<compile_context>
chip_gen: v7x
topology: tpu7x:2x2x1
jax: 0.10.0
libtpu: 0.0.40
codegen_flags: <defaults>
</compile_context>

<pallas_src>
import jax
import jax.numpy as jnp
from jax.experimental import pallas as pl
from jax.experimental.pallas import tpu as pltpu

LN_EPS = 1e-5
BN_EPS = 1e-5
FF_DIM = 2048  # nn.TransformerEncoderLayer default dim_feedforward

LAYER_KEYS = ("wq_h", "bq_h", "wk_h", "bk_h", "wvo_h", "bvo",
              "ln1_g", "ln1_b", "w1", "b1", "w2", "b2", "ln2_g", "ln2_b")
CLF_KEYS = ("wc1_emb", "wc1_num", "bc1", "wc2", "bc2", "wc3", "bc3")


def _layer_norm(x, g, b):
    mu = jnp.mean(x, axis=-1, keepdims=True)
    var = jnp.mean(jnp.square(x - mu), axis=-1, keepdims=True)
    return (x - mu) * jax.lax.rsqrt(var + LN_EPS) * g + b


# ----------------------------------------------------------------------------
# Fused Pallas forward (grid over batch; weights resident in VMEM)
# ----------------------------------------------------------------------------
def forward(prepared, x_cat, x_num=None):
    table = prepared["table"]
    offsets = prepared["offsets"]
    layers = prepared["layers"]
    clf = prepared["classifier"]
    H = prepared["num_heads"]
    S = prepared["num_cats"]
    D = prepared["embed_dim"]
    Dh = D // H
    L = len(layers)
    nL = len(LAYER_KEYS)
    B = x_cat.shape[0]
    NN = clf["wc1_num"].shape[0]
    FF = layers[0]["b1"].shape[1]
    H1 = clf["bc1"].shape[1]
    H2 = clf["bc2"].shape[1]

    # Embedding gather hoisted out of the kernel: one XLA gather on a concatenated table.
    flat_idx = (x_cat.astype(jnp.int32) + offsets[None, :]).reshape(-1)
    emb = jnp.take(table, flat_idx, axis=0).reshape(B, S, D)

    if x_num is None:
        xnum3 = jnp.zeros((B, 1, NN), jnp.float32)
    else:
        assert x_num.shape[1] == prepared["num_numeric"]
        xnum3 = x_num.astype(jnp.float32).reshape(B, 1, NN)

    weights = [lp[k] for lp in layers for k in LAYER_KEYS] + [clf[k] for k in CLF_KEYS]
    nW = len(weights)

    def kernel(emb_ref, xnum_ref, *rest):
        wrefs = rest[:nW]
        logits_ref = rest[nW]
        attn_ref = rest[nW + 1]
        lrefs = wrefs[:L * nL]
        (wc1_emb, wc1_num, bc1, wc2, bc2, wc3, bc3) = wrefs[L * nL:]

        x = emb_ref[0]                                    # (S, D) f32: this sample's tokens

        for l in range(L):
            (wq_h, bq_h, wk_h, bk_h, wvo_h, bvo, ln1g, ln1b,
             w1, b1, w2, b2, ln2g, ln2b) = lrefs[l * nL:(l + 1) * nL]

            xb = x.astype(jnp.bfloat16)
            p_sum = None
            ctx_sum = None
            for h in range(H):                            # accumulate heads; no concats/slices
                q = jnp.dot(xb, wq_h[h], preferred_element_type=jnp.float32) + bq_h[h]
                k = jnp.dot(xb, wk_h[h], preferred_element_type=jnp.float32) + bk_h[h]
                v = jnp.dot(xb, wvo_h[h], preferred_element_type=jnp.float32)  # wo folded in
                s = jax.lax.dot_general(
                    q.astype(jnp.bfloat16), k.astype(jnp.bfloat16),
                    (((1,), (1,)), ((), ())),
                    preferred_element_type=jnp.float32)                         # (S, S)
                s = s - jnp.max(s, axis=-1, keepdims=True)
                e = jnp.exp(s)
                p = e * pl.reciprocal(jnp.sum(e, axis=-1, keepdims=True), approx=True)
                ctx = jnp.dot(p.astype(jnp.bfloat16), v.astype(jnp.bfloat16),
                              preferred_element_type=jnp.float32)               # (S, D)
                p_sum = p if h == 0 else p_sum + p
                ctx_sum = ctx if h == 0 else ctx_sum + ctx

            attn_ref[l, 0] = p_sum * (1.0 / H)            # head-averaged attention weights

            x1 = _layer_norm(x + ctx_sum + bvo[...], ln1g[...], ln1b[...])
            h1 = jnp.maximum(
                jnp.dot(x1.astype(jnp.bfloat16), w1[...],
                        preferred_element_type=jnp.float32) + b1[...], 0.0)
            ff = jnp.dot(h1.astype(jnp.bfloat16), w2[...],
                         preferred_element_type=jnp.float32) + b2[...]
            x = _layer_norm(x1 + ff, ln2g[...], ln2b[...])

        # classifier: per-position (D, H1) weight blocks accumulated -> no (1, S*D) flatten
        acc = jnp.dot(xnum_ref[0].astype(jnp.bfloat16), wc1_num[...],
                      preferred_element_type=jnp.float32)                        # (1, H1)
        for si in range(S):
            acc = acc + jnp.dot(x[si:si + 1, :].astype(jnp.bfloat16), wc1_emb[si],
                                preferred_element_type=jnp.float32)
        hc = jnp.maximum(acc + bc1[...], 0.0)
        hc = jnp.maximum(jnp.dot(hc.astype(jnp.bfloat16), wc2[...],
                                 preferred_element_type=jnp.float32) + bc2[...], 0.0)
        logits_ref[0] = jnp.dot(hc.astype(jnp.bfloat16), wc3[...],
                                preferred_element_type=jnp.float32) + bc3[...]

    def _const_spec(a):
        nd = a.ndim
        return pl.BlockSpec(a.shape, lambda i, _nd=nd: (0,) * _nd)   # resident weight

    in_specs = ([pl.BlockSpec((1, S, D), lambda i: (i, 0, 0)),
                 pl.BlockSpec((1, 1, NN), lambda i: (i, 0, 0))]
                + [_const_spec(a) for a in weights])
    out_specs = (pl.BlockSpec((1, 1, 1), lambda i: (i, 0, 0)),
                 pl.BlockSpec((L, 1, S, S), lambda i: (0, i, 0, 0)))

    flops_layer = (2 * 2 * S * D * Dh * H     # q, k projections
                   + 2 * S * D * D * H        # folded value/output projections
                   + 2 * S * S * Dh * H       # scores
                   + 2 * S * S * D * H        # contexts
                   + 2 * 2 * S * D * FF)      # FFN
    flops_clf = 2 * S * D * H1 + 2 * NN * H1 + 2 * H1 * H2 + 2 * H2
    cost = pl.CostEstimate(
        flops=int(B * (L * flops_layer + flops_clf)),
        transcendentals=int(B * L * H * S * S),
        bytes_accessed=int(sum(int(w.size) * w.dtype.itemsize for w in weights)
                           + emb.size * 4 + xnum3.size * 4 + B * 4 + L * B * S * S * 4))

    logits3, attn = pl.pallas_call(
        kernel,
        grid=(B,),
        in_specs=in_specs,
        out_specs=out_specs,
        out_shape=(jax.ShapeDtypeStruct((B, 1, 1), jnp.float32),
                   jax.ShapeDtypeStruct((L, B, S, S), jnp.float32)),
        compiler_params=pltpu.CompilerParams(dimension_semantics=("parallel",)),
        cost_estimate=cost,
    )(emb, xnum3, *weights)

    logits = logits3.reshape(B, 1)
    return {"logits": logits, "attn_scores": [attn[l] for l in range(L)]}


# ----------------------------------------------------------------------------
# One-time parameter preparation (bf16 conversion, head split, wo/scale/BN folding)
# ----------------------------------------------------------------------------
def prepare_params(params):
    # NOTE: assumes weights are already in x @ W orientation (a real PyTorch checkpoint
    # would need transposes and the in_proj q/k/v split).
    embeds = [jnp.asarray(t, jnp.float32) for t in params["embeds"]]
    D = embeds[0].shape[1]
    S = len(embeds)
    H = int(params["num_heads"])
    Dh = D // H
    scale = 1.0 / float(Dh) ** 0.5

    table = jnp.concatenate(embeds, axis=0)               # (sum(cat_dims), D)
    offs, acc = [], 0
    for t in embeds:
        offs.append(acc)
        acc += t.shape[0]
    offsets = jnp.asarray(offs, jnp.int32)

    def heads_w(w):                                        # (D, D) -> (H, D, Dh) per-head cols
        return jnp.transpose(jnp.reshape(w, (D, H, Dh)), (1, 0, 2))

    def heads_b(b):                                        # (1, D) -> (H, 1, Dh)
        return jnp.reshape(b, (H, Dh))[:, None, :]

    layers = []
    for lp in params["layers"]:
        wv, wo = lp["wv"], lp["wo"]
        # fold output projection into per-head value projection (exact up to softmax-row-sum=1)
        wvo_h = jnp.stack(
            [wv[:, h * Dh:(h + 1) * Dh] @ wo[h * Dh:(h + 1) * Dh, :] for h in range(H)], axis=0)
        layers.append(dict(
            wq_h=(heads_w(lp["wq"]) * scale).astype(jnp.bfloat16),   # 1/sqrt(Dh) folded in
            bq_h=(heads_b(lp["bq"]) * scale).astype(jnp.float32),
            wk_h=heads_w(lp["wk"]).astype(jnp.bfloat16),
            bk_h=heads_b(lp["bk"]).astype(jnp.float32),
            wvo_h=wvo_h.astype(jnp.bfloat16),
            bvo=(lp["bv"] @ wo + lp["bo"]).astype(jnp.float32),
            ln1_g=lp["ln1_g"].astype(jnp.float32), ln1_b=lp["ln1_b"].astype(jnp.float32),
            w1=lp["w1"].astype(jnp.bfloat16), b1=lp["b1"].astype(jnp.float32),
            w2=lp["w2"].astype(jnp.bfloat16), b2=lp["b2"].astype(jnp.float32),
            ln2_g=lp["ln2_g"].astype(jnp.float32), ln2_b=lp["ln2_b"].astype(jnp.float32)))

    cp = params["classifier"]
    s1 = cp["bn1_g"] * jax.lax.rsqrt(cp["bn1_v"] + BN_EPS)
    s2 = cp["bn2_g"] * jax.lax.rsqrt(cp["bn2_v"] + BN_EPS)
    w1f = cp["w1"] * s1
    b1f = (cp["b1"] - cp["bn1_m"]) * s1 + cp["bn1_b"]
    w2f = cp["w2"] * s2
    b2f = (cp["b2"] - cp["bn2_m"]) * s2 + cp["bn2_b"]
    total, width = w1f.shape
    num_numeric = total - S * D
    wc1_emb = jnp.reshape(w1f[:S * D], (S, D, width))      # per-position weight blocks
    wc1_num = w1f[S * D:] if num_numeric > 0 else jnp.zeros((1, width), jnp.float32)
    classifier = dict(
        wc1_emb=wc1_emb.astype(jnp.bfloat16),
        wc1_num=wc1_num.astype(jnp.bfloat16),
        bc1=b1f.astype(jnp.float32),
        wc2=w2f.astype(jnp.bfloat16), bc2=b2f.astype(jnp.float32),
        wc3=cp["w3"].astype(jnp.bfloat16), bc3=cp["b3"].astype(jnp.float32))

    return dict(table=table, offsets=offsets, layers=layers, classifier=classifier,
                num_heads=H, num_cats=S, embed_dim=D, num_numeric=num_numeric)


# ----------------------------------------------------------------------------
# Pure-JAX reference (for correctness check)
# ----------------------------------------------------------------------------
def reference_forward(params, x_cat, x_num=None):
    H = params["num_heads"]
    x = jnp.stack([tab[x_cat[:, i]] for i, tab in enumerate(params["embeds"])], axis=1)
    attn_scores = []
    for lp in params["layers"]:
        B, S, D = x.shape
        Dh = D // H
        q = x @ lp["wq"] + lp["bq"]
        k = x @ lp["wk"] + lp["bk"]
        v = x @ lp["wv"] + lp["bv"]
        qh = q.reshape(B, S, H, Dh).transpose(0, 2, 1, 3)
        kh = k.reshape(B, S, H, Dh).transpose(0, 2, 1, 3)
        vh = v.reshape(B, S, H, Dh).transpose(0, 2, 1, 3)
        s = jnp.einsum("bhqd,bhkd->bhqk", qh, kh) / (Dh ** 0.5)
        p = jax.nn.softmax(s, axis=-1)
        ctx = jnp.einsum("bhqk,bhkd->bhqd", p, vh).transpose(0, 2, 1, 3).reshape(B, S, D)
        attn_out = ctx @ lp["wo"] + lp["bo"]
        x1 = _layer_norm(x + attn_out, lp["ln1_g"], lp["ln1_b"])
        ff = jnp.maximum(x1 @ lp["w1"] + lp["b1"], 0.0) @ lp["w2"] + lp["b2"]
        x = _layer_norm(x1 + ff, lp["ln2_g"], lp["ln2_b"])
        attn_scores.append(p.mean(axis=1))
    x_flat = x.reshape(x.shape[0], -1)
    xc = jnp.concatenate([x_flat, x_num], axis=1) if x_num is not None else x_flat
    cp = params["classifier"]

    def bn(h, g, b, m, v):
        return (h - m) * jax.lax.rsqrt(v + BN_EPS) * g + b

    h = xc @ cp["w1"] + cp["b1"]
    h = jnp.maximum(bn(h, cp["bn1_g"], cp["bn1_b"], cp["bn1_m"], cp["bn1_v"]), 0.0)
    h = h @ cp["w2"] + cp["b2"]
    h = jnp.maximum(bn(h, cp["bn2_g"], cp["bn2_b"], cp["bn2_m"], cp["bn2_v"]), 0.0)
    logits = h @ cp["w3"] + cp["b3"]
    return {"logits": logits, "attn_scores": attn_scores}


# ----------------------------------------------------------------------------
# Deterministic parameter init (synthetic; no checkpoint load)
# ----------------------------------------------------------------------------
def init_params(key, cat_dims, embed_dim=32, num_heads=4, num_layers=2,
                num_numeric=0, ff_dim=FF_DIM):
    keys = jax.random.split(key, 64)
    it = iter(keys)

    def nrm(shape, scale=0.05):
        return (scale * jax.random.normal(next(it), shape)).astype(jnp.float32)

    D = embed_dim
    embeds = [nrm((d, D), 0.1) for d in cat_dims]
    layers = []
    for _ in range(num_layers):
        layers.append(dict(
            wq=nrm((D, D)), bq=nrm((1, D)),
            wk=nrm((D, D)), bk=nrm((1, D)),
            wv=nrm((D, D)), bv=nrm((1, D)),
            wo=nrm((D, D)), bo=nrm((1, D)),
            ln1_g=(1.0 + nrm((1, D), 0.1)), ln1_b=nrm((1, D)),
            w1=nrm((D, ff_dim)), b1=nrm((1, ff_dim)),
            w2=nrm((ff_dim, D)), b2=nrm((1, D)),
            ln2_g=(1.0 + nrm((1, D), 0.1)), ln2_b=nrm((1, D)),
        ))
    total = len(cat_dims) * embed_dim + num_numeric
    classifier = dict(
        w1=nrm((total, 256)), b1=nrm((1, 256)),
        bn1_g=(1.0 + nrm((1, 256), 0.1)), bn1_b=nrm((1, 256)),
        bn1_m=nrm((1, 256), 0.1),
        bn1_v=jax.random.uniform(next(it), (1, 256), minval=0.5, maxval=1.5).astype(jnp.float32),
        w2=nrm((256, 64)), b2=nrm((1, 64)),
        bn2_g=(1.0 + nrm((1, 64), 0.1)), bn2_b=nrm((1, 64)),
        bn2_m=nrm((1, 64), 0.1),
        bn2_v=jax.random.uniform(next(it), (1, 64), minval=0.5, maxval=1.5).astype(jnp.float32),
        w3=nrm((64, 1)), b3=nrm((1, 1)),
    )
    return dict(embeds=embeds, layers=layers, classifier=classifier, num_heads=num_heads)


# ----------------------------------------------------------------------------
if __name__ == "__main__":
    cat_dims = [7, 5, 11, 6, 9, 8]        # 6 categorical features
    embed_dim, num_heads, num_layers, num_numeric = 32, 4, 2, 3
    B = 4

    key = jax.random.PRNGKey(0)
    kp, kc, kn = jax.random.split(key, 3)
    params = init_params(kp, cat_dims, embed_dim, num_heads, num_layers, num_numeric)
    prepared = prepare_params(params)     # one-time layout conversion / folding

    ck = jax.random.split(kc, len(cat_dims))
    x_cat = jnp.stack(
        [jax.random.randint(ck[i], (B,), 0, cat_dims[i]) for i in range(len(cat_dims))],
        axis=1).astype(jnp.int32)                                   # (B, 6) category indices
    x_num = jax.random.normal(kn, (B, num_numeric), dtype=jnp.float32)

    out = forward(prepared, x_cat, x_num)
    jax.block_until_ready(out)

    with jax.default_matmul_precision("highest"):
        ref = reference_forward(params, x_cat, x_num)

    assert out["logits"].shape == (B, 1)
    assert len(out["attn_scores"]) == num_layers
    assert all(a.shape == (B, len(cat_dims), len(cat_dims)) for a in out["attn_scores"])
    logit_err = float(jnp.max(jnp.abs(out["logits"] - ref["logits"])))
    assert jnp.allclose(out["logits"], ref["logits"], atol=1e-2, rtol=2e-2), logit_err
    for a, r in zip(out["attn_scores"], ref["attn_scores"]):
        assert jnp.allclose(a, r, atol=2e-3, rtol=2e-2), float(jnp.max(jnp.abs(a - r)))

    print("KERNEL_OK")
</pallas_src>

<mosaic_0001>
module attributes {stable_mosaic.version = 11 : i64} {
  func.func @kernel(%arg0: i32, %arg1: memref<1x6x32xf32, #tpu.memory_space<vmem>>, %arg2: memref<1x1x3xf32, #tpu.memory_space<vmem>>, %arg3: memref<4x32x8xbf16, #tpu.memory_space<vmem>>, %arg4: memref<4x1x8xf32, #tpu.memory_space<vmem>>, %arg5: memref<4x32x8xbf16, #tpu.memory_space<vmem>>, %arg6: memref<4x1x8xf32, #tpu.memory_space<vmem>>, %arg7: memref<4x32x32xbf16, #tpu.memory_space<vmem>>, %arg8: memref<1x32xf32, #tpu.memory_space<vmem>>, %arg9: memref<1x32xf32, #tpu.memory_space<vmem>>, %arg10: memref<1x32xf32, #tpu.memory_space<vmem>>, %arg11: memref<32x2048xbf16, #tpu.memory_space<vmem>>, %arg12: memref<1x2048xf32, #tpu.memory_space<vmem>>, %arg13: memref<2048x32xbf16, #tpu.memory_space<vmem>>, %arg14: memref<1x32xf32, #tpu.memory_space<vmem>>, %arg15: memref<1x32xf32, #tpu.memory_space<vmem>>, %arg16: memref<1x32xf32, #tpu.memory_space<vmem>>, %arg17: memref<4x32x8xbf16, #tpu.memory_space<vmem>>, %arg18: memref<4x1x8xf32, #tpu.memory_space<vmem>>, %arg19: memref<4x32x8xbf16, #tpu.memory_space<vmem>>, %arg20: memref<4x1x8xf32, #tpu.memory_space<vmem>>, %arg21: memref<4x32x32xbf16, #tpu.memory_space<vmem>>, %arg22: memref<1x32xf32, #tpu.memory_space<vmem>>, %arg23: memref<1x32xf32, #tpu.memory_space<vmem>>, %arg24: memref<1x32xf32, #tpu.memory_space<vmem>>, %arg25: memref<32x2048xbf16, #tpu.memory_space<vmem>>, %arg26: memref<1x2048xf32, #tpu.memory_space<vmem>>, %arg27: memref<2048x32xbf16, #tpu.memory_space<vmem>>, %arg28: memref<1x32xf32, #tpu.memory_space<vmem>>, %arg29: memref<1x32xf32, #tpu.memory_space<vmem>>, %arg30: memref<1x32xf32, #tpu.memory_space<vmem>>, %arg31: memref<6x32x256xbf16, #tpu.memory_space<vmem>>, %arg32: memref<3x256xbf16, #tpu.memory_space<vmem>>, %arg33: memref<1x256xf32, #tpu.memory_space<vmem>>, %arg34: memref<256x64xbf16, #tpu.memory_space<vmem>>, %arg35: memref<1x64xf32, #tpu.memory_space<vmem>>, %arg36: memref<64x1xbf16, #tpu.memory_space<vmem>>, %arg37: memref<1x1xf32, #tpu.memory_space<vmem>>, %arg38: memref<1x1x1xf32, #tpu.memory_space<vmem>>, %arg39: memref<2x1x6x6xf32, #tpu.memory_space<vmem>>) attributes {dimension_semantics = [#tpu.dimension_semantics<parallel>], iteration_bounds = array<i64: 4>, scalar_prefetch = 0 : i64, scratch_operands = 0 : i64, tpu.core_type = #tpu.core_type<tc>, window_params = [{transform_indices = @transform_0, window_bounds = array<i64: 1, 6, 32>}, {transform_indices = @transform_1, window_bounds = array<i64: 1, 1, 3>}, {pipeline_mode = #tpu.pipeline_mode<synchronous>, transform_indices = @transform_2, window_bounds = array<i64: 4, 32, 8>}, {pipeline_mode = #tpu.pipeline_mode<synchronous>, transform_indices = @transform_3, window_bounds = array<i64: 4, 1, 8>}, {pipeline_mode = #tpu.pipeline_mode<synchronous>, transform_indices = @transform_4, window_bounds = array<i64: 4, 32, 8>}, {pipeline_mode = #tpu.pipeline_mode<synchronous>, transform_indices = @transform_5, window_bounds = array<i64: 4, 1, 8>}, {pipeline_mode = #tpu.pipeline_mode<synchronous>, transform_indices = @transform_6, window_bounds = array<i64: 4, 32, 32>}, {pipeline_mode = #tpu.pipeline_mode<synchronous>, transform_indices = @transform_7, window_bounds = array<i64: 1, 32>}, {pipeline_mode = #tpu.pipeline_mode<synchronous>, transform_indices = @transform_8, window_bounds = array<i64: 1, 32>}, {pipeline_mode = #tpu.pipeline_mode<synchronous>, transform_indices = @transform_9, window_bounds = array<i64: 1, 32>}, {pipeline_mode = #tpu.pipeline_mode<synchronous>, transform_indices = @transform_10, window_bounds = array<i64: 32, 2048>}, {pipeline_mode = #tpu.pipeline_mode<synchronous>, transform_indices = @transform_11, window_bounds = array<i64: 1, 2048>}, {pipeline_mode = #tpu.pipeline_mode<synchronous>, transform_indices = @transform_12, window_bounds = array<i64: 2048, 32>}, {pipeline_mode = #tpu.pipeline_mode<synchronous>, transform_indices = @transform_13, window_bounds = array<i64: 1, 32>}, {pipeline_mode = #tpu.pipeline_mode<synchronous>, transform_indices = @transform_14, window_bounds = array<i64: 1, 32>}, {pipeline_mode = #tpu.pipeline_mode<synchronous>, transform_indices = @transform_15, window_bounds = array<i64: 1, 32>}, {pipeline_mode = #tpu.pipeline_mode<synchronous>, transform_indices = @transform_16, window_bounds = array<i64: 4, 32, 8>}, {pipeline_mode = #tpu.pipeline_mode<synchronous>, transform_indices = @transform_17, window_bounds = array<i64: 4, 1, 8>}, {pipeline_mode = #tpu.pipeline_mode<synchronous>, transform_indices = @transform_18, window_bounds = array<i64: 4, 32, 8>}, {pipeline_mode = #tpu.pipeline_mode<synchronous>, transform_indices = @transform_19, window_bounds = array<i64: 4, 1, 8>}, {pipeline_mode = #tpu.pipeline_mode<synchronous>, transform_indices = @transform_20, window_bounds = array<i64: 4, 32, 32>}, {pipeline_mode = #tpu.pipeline_mode<synchronous>, transform_indices = @transform_21, window_bounds = array<i64: 1, 32>}, {pipeline_mode = #tpu.pipeline_mode<synchronous>, transform_indices = @transform_22, window_bounds = array<i64: 1, 32>}, {pipeline_mode = #tpu.pipeline_mode<synchronous>, transform_indices = @transform_23, window_bounds = array<i64: 1, 32>}, {pipeline_mode = #tpu.pipeline_mode<synchronous>, transform_indices = @transform_24, window_bounds = array<i64: 32, 2048>}, {pipeline_mode = #tpu.pipeline_mode<synchronous>, transform_indices = @transform_25, window_bounds = array<i64: 1, 2048>}, {pipeline_mode = #tpu.pipeline_mode<synchronous>, transform_indices = @transform_26, window_bounds = array<i64: 2048, 32>}, {pipeline_mode = #tpu.pipeline_mode<synchronous>, transform_indices = @transform_27, window_bounds = array<i64: 1, 32>}, {pipeline_mode = #tpu.pipeline_mode<synchronous>, transform_indices = @transform_28, window_bounds = array<i64: 1, 32>}, {pipeline_mode = #tpu.pipeline_mode<synchronous>, transform_indices = @transform_29, window_bounds = array<i64: 1, 32>}, {pipeline_mode = #tpu.pipeline_mode<synchronous>, transform_indices = @transform_30, window_bounds = array<i64: 6, 32, 256>}, {pipeline_mode = #tpu.pipeline_mode<synchronous>, transform_indices = @transform_31, window_bounds = array<i64: 3, 256>}, {pipeline_mode = #tpu.pipeline_mode<synchronous>, transform_indices = @transform_32, window_bounds = array<i64: 1, 256>}, {pipeline_mode = #tpu.pipeline_mode<synchronous>, transform_indices = @transform_33, window_bounds = array<i64: 256, 64>}, {pipeline_mode = #tpu.pipeline_mode<synchronous>, transform_indices = @transform_34, window_bounds = array<i64: 1, 64>}, {pipeline_mode = #tpu.pipeline_mode<synchronous>, transform_indices = @transform_35, window_bounds = array<i64: 64, 1>}, {pipeline_mode = #tpu.pipeline_mode<synchronous>, transform_indices = @transform_36, window_bounds = array<i64: 1, 1>}, {transform_indices = @transform_37, window_bounds = array<i64: 1, 1, 1>}, {transform_indices = @transform_38, window_bounds = array<i64: 2, 1, 6, 6>}]} {
    %c0 = arith.constant 0 : index
    %c0_0 = arith.constant 0 : index
    %c0_1 = arith.constant 0 : index
    %0 = vector.load %arg1[%c0, %c0_0, %c0_1] : memref<1x6x32xf32, #tpu.memory_space<vmem>>, vector<1x6x32xf32>
    %1 = vector.shape_cast %0 : vector<1x6x32xf32> to vector<6x32xf32>
    %2 = arith.truncf %1 : vector<6x32xf32> to vector<6x32xbf16>
    %c0_2 = arith.constant 0 : index
    %c0_3 = arith.constant 0 : index
    %c0_4 = arith.constant 0 : index
    %3 = vector.load %arg3[%c0_2, %c0_3, %c0_4] : memref<4x32x8xbf16, #tpu.memory_space<vmem>>, vector<1x32x8xbf16>
    %4 = vector.shape_cast %3 : vector<1x32x8xbf16> to vector<32x8xbf16>
    %cst = arith.constant dense<0.000000e+00> : vector<6x8xf32>
    %5 = tpu.matmul %2, %4, %cst {dimension_numbers = #tpu.dot_dimension_numbers<[1], [0], [0], [1], [0, 0, 1, 1], [], []>} : vector<6x32xbf16>, vector<32x8xbf16>, vector<6x8xf32> -> vector<6x8xf32>
    %c0_5 = arith.constant 0 : index
    %c0_6 = arith.constant 0 : index
    %c0_7 = arith.constant 0 : index
    %6 = vector.load %arg4[%c0_5, %c0_6, %c0_7] : memref<4x1x8xf32, #tpu.memory_space<vmem>>, vector<1x1x8xf32>
    %7 = vector.shape_cast %6 : vector<1x1x8xf32> to vector<1x8xf32>
    %8 = vector.broadcast %7 : vector<1x8xf32> to vector<6x8xf32>
    %9 = arith.addf %5, %8 : vector<6x8xf32>
    %c0_8 = arith.constant 0 : index
    %c0_9 = arith.constant 0 : index
    %c0_10 = arith.constant 0 : index
    %10 = vector.load %arg5[%c0_8, %c0_9, %c0_10] : memref<4x32x8xbf16, #tpu.memory_space<vmem>>, vector<1x32x8xbf16>
    %11 = vector.shape_cast %10 : vector<1x32x8xbf16> to vector<32x8xbf16>
    %cst_11 = arith.constant dense<0.000000e+00> : vector<6x8xf32>
    %12 = tpu.matmul %2, %11, %cst_11 {dimension_numbers = #tpu.dot_dimension_numbers<[1], [0], [0], [1], [0, 0, 1, 1], [], []>} : vector<6x32xbf16>, vector<32x8xbf16>, vector<6x8xf32> -> vector<6x8xf32>
    %c0_12 = arith.constant 0 : index
    %c0_13 = arith.constant 0 : index
    %c0_14 = arith.constant 0 : index
    %13 = vector.load %arg6[%c0_12, %c0_13, %c0_14] : memref<4x1x8xf32, #tpu.memory_space<vmem>>, vector<1x1x8xf32>
    %14 = vector.shape_cast %13 : vector<1x1x8xf32> to vector<1x8xf32>
    %15 = vector.broadcast %14 : vector<1x8xf32> to vector<6x8xf32>
    %16 = arith.addf %12, %15 : vector<6x8xf32>
    %c0_15 = arith.constant 0 : index
    %c0_16 = arith.constant 0 : index
    %c0_17 = arith.constant 0 : index
    %17 = vector.load %arg7[%c0_15, %c0_16, %c0_17] : memref<4x32x32xbf16, #tpu.memory_space<vmem>>, vector<1x32x32xbf16>
    %18 = vector.shape_cast %17 : vector<1x32x32xbf16> to vector<32x32xbf16>
    %cst_18 = arith.constant dense<0.000000e+00> : vector<6x32xf32>
    %19 = tpu.matmul %2, %18, %cst_18 {dimension_numbers = #tpu.dot_dimension_numbers<[1], [0], [0], [1], [0, 0, 1, 1], [], []>} : vector<6x32xbf16>, vector<32x32xbf16>, vector<6x32xf32> -> vector<6x32xf32>
    %20 = arith.truncf %9 : vector<6x8xf32> to vector<6x8xbf16>
    %21 = arith.truncf %16 : vector<6x8xf32> to vector<6x8xbf16>
    %cst_19 = arith.constant dense<0.000000e+00> : vector<6x6xf32>
    %22 = tpu.matmul %20, %21, %cst_19 {dimension_numbers = #tpu.dot_dimension_numbers<[1], [1], [0], [0], [0, 0, 1, 0], [], []>} : vector<6x8xbf16>, vector<6x8xbf16>, vector<6x6xf32> -> vector<6x6xf32>
    %cst_20 = arith.constant dense<0xFF800000> : vector<6xf32>
    %23 = vector.multi_reduction <maximumf>, %22, %cst_20 [1] : vector<6x6xf32> to vector<6xf32>
    %24 = vector.shape_cast %23 : vector<6xf32> to vector<6x1xf32>
    %25 = vector.broadcast %24 : vector<6x1xf32> to vector<6x6xf32>
    %26 = arith.subf %22, %25 : vector<6x6xf32>
    %27 = math.exp %26 : vector<6x6xf32>
    %cst_21 = arith.constant dense<0.000000e+00> : vector<6xf32>
    %28 = vector.multi_reduction <add>, %27, %cst_21 [1] : vector<6x6xf32> to vector<6xf32>
    %29 = vector.shape_cast %28 : vector<6xf32> to vector<6x1xf32>
    %30 = tpu.reciprocal %29 {approx = true} : vector<6x1xf32> -> vector<6x1xf32>
    %31 = vector.broadcast %30 : vector<6x1xf32> to vector<6x6xf32>
    %32 = arith.mulf %27, %31 : vector<6x6xf32>
    %33 = arith.truncf %32 : vector<6x6xf32> to vector<6x6xbf16>
    %34 = arith.truncf %19 : vector<6x32xf32> to vector<6x32xbf16>
    %cst_22 = arith.constant dense<0.000000e+00> : vector<6x32xf32>
    %35 = tpu.matmul %33, %34, %cst_22 {dimension_numbers = #tpu.dot_dimension_numbers<[1], [0], [0], [1], [0, 0, 1, 1], [], []>} : vector<6x6xbf16>, vector<6x32xbf16>, vector<6x32xf32> -> vector<6x32xf32>
    %c1 = arith.constant 1 : index
    %c0_23 = arith.constant 0 : index
    %c0_24 = arith.constant 0 : index
    %36 = vector.load %arg3[%c1, %c0_23, %c0_24] : memref<4x32x8xbf16, #tpu.memory_space<vmem>>, vector<1x32x8xbf16>
    %37 = vector.shape_cast %36 : vector<1x32x8xbf16> to vector<32x8xbf16>
    %cst_25 = arith.constant dense<0.000000e+00> : vector<6x8xf32>
    %38 = tpu.matmul %2, %37, %cst_25 {dimension_numbers = #tpu.dot_dimension_numbers<[1], [0], [0], [1], [0, 0, 1, 1], [], []>} : vector<6x32xbf16>, vector<32x8xbf16>, vector<6x8xf32> -> vector<6x8xf32>
    %c1_26 = arith.constant 1 : index
    %c0_27 = arith.constant 0 : index
    %c0_28 = arith.constant 0 : index
    %39 = vector.load %arg4[%c1_26, %c0_27, %c0_28] : memref<4x1x8xf32, #tpu.memory_space<vmem>>, vector<1x1x8xf32>
    %40 = vector.shape_cast %39 : vector<1x1x8xf32> to vector<1x8xf32>
    %41 = vector.broadcast %40 : vector<1x8xf32> to vector<6x8xf32>
    %42 = arith.addf %38, %41 : vector<6x8xf32>
    %c1_29 = arith.constant 1 : index
    %c0_30 = arith.constant 0 : index
    %c0_31 = arith.constant 0 : index
    %43 = vector.load %arg5[%c1_29, %c0_30, %c0_31] : memref<4x32x8xbf16, #tpu.memory_space<vmem>>, vector<1x32x8xbf16>
    %44 = vector.shape_cast %43 : vector<1x32x8xbf16> to vector<32x8xbf16>
    %cst_32 = arith.constant dense<0.000000e+00> : vector<6x8xf32>
    %45 = tpu.matmul %2, %44, %cst_32 {dimension_numbers = #tpu.dot_dimension_numbers<[1], [0], [0], [1], [0, 0, 1, 1], [], []>} : vector<6x32xbf16>, vector<32x8xbf16>, vector<6x8xf32> -> vector<6x8xf32>
    %c1_33 = arith.constant 1 : index
    %c0_34 = arith.constant 0 : index
    %c0_35 = arith.constant 0 : index
    %46 = vector.load %arg6[%c1_33, %c0_34, %c0_35] : memref<4x1x8xf32, #tpu.memory_space<vmem>>, vector<1x1x8xf32>
    %47 = vector.shape_cast %46 : vector<1x1x8xf32> to vector<1x8xf32>
    %48 = vector.broadcast %47 : vector<1x8xf32> to vector<6x8xf32>
    %49 = arith.addf %45, %48 : vector<6x8xf32>
    %c1_36 = arith.constant 1 : index
    %c0_37 = arith.constant 0 : index
    %c0_38 = arith.constant 0 : index
    %50 = vector.load %arg7[%c1_36, %c0_37, %c0_38] : memref<4x32x32xbf16, #tpu.memory_space<vmem>>, vector<1x32x32xbf16>
    %51 = vector.shape_cast %50 : vector<1x32x32xbf16> to vector<32x32xbf16>
    %cst_39 = arith.constant dense<0.000000e+00> : vector<6x32xf32>
    %52 = tpu.matmul %2, %51, %cst_39 {dimension_numbers = #tpu.dot_dimension_numbers<[1], [0], [0], [1], [0, 0, 1, 1], [], []>} : vector<6x32xbf16>, vector<32x32xbf16>, vector<6x32xf32> -> vector<6x32xf32>
    %53 = arith.truncf %42 : vector<6x8xf32> to vector<6x8xbf16>
    %54 = arith.truncf %49 : vector<6x8xf32> to vector<6x8xbf16>
    %cst_40 = arith.constant dense<0.000000e+00> : vector<6x6xf32>
    %55 = tpu.matmul %53, %54, %cst_40 {dimension_numbers = #tpu.dot_dimension_numbers<[1], [1], [0], [0], [0, 0, 1, 0], [], []>} : vector<6x8xbf16>, vector<6x8xbf16>, vector<6x6xf32> -> vector<6x6xf32>
    %cst_41 = arith.constant dense<0xFF800000> : vector<6xf32>
    %56 = vector.multi_reduction <maximumf>, %55, %cst_41 [1] : vector<6x6xf32> to vector<6xf32>
    %57 = vector.shape_cast %56 : vector<6xf32> to vector<6x1xf32>
    %58 = vector.broadcast %57 : vector<6x1xf32> to vector<6x6xf32>
    %59 = arith.subf %55, %58 : vector<6x6xf32>
    %60 = math.exp %59 : vector<6x6xf32>
    %cst_42 = arith.constant dense<0.000000e+00> : vector<6xf32>
    %61 = vector.multi_reduction <add>, %60, %cst_42 [1] : vector<6x6xf32> to vector<6xf32>
    %62 = vector.shape_cast %61 : vector<6xf32> to vector<6x1xf32>
    %63 = tpu.reciprocal %62 {approx = true} : vector<6x1xf32> -> vector<6x1xf32>
    %64 = vector.broadcast %63 : vector<6x1xf32> to vector<6x6xf32>
    %65 = arith.mulf %60, %64 : vector<6x6xf32>
    %66 = arith.truncf %65 : vector<6x6xf32> to vector<6x6xbf16>
    %67 = arith.truncf %52 : vector<6x32xf32> to vector<6x32xbf16>
    %cst_43 = arith.constant dense<0.000000e+00> : vector<6x32xf32>
    %68 = tpu.matmul %66, %67, %cst_43 {dimension_numbers = #tpu.dot_dimension_numbers<[1], [0], [0], [1], [0, 0, 1, 1], [], []>} : vector<6x6xbf16>, vector<6x32xbf16>, vector<6x32xf32> -> vector<6x32xf32>
    %69 = arith.addf %32, %65 : vector<6x6xf32>
    %70 = arith.addf %35, %68 : vector<6x32xf32>
    %c2 = arith.constant 2 : index
    %c0_44 = arith.constant 0 : index
    %c0_45 = arith.constant 0 : index
    %71 = vector.load %arg3[%c2, %c0_44, %c0_45] : memref<4x32x8xbf16, #tpu.memory_space<vmem>>, vector<1x32x8xbf16>
    %72 = vector.shape_cast %71 : vector<1x32x8xbf16> to vector<32x8xbf16>
    %cst_46 = arith.constant dense<0.000000e+00> : vector<6x8xf32>
    %73 = tpu.matmul %2, %72, %cst_46 {dimension_numbers = #tpu.dot_dimension_numbers<[1], [0], [0], [1], [0, 0, 1, 1], [], []>} : vector<6x32xbf16>, vector<32x8xbf16>, vector<6x8xf32> -> vector<6x8xf32>
    %c2_47 = arith.constant 2 : index
    %c0_48 = arith.constant 0 : index
    %c0_49 = arith.constant 0 : index
    %74 = vector.load %arg4[%c2_47, %c0_48, %c0_49] : memref<4x1x8xf32, #tpu.memory_space<vmem>>, vector<1x1x8xf32>
    %75 = vector.shape_cast %74 : vector<1x1x8xf32> to vector<1x8xf32>
    %76 = vector.broadcast %75 : vector<1x8xf32> to vector<6x8xf32>
    %77 = arith.addf %73, %76 : vector<6x8xf32>
    %c2_50 = arith.constant 2 : index
    %c0_51 = arith.constant 0 : index
    %c0_52 = arith.constant 0 : index
    %78 = vector.load %arg5[%c2_50, %c0_51, %c0_52] : memref<4x32x8xbf16, #tpu.memory_space<vmem>>, vector<1x32x8xbf16>
    %79 = vector.shape_cast %78 : vector<1x32x8xbf16> to vector<32x8xbf16>
    %cst_53 = arith.constant dense<0.000000e+00> : vector<6x8xf32>
    %80 = tpu.matmul %2, %79, %cst_53 {dimension_numbers = #tpu.dot_dimension_numbers<[1], [0], [0], [1], [0, 0, 1, 1], [], []>} : vector<6x32xbf16>, vector<32x8xbf16>, vector<6x8xf32> -> vector<6x8xf32>
    %c2_54 = arith.constant 2 : index
    %c0_55 = arith.constant 0 : index
    %c0_56 = arith.constant 0 : index
    %81 = vector.load %arg6[%c2_54, %c0_55, %c0_56] : memref<4x1x8xf32, #tpu.memory_space<vmem>>, vector<1x1x8xf32>
    %82 = vector.shape_cast %81 : vector<1x1x8xf32> to vector<1x8xf32>
    %83 = vector.broadcast %82 : vector<1x8xf32> to vector<6x8xf32>
    %84 = arith.addf %80, %83 : vector<6x8xf32>
    %c2_57 = arith.constant 2 : index
    %c0_58 = arith.constant 0 : index
    %c0_59 = arith.constant 0 : index
    %85 = vector.load %arg7[%c2_57, %c0_58, %c0_59] : memref<4x32x32xbf16, #tpu.memory_space<vmem>>, vector<1x32x32xbf16>
    %86 = vector.shape_cast %85 : vector<1x32x32xbf16> to vector<32x32xbf16>
    %cst_60 = arith.constant dense<0.000000e+00> : vector<6x32xf32>
    %87 = tpu.matmul %2, %86, %cst_60 {dimension_numbers = #tpu.dot_dimension_numbers<[1], [0], [0], [1], [0, 0, 1, 1], [], []>} : vector<6x32xbf16>, vector<32x32xbf16>, vector<6x32xf32> -> vector<6x32xf32>
    %88 = arith.truncf %77 : vector<6x8xf32> to vector<6x8xbf16>
    %89 = arith.truncf %84 : vector<6x8xf32> to vector<6x8xbf16>
    %cst_61 = arith.constant dense<0.000000e+00> : vector<6x6xf32>
    %90 = tpu.matmul %88, %89, %cst_61 {dimension_numbers = #tpu.dot_dimension_numbers<[1], [1], [0], [0], [0, 0, 1, 0], [], []>} : vector<6x8xbf16>, vector<6x8xbf16>, vector<6x6xf32> -> vector<6x6xf32>
    %cst_62 = arith.constant dense<0xFF800000> : vector<6xf32>
    %91 = vector.multi_reduction <maximumf>, %90, %cst_62 [1] : vector<6x6xf32> to vector<6xf32>
    %92 = vector.shape_cast %91 : vector<6xf32> to vector<6x1xf32>
    %93 = vector.broadcast %92 : vector<6x1xf32> to vector<6x6xf32>
    %94 = arith.subf %90, %93 : vector<6x6xf32>
    %95 = math.exp %94 : vector<6x6xf32>
    %cst_63 = arith.constant dense<0.000000e+00> : vector<6xf32>
    %96 = vector.multi_reduction <add>, %95, %cst_63 [1] : vector<6x6xf32> to vector<6xf32>
    %97 = vector.shape_cast %96 : vector<6xf32> to vector<6x1xf32>
    %98 = tpu.reciprocal %97 {approx = true} : vector<6x1xf32> -> vector<6x1xf32>
    %99 = vector.broadcast %98 : vector<6x1xf32> to vector<6x6xf32>
    %100 = arith.mulf %95, %99 : vector<6x6xf32>
    %101 = arith.truncf %100 : vector<6x6xf32> to vector<6x6xbf16>
    %102 = arith.truncf %87 : vector<6x32xf32> to vector<6x32xbf16>
    %cst_64 = arith.constant dense<0.000000e+00> : vector<6x32xf32>
    %103 = tpu.matmul %101, %102, %cst_64 {dimension_numbers = #tpu.dot_dimension_numbers<[1], [0], [0], [1], [0, 0, 1, 1], [], []>} : vector<6x6xbf16>, vector<6x32xbf16>, vector<6x32xf32> -> vector<6x32xf32>
    %104 = arith.addf %69, %100 : vector<6x6xf32>
    %105 = arith.addf %70, %103 : vector<6x32xf32>
    %c3 = arith.constant 3 : index
    %c0_65 = arith.constant 0 : index
    %c0_66 = arith.constant 0 : index
    %106 = vector.load %arg3[%c3, %c0_65, %c0_66] : memref<4x32x8xbf16, #tpu.memory_space<vmem>>, vector<1x32x8xbf16>
    %107 = vector.shape_cast %106 : vector<1x32x8xbf16> to vector<32x8xbf16>
    %cst_67 = arith.constant dense<0.000000e+00> : vector<6x8xf32>
    %108 = tpu.matmul %2, %107, %cst_67 {dimension_numbers = #tpu.dot_dimension_numbers<[1], [0], [0], [1], [0, 0, 1, 1], [], []>} : vector<6x32xbf16>, vector<32x8xbf16>, vector<6x8xf32> -> vector<6x8xf32>
    %c3_68 = arith.constant 3 : index
    %c0_69 = arith.constant 0 : index
    %c0_70 = arith.constant 0 : index
    %109 = vector.load %arg4[%c3_68, %c0_69, %c0_70] : memref<4x1x8xf32, #tpu.memory_space<vmem>>, vector<1x1x8xf32>
    %110 = vector.shape_cast %109 : vector<1x1x8xf32> to vector<1x8xf32>
    %111 = vector.broadcast %110 : vector<1x8xf32> to vector<6x8xf32>
    %112 = arith.addf %108, %111 : vector<6x8xf32>
    %c3_71 = arith.constant 3 : index
    %c0_72 = arith.constant 0 : index
    %c0_73 = arith.constant 0 : index
    %113 = vector.load %arg5[%c3_71, %c0_72, %c0_73] : memref<4x32x8xbf16, #tpu.memory_space<vmem>>, vector<1x32x8xbf16>
    %114 = vector.shape_cast %113 : vector<1x32x8xbf16> to vector<32x8xbf16>
    %cst_74 = arith.constant dense<0.000000e+00> : vector<6x8xf32>
    %115 = tpu.matmul %2, %114, %cst_74 {dimension_numbers = #tpu.dot_dimension_numbers<[1], [0], [0], [1], [0, 0, 1, 1], [], []>} : vector<6x32xbf16>, vector<32x8xbf16>, vector<6x8xf32> -> vector<6x8xf32>
    %c3_75 = arith.constant 3 : index
    %c0_76 = arith.constant 0 : index
    %c0_77 = arith.constant 0 : index
    %116 = vector.load %arg6[%c3_75, %c0_76, %c0_77] : memref<4x1x8xf32, #tpu.memory_space<vmem>>, vector<1x1x8xf32>
    %117 = vector.shape_cast %116 : vector<1x1x8xf32> to vector<1x8xf32>
    %118 = vector.broadcast %117 : vector<1x8xf32> to vector<6x8xf32>
    %119 = arith.addf %115, %118 : vector<6x8xf32>
    %c3_78 = arith.constant 3 : index
    %c0_79 = arith.constant 0 : index
    %c0_80 = arith.constant 0 : index
    %120 = vector.load %arg7[%c3_78, %c0_79, %c0_80] : memref<4x32x32xbf16, #tpu.memory_space<vmem>>, vector<1x32x32xbf16>
    %121 = vector.shape_cast %120 : vector<1x32x32xbf16> to vector<32x32xbf16>
    %cst_81 = arith.constant dense<0.000000e+00> : vector<6x32xf32>
    %122 = tpu.matmul %2, %121, %cst_81 {dimension_numbers = #tpu.dot_dimension_numbers<[1], [0], [0], [1], [0, 0, 1, 1], [], []>} : vector<6x32xbf16>, vector<32x32xbf16>, vector<6x32xf32> -> vector<6x32xf32>
    %123 = arith.truncf %112 : vector<6x8xf32> to vector<6x8xbf16>
    %124 = arith.truncf %119 : vector<6x8xf32> to vector<6x8xbf16>
    %cst_82 = arith.constant dense<0.000000e+00> : vector<6x6xf32>
    %125 = tpu.matmul %123, %124, %cst_82 {dimension_numbers = #tpu.dot_dimension_numbers<[1], [1], [0], [0], [0, 0, 1, 0], [], []>} : vector<6x8xbf16>, vector<6x8xbf16>, vector<6x6xf32> -> vector<6x6xf32>
    %cst_83 = arith.constant dense<0xFF800000> : vector<6xf32>
    %126 = vector.multi_reduction <maximumf>, %125, %cst_83 [1] : vector<6x6xf32> to vector<6xf32>
    %127 = vector.shape_cast %126 : vector<6xf32> to vector<6x1xf32>
    %128 = vector.broadcast %127 : vector<6x1xf32> to vector<6x6xf32>
    %129 = arith.subf %125, %128 : vector<6x6xf32>
    %130 = math.exp %129 : vector<6x6xf32>
    %cst_84 = arith.constant dense<0.000000e+00> : vector<6xf32>
    %131 = vector.multi_reduction <add>, %130, %cst_84 [1] : vector<6x6xf32> to vector<6xf32>
    %132 = vector.shape_cast %131 : vector<6xf32> to vector<6x1xf32>
    %133 = tpu.reciprocal %132 {approx = true} : vector<6x1xf32> -> vector<6x1xf32>
    %134 = vector.broadcast %133 : vector<6x1xf32> to vector<6x6xf32>
    %135 = arith.mulf %130, %134 : vector<6x6xf32>
    %136 = arith.truncf %135 : vector<6x6xf32> to vector<6x6xbf16>
    %137 = arith.truncf %122 : vector<6x32xf32> to vector<6x32xbf16>
    %cst_85 = arith.constant dense<0.000000e+00> : vector<6x32xf32>
    %138 = tpu.matmul %136, %137, %cst_85 {dimension_numbers = #tpu.dot_dimension_numbers<[1], [0], [0], [1], [0, 0, 1, 1], [], []>} : vector<6x6xbf16>, vector<6x32xbf16>, vector<6x32xf32> -> vector<6x32xf32>
    %139 = arith.addf %104, %135 : vector<6x6xf32>
    %140 = arith.addf %105, %138 : vector<6x32xf32>
    %cst_86 = arith.constant 2.500000e-01 : f32
    %141 = vector.broadcast %cst_86 : f32 to vector<6x6xf32>
    %142 = arith.mulf %139, %141 : vector<6x6xf32>
    %c0_87 = arith.constant 0 : index
    %c0_88 = arith.constant 0 : index
    %c0_89 = arith.constant 0 : index
    %c0_90 = arith.constant 0 : index
    %143 = vector.load %arg39[%c0_87, %c0_88, %c0_89, %c0_90] : memref<2x1x6x6xf32, #tpu.memory_space<vmem>>, vector<1x1x6x6xf32>
    %144 = vector.shape_cast %143 : vector<1x1x6x6xf32> to vector<6x6xf32>
    %145 = vector.shape_cast %142 : vector<6x6xf32> to vector<1x1x6x6xf32>
    tpu.vector_store %arg39[%c0_87, %c0_88, %c0_89, %c0_90], %145 {strides = array<i32>} : memref<2x1x6x6xf32, #tpu.memory_space<vmem>>, vector<1x1x6x6xf32>,
    %146 = arith.addf %1, %140 : vector<6x32xf32>
    %c0_91 = arith.constant 0 : index
    %c0_92 = arith.constant 0 : index
    %147 = vector.load %arg8[%c0_91, %c0_92] : memref<1x32xf32, #tpu.memory_space<vmem>>, vector<1x32xf32>
    %148 = vector.broadcast %147 : vector<1x32xf32> to vector<6x32xf32>
    %149 = arith.addf %146, %148 : vector<6x32xf32>
    %c0_93 = arith.constant 0 : index
    %c0_94 = arith.constant 0 : index
    %150 = vector.load %arg9[%c0_93, %c0_94] : memref<1x32xf32, #tpu.memory_space<vmem>>, vector<1x32xf32>
    %c0_95 = arith.constant 0 : index
    %c0_96 = arith.constant 0 : index
    %151 = vector.load %arg10[%c0_95, %c0_96] : memref<1x32xf32, #tpu.memory_space<vmem>>, vector<1x32xf32>
    %cst_97 = arith.constant dense<0.000000e+00> : vector<6xf32>
    %152 = vector.multi_reduction <add>, %149, %cst_97 [1] : vector<6x32xf32> to vector<6xf32>
    %153 = vector.shape_cast %152 : vector<6xf32> to vector<6x1xf32>
    %cst_98 = arith.constant 3.200000e+01 : f32
    %154 = vector.broadcast %cst_98 : f32 to vector<6x1xf32>
    %155 = arith.divf %153, %154 : vector<6x1xf32>
    %156 = vector.broadcast %155 : vector<6x1xf32> to vector<6x32xf32>
    %157 = arith.subf %149, %156 : vector<6x32xf32>
    %158 = arith.mulf %157, %157 : vector<6x32xf32>
    %cst_99 = arith.constant dense<0.000000e+00> : vector<6xf32>
    %159 = vector.multi_reduction <add>, %158, %cst_99 [1] : vector<6x32xf32> to vector<6xf32>
    %160 = vector.shape_cast %159 : vector<6xf32> to vector<6x1xf32>
    %cst_100 = arith.constant 3.200000e+01 : f32
    %161 = vector.broadcast %cst_100 : f32 to vector<6x1xf32>
    %162 = arith.divf %160, %161 : vector<6x1xf32>
    %163 = vector.broadcast %155 : vector<6x1xf32> to vector<6x32xf32>
    %164 = arith.subf %149, %163 : vector<6x32xf32>
    %cst_101 = arith.constant 9.99999974E-6 : f32
    %165 = vector.broadcast %cst_101 : f32 to vector<6x1xf32>
    %166 = arith.addf %162, %165 : vector<6x1xf32>
    %167 = math.rsqrt %166 : vector<6x1xf32>
    %168 = vector.broadcast %167 : vector<6x1xf32> to vector<6x32xf32>
    %169 = arith.mulf %164, %168 : vector<6x32xf32>
    %170 = vector.broadcast %150 : vector<1x32xf32> to vector<6x32xf32>
    %171 = arith.mulf %169, %170 : vector<6x32xf32>
    %172 = vector.broadcast %151 : vector<1x32xf32> to vector<6x32xf32>
    %173 = arith.addf %171, %172 : vector<6x32xf32>
    %174 = arith.truncf %173 : vector<6x32xf32> to vector<6x32xbf16>
    %c0_102 = arith.constant 0 : index
    %c0_103 = arith.constant 0 : index
    %175 = vector.load %arg11[%c0_102, %c0_103] : memref<32x2048xbf16, #tpu.memory_space<vmem>>, vector<32x2048xbf16>
    %cst_104 = arith.constant dense<0.000000e+00> : vector<6x2048xf32>
    %176 = tpu.matmul %174, %175, %cst_104 {dimension_numbers = #tpu.dot_dimension_numbers<[1], [0], [0], [1], [0, 0, 1, 1], [], []>} : vector<6x32xbf16>, vector<32x2048xbf16>, vector<6x2048xf32> -> vector<6x2048xf32>
    %c0_105 = arith.constant 0 : index
    %c0_106 = arith.constant 0 : index
    %177 = vector.load %arg12[%c0_105, %c0_106] : memref<1x2048xf32, #tpu.memory_space<vmem>>, vector<1x2048xf32>
    %178 = vector.broadcast %177 : vector<1x2048xf32> to vector<6x2048xf32>
    %179 = arith.addf %176, %178 : vector<6x2048xf32>
    %cst_107 = arith.constant 0.000000e+00 : f32
    %180 = vector.broadcast %cst_107 : f32 to vector<6x2048xf32>
    %181 = arith.maximumf %179, %180 : vector<6x2048xf32>
    %182 = arith.truncf %181 : vector<6x2048xf32> to vector<6x2048xbf16>
    %c0_108 = arith.constant 0 : index
    %c0_109 = arith.constant 0 : index
    %183 = vector.load %arg13[%c0_108, %c0_109] : memref<2048x32xbf16, #tpu.memory_space<vmem>>, vector<2048x32xbf16>
    %cst_110 = arith.constant dense<0.000000e+00> : vector<6x32xf32>
    %184 = tpu.matmul %182, %183, %cst_110 {dimension_numbers = #tpu.dot_dimension_numbers<[1], [0], [0], [1], [0, 0, 1, 1], [], []>} : vector<6x2048xbf16>, vector<2048x32xbf16>, vector<6x32xf32> -> vector<6x32xf32>
    %c0_111 = arith.constant 0 : index
    %c0_112 = arith.constant 0 : index
    %185 = vector.load %arg14[%c0_111, %c0_112] : memref<1x32xf32, #tpu.memory_space<vmem>>, vector<1x32xf32>
    %186 = vector.broadcast %185 : vector<1x32xf32> to vector<6x32xf32>
    %187 = arith.addf %184, %186 : vector<6x32xf32>
    %188 = arith.addf %173, %187 : vector<6x32xf32>
    %c0_113 = arith.constant 0 : index
    %c0_114 = arith.constant 0 : index
    %189 = vector.load %arg15[%c0_113, %c0_114] : memref<1x32xf32, #tpu.memory_space<vmem>>, vector<1x32xf32>
    %c0_115 = arith.constant 0 : index
    %c0_116 = arith.constant 0 : index
    %190 = vector.load %arg16[%c0_115, %c0_116] : memref<1x32xf32, #tpu.memory_space<vmem>>, vector<1x32xf32>
    %cst_117 = arith.constant dense<0.000000e+00> : vector<6xf32>
    %191 = vector.multi_reduction <add>, %188, %cst_117 [1] : vector<6x32xf32> to vector<6xf32>
    %192 = vector.shape_cast %191 : vector<6xf32> to vector<6x1xf32>
    %cst_118 = arith.constant 3.200000e+01 : f32
    %193 = vector.broadcast %cst_118 : f32 to vector<6x1xf32>
    %194 = arith.divf %192, %193 : vector<6x1xf32>
    %195 = vector.broadcast %194 : vector<6x1xf32> to vector<6x32xf32>
    %196 = arith.subf %188, %195 : vector<6x32xf32>
    %197 = arith.mulf %196, %196 : vector<6x32xf32>
    %cst_119 = arith.constant dense<0.000000e+00> : vector<6xf32>
    %198 = vector.multi_reduction <add>, %197, %cst_119 [1] : vector<6x32xf32> to vector<6xf32>
    %199 = vector.shape_cast %198 : vector<6xf32> to vector<6x1xf32>
    %cst_120 = arith.constant 3.200000e+01 : f32
    %200 = vector.broadcast %cst_120 : f32 to vector<6x1xf32>
    %201 = arith.divf %199, %200 : vector<6x1xf32>
    %202 = vector.broadcast %194 : vector<6x1xf32> to vector<6x32xf32>
    %203 = arith.subf %188, %202 : vector<6x32xf32>
    %cst_121 = arith.constant 9.99999974E-6 : f32
    %204 = vector.broadcast %cst_121 : f32 to vector<6x1xf32>
    %205 = arith.addf %201, %204 : vector<6x1xf32>
    %206 = math.rsqrt %205 : vector<6x1xf32>
    %207 = vector.broadcast %206 : vector<6x1xf32> to vector<6x32xf32>
    %208 = arith.mulf %203, %207 : vector<6x32xf32>
    %209 = vector.broadcast %189 : vector<1x32xf32> to vector<6x32xf32>
    %210 = arith.mulf %208, %209 : vector<6x32xf32>
    %211 = vector.broadcast %190 : vector<1x32xf32> to vector<6x32xf32>
    %212 = arith.addf %210, %211 : vector<6x32xf32>
    %213 = arith.truncf %212 : vector<6x32xf32> to vector<6x32xbf16>
    %c0_122 = arith.constant 0 : index
    %c0_123 = arith.constant 0 : index
    %c0_124 = arith.constant 0 : index
    %214 = vector.load %arg17[%c0_122, %c0_123, %c0_124] : memref<4x32x8xbf16, #tpu.memory_space<vmem>>, vector<1x32x8xbf16>
    %215 = vector.shape_cast %214 : vector<1x32x8xbf16> to vector<32x8xbf16>
    %cst_125 = arith.constant dense<0.000000e+00> : vector<6x8xf32>
    %216 = tpu.matmul %213, %215, %cst_125 {dimension_numbers = #tpu.dot_dimension_numbers<[1], [0], [0], [1], [0, 0, 1, 1], [], []>} : vector<6x32xbf16>, vector<32x8xbf16>, vector<6x8xf32> -> vector<6x8xf32>
    %c0_126 = arith.constant 0 : index
    %c0_127 = arith.constant 0 : index
    %c0_128 = arith.constant 0 : index
    %217 = vector.load %arg18[%c0_126, %c0_127, %c0_128] : memref<4x1x8xf32, #tpu.memory_space<vmem>>, vector<1x1x8xf32>
    %218 = vector.shape_cast %217 : vector<1x1x8xf32> to vector<1x8xf32>
    %219 = vector.broadcast %218 : vector<1x8xf32> to vector<6x8xf32>
    %220 = arith.addf %216, %219 : vector<6x8xf32>
    %c0_129 = arith.constant 0 : index
    %c0_130 = arith.constant 0 : index
    %c0_131 = arith.constant 0 : index
    %221 = vector.load %arg19[%c0_129, %c0_130, %c0_131] : memref<4x32x8xbf16, #tpu.memory_space<vmem>>, vector<1x32x8xbf16>
    %222 = vector.shape_cast %221 : vector<1x32x8xbf16> to vector<32x8xbf16>
    %cst_132 = arith.constant dense<0.000000e+00> : vector<6x8xf32>
    %223 = tpu.matmul %213, %222, %cst_132 {dimension_numbers = #tpu.dot_dimension_numbers<[1], [0], [0], [1], [0, 0, 1, 1], [], []>} : vector<6x32xbf16>, vector<32x8xbf16>, vector<6x8xf32> -> vector<6x8xf32>
    %c0_133 = arith.constant 0 : index
    %c0_134 = arith.constant 0 : index
    %c0_135 = arith.constant 0 : index
    %224 = vector.load %arg20[%c0_133, %c0_134, %c0_135] : memref<4x1x8xf32, #tpu.memory_space<vmem>>, vector<1x1x8xf32>
    %225 = vector.shape_cast %224 : vector<1x1x8xf32> to vector<1x8xf32>
    %226 = vector.broadcast %225 : vector<1x8xf32> to vector<6x8xf32>
    %227 = arith.addf %223, %226 : vector<6x8xf32>
    %c0_136 = arith.constant 0 : index
    %c0_137 = arith.constant 0 : index
    %c0_138 = arith.constant 0 : index
    %228 = vector.load %arg21[%c0_136, %c0_137, %c0_138] : memref<4x32x32xbf16, #tpu.memory_space<vmem>>, vector<1x32x32xbf16>
    %229 = vector.shape_cast %228 : vector<1x32x32xbf16> to vector<32x32xbf16>
    %cst_139 = arith.constant dense<0.000000e+00> : vector<6x32xf32>
    %230 = tpu.matmul %213, %229, %cst_139 {dimension_numbers = #tpu.dot_dimension_numbers<[1], [0], [0], [1], [0, 0, 1, 1], [], []>} : vector<6x32xbf16>, vector<32x32xbf16>, vector<6x32xf32> -> vector<6x32xf32>
    %231 = arith.truncf %220 : vector<6x8xf32> to vector<6x8xbf16>
    %232 = arith.truncf %227 : vector<6x8xf32> to vector<6x8xbf16>
    %cst_140 = arith.constant dense<0.000000e+00> : vector<6x6xf32>
    %233 = tpu.matmul %231, %232, %cst_140 {dimension_numbers = #tpu.dot_dimension_numbers<[1], [1], [0], [0], [0, 0, 1, 0], [], []>} : vector<6x8xbf16>, vector<6x8xbf16>, vector<6x6xf32> -> vector<6x6xf32>
    %cst_141 = arith.constant dense<0xFF800000> : vector<6xf32>
    %234 = vector.multi_reduction <maximumf>, %233, %cst_141 [1] : vector<6x6xf32> to vector<6xf32>
    %235 = vector.shape_cast %234 : vector<6xf32> to vector<6x1xf32>
    %236 = vector.broadcast %235 : vector<6x1xf32> to vector<6x6xf32>
    %237 = arith.subf %233, %236 : vector<6x6xf32>
    %238 = math.exp %237 : vector<6x6xf32>
    %cst_142 = arith.constant dense<0.000000e+00> : vector<6xf32>
    %239 = vector.multi_reduction <add>, %238, %cst_142 [1] : vector<6x6xf32> to vector<6xf32>
    %240 = vector.shape_cast %239 : vector<6xf32> to vector<6x1xf32>
    %241 = tpu.reciprocal %240 {approx = true} : vector<6x1xf32> -> vector<6x1xf32>
    %242 = vector.broadcast %241 : vector<6x1xf32> to vector<6x6xf32>
    %243 = arith.mulf %238, %242 : vector<6x6xf32>
    %244 = arith.truncf %243 : vector<6x6xf32> to vector<6x6xbf16>
    %245 = arith.truncf %230 : vector<6x32xf32> to vector<6x32xbf16>
    %cst_143 = arith.constant dense<0.000000e+00> : vector<6x32xf32>
    %246 = tpu.matmul %244, %245, %cst_143 {dimension_numbers = #tpu.dot_dimension_numbers<[1], [0], [0], [1], [0, 0, 1, 1], [], []>} : vector<6x6xbf16>, vector<6x32xbf16>, vector<6x32xf32> -> vector<6x32xf32>
    %c1_144 = arith.constant 1 : index
    %c0_145 = arith.constant 0 : index
    %c0_146 = arith.constant 0 : index
    %247 = vector.load %arg17[%c1_144, %c0_145, %c0_146] : memref<4x32x8xbf16, #tpu.memory_space<vmem>>, vector<1x32x8xbf16>
    %248 = vector.shape_cast %247 : vector<1x32x8xbf16> to vector<32x8xbf16>
    %cst_147 = arith.constant dense<0.000000e+00> : vector<6x8xf32>
    %249 = tpu.matmul %213, %248, %cst_147 {dimension_numbers = #tpu.dot_dimension_numbers<[1], [0], [0], [1], [0, 0, 1, 1], [], []>} : vector<6x32xbf16>, vector<32x8xbf16>, vector<6x8xf32> -> vector<6x8xf32>
    %c1_148 = arith.constant 1 : index
    %c0_149 = arith.constant 0 : index
    %c0_150 = arith.constant 0 : index
    %250 = vector.load %arg18[%c1_148, %c0_149, %c0_150] : memref<4x1x8xf32, #tpu.memory_space<vmem>>, vector<1x1x8xf32>
    %251 = vector.shape_cast %250 : vector<1x1x8xf32> to vector<1x8xf32>
    %252 = vector.broadcast %251 : vector<1x8xf32> to vector<6x8xf32>
    %253 = arith.addf %249, %252 : vector<6x8xf32>
    %c1_151 = arith.constant 1 : index
    %c0_152 = arith.constant 0 : index
    %c0_153 = arith.constant 0 : index
    %254 = vector.load %arg19[%c1_151, %c0_152, %c0_153] : memref<4x32x8xbf16, #tpu.memory_space<vmem>>, vector<1x32x8xbf16>
    %255 = vector.shape_cast %254 : vector<1x32x8xbf16> to vector<32x8xbf16>
    %cst_154 = arith.constant dense<0.000000e+00> : vector<6x8xf32>
    %256 = tpu.matmul %213, %255, %cst_154 {dimension_numbers = #tpu.dot_dimension_numbers<[1], [0], [0], [1], [0, 0, 1, 1], [], []>} : vector<6x32xbf16>, vector<32x8xbf16>, vector<6x8xf32> -> vector<6x8xf32>
    %c1_155 = arith.constant 1 : index
    %c0_156 = arith.constant 0 : index
    %c0_157 = arith.constant 0 : index
    %257 = vector.load %arg20[%c1_155, %c0_156, %c0_157] : memref<4x1x8xf32, #tpu.memory_space<vmem>>, vector<1x1x8xf32>
    %258 = vector.shape_cast %257 : vector<1x1x8xf32> to vector<1x8xf32>
    %259 = vector.broadcast %258 : vector<1x8xf32> to vector<6x8xf32>
    %260 = arith.addf %256, %259 : vector<6x8xf32>
    %c1_158 = arith.constant 1 : index
    %c0_159 = arith.constant 0 : index
    %c0_160 = arith.constant 0 : index
    %261 = vector.load %arg21[%c1_158, %c0_159, %c0_160] : memref<4x32x32xbf16, #tpu.memory_space<vmem>>, vector<1x32x32xbf16>
    %262 = vector.shape_cast %261 : vector<1x32x32xbf16> to vector<32x32xbf16>
    %cst_161 = arith.constant dense<0.000000e+00> : vector<6x32xf32>
    %263 = tpu.matmul %213, %262, %cst_161 {dimension_numbers = #tpu.dot_dimension_numbers<[1], [0], [0], [1], [0, 0, 1, 1], [], []>} : vector<6x32xbf16>, vector<32x32xbf16>, vector<6x32xf32> -> vector<6x32xf32>
    %264 = arith.truncf %253 : vector<6x8xf32> to vector<6x8xbf16>
    %265 = arith.truncf %260 : vector<6x8xf32> to vector<6x8xbf16>
    %cst_162 = arith.constant dense<0.000000e+00> : vector<6x6xf32>
    %266 = tpu.matmul %264, %265, %cst_162 {dimension_numbers = #tpu.dot_dimension_numbers<[1], [1], [0], [0], [0, 0, 1, 0], [], []>} : vector<6x8xbf16>, vector<6x8xbf16>, vector<6x6xf32> -> vector<6x6xf32>
    %cst_163 = arith.constant dense<0xFF800000> : vector<6xf32>
    %267 = vector.multi_reduction <maximumf>, %266, %cst_163 [1] : vector<6x6xf32> to vector<6xf32>
    %268 = vector.shape_cast %267 : vector<6xf32> to vector<6x1xf32>
    %269 = vector.broadcast %268 : vector<6x1xf32> to vector<6x6xf32>
    %270 = arith.subf %266, %269 : vector<6x6xf32>
    %271 = math.exp %270 : vector<6x6xf32>
    %cst_164 = arith.constant dense<0.000000e+00> : vector<6xf32>
    %272 = vector.multi_reduction <add>, %271, %cst_164 [1] : vector<6x6xf32> to vector<6xf32>
    %273 = vector.shape_cast %272 : vector<6xf32> to vector<6x1xf32>
    %274 = tpu.reciprocal %273 {approx = true} : vector<6x1xf32> -> vector<6x1xf32>
    %275 = vector.broadcast %274 : vector<6x1xf32> to vector<6x6xf32>
    %276 = arith.mulf %271, %275 : vector<6x6xf32>
    %277 = arith.truncf %276 : vector<6x6xf32> to vector<6x6xbf16>
    %278 = arith.truncf %263 : vector<6x32xf32> to vector<6x32xbf16>
    %cst_165 = arith.constant dense<0.000000e+00> : vector<6x32xf32>
    %279 = tpu.matmul %277, %278, %cst_165 {dimension_numbers = #tpu.dot_dimension_numbers<[1], [0], [0], [1], [0, 0, 1, 1], [], []>} : vector<6x6xbf16>, vector<6x32xbf16>, vector<6x32xf32> -> vector<6x32xf32>
    %280 = arith.addf %243, %276 : vector<6x6xf32>
    %281 = arith.addf %246, %279 : vector<6x32xf32>
    %c2_166 = arith.constant 2 : index
    %c0_167 = arith.constant 0 : index
    %c0_168 = arith.constant 0 : index
    %282 = vector.load %arg17[%c2_166, %c0_167, %c0_168] : memref<4x32x8xbf16, #tpu.memory_space<vmem>>, vector<1x32x8xbf16>
    %283 = vector.shape_cast %282 : vector<1x32x8xbf16> to vector<32x8xbf16>
    %cst_169 = arith.constant dense<0.000000e+00> : vector<6x8xf32>
    %284 = tpu.matmul %213, %283, %cst_169 {dimension_numbers = #tpu.dot_dimension_numbers<[1], [0], [0], [1], [0, 0, 1, 1], [], []>} : vector<6x32xbf16>, vector<32x8xbf16>, vector<6x8xf32> -> vector<6x8xf32>
    %c2_170 = arith.constant 2 : index
    %c0_171 = arith.constant 0 : index
    %c0_172 = arith.constant 0 : index
    %285 = vector.load %arg18[%c2_170, %c0_171, %c0_172] : memref<4x1x8xf32, #tpu.memory_space<vmem>>, vector<1x1x8xf32>
    %286 = vector.shape_cast %285 : vector<1x1x8xf32> to vector<1x8xf32>
    %287 = vector.broadcast %286 : vector<1x8xf32> to vector<6x8xf32>
    %288 = arith.addf %284, %287 : vector<6x8xf32>
    %c2_173 = arith.constant 2 : index
    %c0_174 = arith.constant 0 : index
    %c0_175 = arith.constant 0 : index
    %289 = vector.load %arg19[%c2_173, %c0_174, %c0_175] : memref<4x32x8xbf16, #tpu.memory_space<vmem>>, vector<1x32x8xbf16>
    %290 = vector.shape_cast %289 : vector<1x32x8xbf16> to vector<32x8xbf16>
    %cst_176 = arith.constant dense<0.000000e+00> : vector<6x8xf32>
    %291 = tpu.matmul %213, %290, %cst_176 {dimension_numbers = #tpu.dot_dimension_numbers<[1], [0], [0], [1], [0, 0, 1, 1], [], []>} : vector<6x32xbf16>, vector<32x8xbf16>, vector<6x8xf32> -> vector<6x8xf32>
    %c2_177 = arith.constant 2 : index
    %c0_178 = arith.constant 0 : index
    %c0_179 = arith.constant 0 : index
    %292 = vector.load %arg20[%c2_177, %c0_178, %c0_179] : memref<4x1x8xf32, #tpu.memory_space<vmem>>, vector<1x1x8xf32>
    %293 = vector.shape_cast %292 : vector<1x1x8xf32> to vector<1x8xf32>
    %294 = vector.broadcast %293 : vector<1x8xf32> to vector<6x8xf32>
    %295 = arith.addf %291, %294 : vector<6x8xf32>
    %c2_180 = arith.constant 2 : index
    %c0_181 = arith.constant 0 : index
    %c0_182 = arith.constant 0 : index
    %296 = vector.load %arg21[%c2_180, %c0_181, %c0_182] : memref<4x32x32xbf16, #tpu.memory_space<vmem>>, vector<1x32x32xbf16>
    %297 = vector.shape_cast %296 : vector<1x32x32xbf16> to vector<32x32xbf16>
    %cst_183 = arith.constant dense<0.000000e+00> : vector<6x32xf32>
    %298 = tpu.matmul %213, %297, %cst_183 {dimension_numbers = #tpu.dot_dimension_numbers<[1], [0], [0], [1], [0, 0, 1, 1], [], []>} : vector<6x32xbf16>, vector<32x32xbf16>, vector<6x32xf32> -> vector<6x32xf32>
    %299 = arith.truncf %288 : vector<6x8xf32> to vector<6x8xbf16>
    %300 = arith.truncf %295 : vector<6x8xf32> to vector<6x8xbf16>
    %cst_184 = arith.constant dense<0.000000e+00> : vector<6x6xf32>
    %301 = tpu.matmul %299, %300, %cst_184 {dimension_numbers = #tpu.dot_dimension_numbers<[1], [1], [0], [0], [0, 0, 1, 0], [], []>} : vector<6x8xbf16>, vector<6x8xbf16>, vector<6x6xf32> -> vector<6x6xf32>
    %cst_185 = arith.constant dense<0xFF800000> : vector<6xf32>
    %302 = vector.multi_reduction <maximumf>, %301, %cst_185 [1] : vector<6x6xf32> to vector<6xf32>
    %303 = vector.shape_cast %302 : vector<6xf32> to vector<6x1xf32>
    %304 = vector.broadcast %303 : vector<6x1xf32> to vector<6x6xf32>
    %305 = arith.subf %301, %304 : vector<6x6xf32>
    %306 = math.exp %305 : vector<6x6xf32>
    %cst_186 = arith.constant dense<0.000000e+00> : vector<6xf32>
    %307 = vector.multi_reduction <add>, %306, %cst_186 [1] : vector<6x6xf32> to vector<6xf32>
    %308 = vector.shape_cast %307 : vector<6xf32> to vector<6x1xf32>
    %309 = tpu.reciprocal %308 {approx = true} : vector<6x1xf32> -> vector<6x1xf32>
    %310 = vector.broadcast %309 : vector<6x1xf32> to vector<6x6xf32>
    %311 = arith.mulf %306, %310 : vector<6x6xf32>
    %312 = arith.truncf %311 : vector<6x6xf32> to vector<6x6xbf16>
    %313 = arith.truncf %298 : vector<6x32xf32> to vector<6x32xbf16>
    %cst_187 = arith.constant dense<0.000000e+00> : vector<6x32xf32>
    %314 = tpu.matmul %312, %313, %cst_187 {dimension_numbers = #tpu.dot_dimension_numbers<[1], [0], [0], [1], [0, 0, 1, 1], [], []>} : vector<6x6xbf16>, vector<6x32xbf16>, vector<6x32xf32> -> vector<6x32xf32>
    %315 = arith.addf %280, %311 : vector<6x6xf32>
    %316 = arith.addf %281, %314 : vector<6x32xf32>
    %c3_188 = arith.constant 3 : index
    %c0_189 = arith.constant 0 : index
    %c0_190 = arith.constant 0 : index
    %317 = vector.load %arg17[%c3_188, %c0_189, %c0_190] : memref<4x32x8xbf16, #tpu.memory_space<vmem>>, vector<1x32x8xbf16>
    %318 = vector.shape_cast %317 : vector<1x32x8xbf16> to vector<32x8xbf16>
    %cst_191 = arith.constant dense<0.000000e+00> : vector<6x8xf32>
    %319 = tpu.matmul %213, %318, %cst_191 {dimension_numbers = #tpu.dot_dimension_numbers<[1], [0], [0], [1], [0, 0, 1, 1], [], []>} : vector<6x32xbf16>, vector<32x8xbf16>, vector<6x8xf32> -> vector<6x8xf32>
    %c3_192 = arith.constant 3 : index
    %c0_193 = arith.constant 0 : index
    %c0_194 = arith.constant 0 : index
    %320 = vector.load %arg18[%c3_192, %c0_193, %c0_194] : memref<4x1x8xf32, #tpu.memory_space<vmem>>, vector<1x1x8xf32>
    %321 = vector.shape_cast %320 : vector<1x1x8xf32> to vector<1x8xf32>
    %322 = vector.broadcast %321 : vector<1x8xf32> to vector<6x8xf32>
    %323 = arith.addf %319, %322 : vector<6x8xf32>
    %c3_195 = arith.constant 3 : index
    %c0_196 = arith.constant 0 : index
    %c0_197 = arith.constant 0 : index
    %324 = vector.load %arg19[%c3_195, %c0_196, %c0_197] : memref<4x32x8xbf16, #tpu.memory_space<vmem>>, vector<1x32x8xbf16>
    %325 = vector.shape_cast %324 : vector<1x32x8xbf16> to vector<32x8xbf16>
    %cst_198 = arith.constant dense<0.000000e+00> : vector<6x8xf32>
    %326 = tpu.matmul %213, %325, %cst_198 {dimension_numbers = #tpu.dot_dimension_numbers<[1], [0], [0], [1], [0, 0, 1, 1], [], []>} : vector<6x32xbf16>, vector<32x8xbf16>, vector<6x8xf32> -> vector<6x8xf32>
    %c3_199 = arith.constant 3 : index
    %c0_200 = arith.constant 0 : index
    %c0_201 = arith.constant 0 : index
    %327 = vector.load %arg20[%c3_199, %c0_200, %c0_201] : memref<4x1x8xf32, #tpu.memory_space<vmem>>, vector<1x1x8xf32>
    %328 = vector.shape_cast %327 : vector<1x1x8xf32> to vector<1x8xf32>
    %329 = vector.broadcast %328 : vector<1x8xf32> to vector<6x8xf32>
    %330 = arith.addf %326, %329 : vector<6x8xf32>
    %c3_202 = arith.constant 3 : index
    %c0_203 = arith.constant 0 : index
    %c0_204 = arith.constant 0 : index
    %331 = vector.load %arg21[%c3_202, %c0_203, %c0_204] : memref<4x32x32xbf16, #tpu.memory_space<vmem>>, vector<1x32x32xbf16>
    %332 = vector.shape_cast %331 : vector<1x32x32xbf16> to vector<32x32xbf16>
    %cst_205 = arith.constant dense<0.000000e+00> : vector<6x32xf32>
    %333 = tpu.matmul %213, %332, %cst_205 {dimension_numbers = #tpu.dot_dimension_numbers<[1], [0], [0], [1], [0, 0, 1, 1], [], []>} : vector<6x32xbf16>, vector<32x32xbf16>, vector<6x32xf32> -> vector<6x32xf32>
    %334 = arith.truncf %323 : vector<6x8xf32> to vector<6x8xbf16>
    %335 = arith.truncf %330 : vector<6x8xf32> to vector<6x8xbf16>
    %cst_206 = arith.constant dense<0.000000e+00> : vector<6x6xf32>
    %336 = tpu.matmul %334, %335, %cst_206 {dimension_numbers = #tpu.dot_dimension_numbers<[1], [1], [0], [0], [0, 0, 1, 0], [], []>} : vector<6x8xbf16>, vector<6x8xbf16>, vector<6x6xf32> -> vector<6x6xf32>
    %cst_207 = arith.constant dense<0xFF800000> : vector<6xf32>
    %337 = vector.multi_reduction <maximumf>, %336, %cst_207 [1] : vector<6x6xf32> to vector<6xf32>
    %338 = vector.shape_cast %337 : vector<6xf32> to vector<6x1xf32>
    %339 = vector.broadcast %338 : vector<6x1xf32> to vector<6x6xf32>
    %340 = arith.subf %336, %339 : vector<6x6xf32>
    %341 = math.exp %340 : vector<6x6xf32>
    %cst_208 = arith.constant dense<0.000000e+00> : vector<6xf32>
    %342 = vector.multi_reduction <add>, %341, %cst_208 [1] : vector<6x6xf32> to vector<6xf32>
    %343 = vector.shape_cast %342 : vector<6xf32> to vector<6x1xf32>
    %344 = tpu.reciprocal %343 {approx = true} : vector<6x1xf32> -> vector<6x1xf32>
    %345 = vector.broadcast %344 : vector<6x1xf32> to vector<6x6xf32>
    %346 = arith.mulf %341, %345 : vector<6x6xf32>
    %347 = arith.truncf %346 : vector<6x6xf32> to vector<6x6xbf16>
    %348 = arith.truncf %333 : vector<6x32xf32> to vector<6x32xbf16>
    %cst_209 = arith.constant dense<0.000000e+00> : vector<6x32xf32>
    %349 = tpu.matmul %347, %348, %cst_209 {dimension_numbers = #tpu.dot_dimension_numbers<[1], [0], [0], [1], [0, 0, 1, 1], [], []>} : vector<6x6xbf16>, vector<6x32xbf16>, vector<6x32xf32> -> vector<6x32xf32>
    %350 = arith.addf %315, %346 : vector<6x6xf32>
    %351 = arith.addf %316, %349 : vector<6x32xf32>
    %cst_210 = arith.constant 2.500000e-01 : f32
    %352 = vector.broadcast %cst_210 : f32 to vector<6x6xf32>
    %353 = arith.mulf %350, %352 : vector<6x6xf32>
    %c1_211 = arith.constant 1 : index
    %c0_212 = arith.constant 0 : index
    %c0_213 = arith.constant 0 : index
    %c0_214 = arith.constant 0 : index
    %354 = vector.load %arg39[%c1_211, %c0_212, %c0_213, %c0_214] : memref<2x1x6x6xf32, #tpu.memory_space<vmem>>, vector<1x1x6x6xf32>
    %355 = vector.shape_cast %354 : vector<1x1x6x6xf32> to vector<6x6xf32>
    %356 = vector.shape_cast %353 : vector<6x6xf32> to vector<1x1x6x6xf32>
    tpu.vector_store %arg39[%c1_211, %c0_212, %c0_213, %c0_214], %356 {strides = array<i32>} : memref<2x1x6x6xf32, #tpu.memory_space<vmem>>, vector<1x1x6x6xf32>,
    %357 = arith.addf %212, %351 : vector<6x32xf32>
    %c0_215 = arith.constant 0 : index
    %c0_216 = arith.constant 0 : index
    %358 = vector.load %arg22[%c0_215, %c0_216] : memref<1x32xf32, #tpu.memory_space<vmem>>, vector<1x32xf32>
    %359 = vector.broadcast %358 : vector<1x32xf32> to vector<6x32xf32>
    %360 = arith.addf %357, %359 : vector<6x32xf32>
    %c0_217 = arith.constant 0 : index
    %c0_218 = arith.constant 0 : index
    %361 = vector.load %arg23[%c0_217, %c0_218] : memref<1x32xf32, #tpu.memory_space<vmem>>, vector<1x32xf32>
    %c0_219 = arith.constant 0 : index
    %c0_220 = arith.constant 0 : index
    %362 = vector.load %arg24[%c0_219, %c0_220] : memref<1x32xf32, #tpu.memory_space<vmem>>, vector<1x32xf32>
    %cst_221 = arith.constant dense<0.000000e+00> : vector<6xf32>
    %363 = vector.multi_reduction <add>, %360, %cst_221 [1] : vector<6x32xf32> to vector<6xf32>
    %364 = vector.shape_cast %363 : vector<6xf32> to vector<6x1xf32>
    %cst_222 = arith.constant 3.200000e+01 : f32
    %365 = vector.broadcast %cst_222 : f32 to vector<6x1xf32>
    %366 = arith.divf %364, %365 : vector<6x1xf32>
    %367 = vector.broadcast %366 : vector<6x1xf32> to vector<6x32xf32>
    %368 = arith.subf %360, %367 : vector<6x32xf32>
    %369 = arith.mulf %368, %368 : vector<6x32xf32>
    %cst_223 = arith.constant dense<0.000000e+00> : vector<6xf32>
    %370 = vector.multi_reduction <add>, %369, %cst_223 [1] : vector<6x32xf32> to vector<6xf32>
    %371 = vector.shape_cast %370 : vector<6xf32> to vector<6x1xf32>
    %cst_224 = arith.constant 3.200000e+01 : f32
    %372 = vector.broadcast %cst_224 : f32 to vector<6x1xf32>
    %373 = arith.divf %371, %372 : vector<6x1xf32>
    %374 = vector.broadcast %366 : vector<6x1xf32> to vector<6x32xf32>
    %375 = arith.subf %360, %374 : vector<6x32xf32>
    %cst_225 = arith.constant 9.99999974E-6 : f32
    %376 = vector.broadcast %cst_225 : f32 to vector<6x1xf32>
    %377 = arith.addf %373, %376 : vector<6x1xf32>
    %378 = math.rsqrt %377 : vector<6x1xf32>
    %379 = vector.broadcast %378 : vector<6x1xf32> to vector<6x32xf32>
    %380 = arith.mulf %375, %379 : vector<6x32xf32>
    %381 = vector.broadcast %361 : vector<1x32xf32> to vector<6x32xf32>
    %382 = arith.mulf %380, %381 : vector<6x32xf32>
    %383 = vector.broadcast %362 : vector<1x32xf32> to vector<6x32xf32>
    %384 = arith.addf %382, %383 : vector<6x32xf32>
    %385 = arith.truncf %384 : vector<6x32xf32> to vector<6x32xbf16>
    %c0_226 = arith.constant 0 : index
    %c0_227 = arith.constant 0 : index
    %386 = vector.load %arg25[%c0_226, %c0_227] : memref<32x2048xbf16, #tpu.memory_space<vmem>>, vector<32x2048xbf16>
    %cst_228 = arith.constant dense<0.000000e+00> : vector<6x2048xf32>
    %387 = tpu.matmul %385, %386, %cst_228 {dimension_numbers = #tpu.dot_dimension_numbers<[1], [0], [0], [1], [0, 0, 1, 1], [], []>} : vector<6x32xbf16>, vector<32x2048xbf16>, vector<6x2048xf32> -> vector<6x2048xf32>
    %c0_229 = arith.constant 0 : index
    %c0_230 = arith.constant 0 : index
    %388 = vector.load %arg26[%c0_229, %c0_230] : memref<1x2048xf32, #tpu.memory_space<vmem>>, vector<1x2048xf32>
    %389 = vector.broadcast %388 : vector<1x2048xf32> to vector<6x2048xf32>
    %390 = arith.addf %387, %389 : vector<6x2048xf32>
    %cst_231 = arith.constant 0.000000e+00 : f32
    %391 = vector.broadcast %cst_231 : f32 to vector<6x2048xf32>
    %392 = arith.maximumf %390, %391 : vector<6x2048xf32>
    %393 = arith.truncf %392 : vector<6x2048xf32> to vector<6x2048xbf16>
    %c0_232 = arith.constant 0 : index
    %c0_233 = arith.constant 0 : index
    %394 = vector.load %arg27[%c0_232, %c0_233] : memref<2048x32xbf16, #tpu.memory_space<vmem>>, vector<2048x32xbf16>
    %cst_234 = arith.constant dense<0.000000e+00> : vector<6x32xf32>
    %395 = tpu.matmul %393, %394, %cst_234 {dimension_numbers = #tpu.dot_dimension_numbers<[1], [0], [0], [1], [0, 0, 1, 1], [], []>} : vector<6x2048xbf16>, vector<2048x32xbf16>, vector<6x32xf32> -> vector<6x32xf32>
    %c0_235 = arith.constant 0 : index
    %c0_236 = arith.constant 0 : index
    %396 = vector.load %arg28[%c0_235, %c0_236] : memref<1x32xf32, #tpu.memory_space<vmem>>, vector<1x32xf32>
    %397 = vector.broadcast %396 : vector<1x32xf32> to vector<6x32xf32>
    %398 = arith.addf %395, %397 : vector<6x32xf32>
    %399 = arith.addf %384, %398 : vector<6x32xf32>
    %c0_237 = arith.constant 0 : index
    %c0_238 = arith.constant 0 : index
    %400 = vector.load %arg29[%c0_237, %c0_238] : memref<1x32xf32, #tpu.memory_space<vmem>>, vector<1x32xf32>
    %c0_239 = arith.constant 0 : index
    %c0_240 = arith.constant 0 : index
    %401 = vector.load %arg30[%c0_239, %c0_240] : memref<1x32xf32, #tpu.memory_space<vmem>>, vector<1x32xf32>
    %cst_241 = arith.constant dense<0.000000e+00> : vector<6xf32>
    %402 = vector.multi_reduction <add>, %399, %cst_241 [1] : vector<6x32xf32> to vector<6xf32>
    %403 = vector.shape_cast %402 : vector<6xf32> to vector<6x1xf32>
    %cst_242 = arith.constant 3.200000e+01 : f32
    %404 = vector.broadcast %cst_242 : f32 to vector<6x1xf32>
    %405 = arith.divf %403, %404 : vector<6x1xf32>
    %406 = vector.broadcast %405 : vector<6x1xf32> to vector<6x32xf32>
    %407 = arith.subf %399, %406 : vector<6x32xf32>
    %408 = arith.mulf %407, %407 : vector<6x32xf32>
    %cst_243 = arith.constant dense<0.000000e+00> : vector<6xf32>
    %409 = vector.multi_reduction <add>, %408, %cst_243 [1] : vector<6x32xf32> to vector<6xf32>
    %410 = vector.shape_cast %409 : vector<6xf32> to vector<6x1xf32>
    %cst_244 = arith.constant 3.200000e+01 : f32
    %411 = vector.broadcast %cst_244 : f32 to vector<6x1xf32>
    %412 = arith.divf %410, %411 : vector<6x1xf32>
    %413 = vector.broadcast %405 : vector<6x1xf32> to vector<6x32xf32>
    %414 = arith.subf %399, %413 : vector<6x32xf32>
    %cst_245 = arith.constant 9.99999974E-6 : f32
    %415 = vector.broadcast %cst_245 : f32 to vector<6x1xf32>
    %416 = arith.addf %412, %415 : vector<6x1xf32>
    %417 = math.rsqrt %416 : vector<6x1xf32>
    %418 = vector.broadcast %417 : vector<6x1xf32> to vector<6x32xf32>
    %419 = arith.mulf %414, %418 : vector<6x32xf32>
    %420 = vector.broadcast %400 : vector<1x32xf32> to vector<6x32xf32>
    %421 = arith.mulf %419, %420 : vector<6x32xf32>
    %422 = vector.broadcast %401 : vector<1x32xf32> to vector<6x32xf32>
    %423 = arith.addf %421, %422 : vector<6x32xf32>
    %c0_246 = arith.constant 0 : index
    %c0_247 = arith.constant 0 : index
    %c0_248 = arith.constant 0 : index
    %424 = vector.load %arg2[%c0_246, %c0_247, %c0_248] : memref<1x1x3xf32, #tpu.memory_space<vmem>>, vector<1x1x3xf32>
    %425 = vector.shape_cast %424 : vector<1x1x3xf32> to vector<1x3xf32>
    %426 = arith.truncf %425 : vector<1x3xf32> to vector<1x3xbf16>
    %c0_249 = arith.constant 0 : index
    %c0_250 = arith.constant 0 : index
    %427 = vector.load %arg32[%c0_249, %c0_250] : memref<3x256xbf16, #tpu.memory_space<vmem>>, vector<3x256xbf16>
    %cst_251 = arith.constant dense<0.000000e+00> : vector<1x256xf32>
    %428 = tpu.matmul %426, %427, %cst_251 {dimension_numbers = #tpu.dot_dimension_numbers<[1], [0], [0], [1], [0, 0, 1, 1], [], []>} : vector<1x3xbf16>, vector<3x256xbf16>, vector<1x256xf32> -> vector<1x256xf32>
    %429 = vector.extract_strided_slice %423 {offsets = [0, 0], sizes = [1, 32], strides = [1, 1]} : vector<6x32xf32> to vector<1x32xf32>
    %430 = arith.truncf %429 : vector<1x32xf32> to vector<1x32xbf16>
    %c0_252 = arith.constant 0 : index
    %c0_253 = arith.constant 0 : index
    %c0_254 = arith.constant 0 : index
    %431 = vector.load %arg31[%c0_252, %c0_253, %c0_254] : memref<6x32x256xbf16, #tpu.memory_space<vmem>>, vector<1x32x256xbf16>
    %432 = vector.shape_cast %431 : vector<1x32x256xbf16> to vector<32x256xbf16>
    %cst_255 = arith.constant dense<0.000000e+00> : vector<1x256xf32>
    %433 = tpu.matmul %430, %432, %cst_255 {dimension_numbers = #tpu.dot_dimension_numbers<[1], [0], [0], [1], [0, 0, 1, 1], [], []>} : vector<1x32xbf16>, vector<32x256xbf16>, vector<1x256xf32> -> vector<1x256xf32>
    %434 = arith.addf %428, %433 : vector<1x256xf32>
    %435 = vector.extract_strided_slice %423 {offsets = [1, 0], sizes = [1, 32], strides = [1, 1]} : vector<6x32xf32> to vector<1x32xf32>
    %436 = arith.truncf %435 : vector<1x32xf32> to vector<1x32xbf16>
    %c1_256 = arith.constant 1 : index
    %c0_257 = arith.constant 0 : index
    %c0_258 = arith.constant 0 : index
    %437 = vector.load %arg31[%c1_256, %c0_257, %c0_258] : memref<6x32x256xbf16, #tpu.memory_space<vmem>>, vector<1x32x256xbf16>
    %438 = vector.shape_cast %437 : vector<1x32x256xbf16> to vector<32x256xbf16>
    %cst_259 = arith.constant dense<0.000000e+00> : vector<1x256xf32>
    %439 = tpu.matmul %436, %438, %cst_259 {dimension_numbers = #tpu.dot_dimension_numbers<[1], [0], [0], [1], [0, 0, 1, 1], [], []>} : vector<1x32xbf16>, vector<32x256xbf16>, vector<1x256xf32> -> vector<1x256xf32>
    %440 = arith.addf %434, %439 : vector<1x256xf32>
    %441 = vector.extract_strided_slice %423 {offsets = [2, 0], sizes = [1, 32], strides = [1, 1]} : vector<6x32xf32> to vector<1x32xf32>
    %442 = arith.truncf %441 : vector<1x32xf32> to vector<1x32xbf16>
    %c2_260 = arith.constant 2 : index
    %c0_261 = arith.constant 0 : index
    %c0_262 = arith.constant 0 : index
    %443 = vector.load %arg31[%c2_260, %c0_261, %c0_262] : memref<6x32x256xbf16, #tpu.memory_space<vmem>>, vector<1x32x256xbf16>
    %444 = vector.shape_cast %443 : vector<1x32x256xbf16> to vector<32x256xbf16>
    %cst_263 = arith.constant dense<0.000000e+00> : vector<1x256xf32>
    %445 = tpu.matmul %442, %444, %cst_263 {dimension_numbers = #tpu.dot_dimension_numbers<[1], [0], [0], [1], [0, 0, 1, 1], [], []>} : vector<1x32xbf16>, vector<32x256xbf16>, vector<1x256xf32> -> vector<1x256xf32>
    %446 = arith.addf %440, %445 : vector<1x256xf32>
    %447 = vector.extract_strided_slice %423 {offsets = [3, 0], sizes = [1, 32], strides = [1, 1]} : vector<6x32xf32> to vector<1x32xf32>
    %448 = arith.truncf %447 : vector<1x32xf32> to vector<1x32xbf16>
    %c3_264 = arith.constant 3 : index
    %c0_265 = arith.constant 0 : index
    %c0_266 = arith.constant 0 : index
    %449 = vector.load %arg31[%c3_264, %c0_265, %c0_266] : memref<6x32x256xbf16, #tpu.memory_space<vmem>>, vector<1x32x256xbf16>
    %450 = vector.shape_cast %449 : vector<1x32x256xbf16> to vector<32x256xbf16>
    %cst_267 = arith.constant dense<0.000000e+00> : vector<1x256xf32>
    %451 = tpu.matmul %448, %450, %cst_267 {dimension_numbers = #tpu.dot_dimension_numbers<[1], [0], [0], [1], [0, 0, 1, 1], [], []>} : vector<1x32xbf16>, vector<32x256xbf16>, vector<1x256xf32> -> vector<1x256xf32>
    %452 = arith.addf %446, %451 : vector<1x256xf32>
    %453 = vector.extract_strided_slice %423 {offsets = [4, 0], sizes = [1, 32], strides = [1, 1]} : vector<6x32xf32> to vector<1x32xf32>
    %454 = arith.truncf %453 : vector<1x32xf32> to vector<1x32xbf16>
    %c4 = arith.constant 4 : index
    %c0_268 = arith.constant 0 : index
    %c0_269 = arith.constant 0 : index
    %455 = vector.load %arg31[%c4, %c0_268, %c0_269] : memref<6x32x256xbf16, #tpu.memory_space<vmem>>, vector<1x32x256xbf16>
    %456 = vector.shape_cast %455 : vector<1x32x256xbf16> to vector<32x256xbf16>
    %cst_270 = arith.constant dense<0.000000e+00> : vector<1x256xf32>
    %457 = tpu.matmul %454, %456, %cst_270 {dimension_numbers = #tpu.dot_dimension_numbers<[1], [0], [0], [1], [0, 0, 1, 1], [], []>} : vector<1x32xbf16>, vector<32x256xbf16>, vector<1x256xf32> -> vector<1x256xf32>
    %458 = arith.addf %452, %457 : vector<1x256xf32>
    %459 = vector.extract_strided_slice %423 {offsets = [5, 0], sizes = [1, 32], strides = [1, 1]} : vector<6x32xf32> to vector<1x32xf32>
    %460 = arith.truncf %459 : vector<1x32xf32> to vector<1x32xbf16>
    %c5 = arith.constant 5 : index
    %c0_271 = arith.constant 0 : index
    %c0_272 = arith.constant 0 : index
    %461 = vector.load %arg31[%c5, %c0_271, %c0_272] : memref<6x32x256xbf16, #tpu.memory_space<vmem>>, vector<1x32x256xbf16>
    %462 = vector.shape_cast %461 : vector<1x32x256xbf16> to vector<32x256xbf16>
    %cst_273 = arith.constant dense<0.000000e+00> : vector<1x256xf32>
    %463 = tpu.matmul %460, %462, %cst_273 {dimension_numbers = #tpu.dot_dimension_numbers<[1], [0], [0], [1], [0, 0, 1, 1], [], []>} : vector<1x32xbf16>, vector<32x256xbf16>, vector<1x256xf32> -> vector<1x256xf32>
    %464 = arith.addf %458, %463 : vector<1x256xf32>
    %c0_274 = arith.constant 0 : index
    %c0_275 = arith.constant 0 : index
    %465 = vector.load %arg33[%c0_274, %c0_275] : memref<1x256xf32, #tpu.memory_space<vmem>>, vector<1x256xf32>
    %466 = arith.addf %464, %465 : vector<1x256xf32>
    %cst_276 = arith.constant 0.000000e+00 : f32
    %467 = vector.broadcast %cst_276 : f32 to vector<1x256xf32>
    %468 = arith.maximumf %466, %467 : vector<1x256xf32>
    %469 = arith.truncf %468 : vector<1x256xf32> to vector<1x256xbf16>
    %c0_277 = arith.constant 0 : index
    %c0_278 = arith.constant 0 : index
    %470 = vector.load %arg34[%c0_277, %c0_278] : memref<256x64xbf16, #tpu.memory_space<vmem>>, vector<256x64xbf16>
    %cst_279 = arith.constant dense<0.000000e+00> : vector<1x64xf32>
    %471 = tpu.matmul %469, %470, %cst_279 {dimension_numbers = #tpu.dot_dimension_numbers<[1], [0], [0], [1], [0, 0, 1, 1], [], []>} : vector<1x256xbf16>, vector<256x64xbf16>, vector<1x64xf32> -> vector<1x64xf32>
    %c0_280 = arith.constant 0 : index
    %c0_281 = arith.constant 0 : index
    %472 = vector.load %arg35[%c0_280, %c0_281] : memref<1x64xf32, #tpu.memory_space<vmem>>, vector<1x64xf32>
    %473 = arith.addf %471, %472 : vector<1x64xf32>
    %cst_282 = arith.constant 0.000000e+00 : f32
    %474 = vector.broadcast %cst_282 : f32 to vector<1x64xf32>
    %475 = arith.maximumf %473, %474 : vector<1x64xf32>
    %476 = arith.truncf %475 : vector<1x64xf32> to vector<1x64xbf16>
    %c0_283 = arith.constant 0 : index
    %c0_284 = arith.constant 0 : index
    %477 = vector.load %arg36[%c0_283, %c0_284] : memref<64x1xbf16, #tpu.memory_space<vmem>>, vector<64x1xbf16>
    %cst_285 = arith.constant dense<0.000000e+00> : vector<1x1xf32>
    %478 = tpu.matmul %476, %477, %cst_285 {dimension_numbers = #tpu.dot_dimension_numbers<[1], [0], [0], [1], [0, 0, 1, 1], [], []>} : vector<1x64xbf16>, vector<64x1xbf16>, vector<1x1xf32> -> vector<1x1xf32>
    %c0_286 = arith.constant 0 : index
    %c0_287 = arith.constant 0 : index
    %479 = vector.load %arg37[%c0_286, %c0_287] : memref<1x1xf32, #tpu.memory_space<vmem>>, vector<1x1xf32>
    %480 = arith.addf %478, %479 : vector<1x1xf32>
    %c0_288 = arith.constant 0 : index
    %c0_289 = arith.constant 0 : index
    %c0_290 = arith.constant 0 : index
    %481 = vector.load %arg38[%c0_288, %c0_289, %c0_290] : memref<1x1x1xf32, #tpu.memory_space<vmem>>, vector<1x1x1xf32>
    %482 = vector.shape_cast %481 : vector<1x1x1xf32> to vector<1x1xf32>
    %483 = vector.shape_cast %480 : vector<1x1xf32> to vector<1x1x1xf32>
    tpu.vector_store %arg38[%c0_288, %c0_289, %c0_290], %483 {strides = array<i32>} : memref<1x1x1xf32, #tpu.memory_space<vmem>>, vector<1x1x1xf32>,
    return
  }
  func.func @transform_0(%arg0: i32) -> (i32, i32, i32) {
    %c0_i32 = arith.constant 0 : i32
    %c0_i32_0 = arith.constant 0 : i32
    %c0_i32_1 = arith.constant 0 : i32
    return %arg0, %c0_i32, %c0_i32_0 : i32, i32, i32
  }
  func.func @transform_1(%arg0: i32) -> (i32, i32, i32) {
    %c0_i32 = arith.constant 0 : i32
    %c0_i32_0 = arith.constant 0 : i32
    %c0_i32_1 = arith.constant 0 : i32
    return %arg0, %c0_i32, %c0_i32_0 : i32, i32, i32
  }
  func.func @transform_2(%arg0: i32) -> (i32, i32, i32) {
    %c0_i32 = arith.constant 0 : i32
    %c0_i32_0 = arith.constant 0 : i32
    %c0_i32_1 = arith.constant 0 : i32
    %c0_i32_2 = arith.constant 0 : i32
    return %c0_i32, %c0_i32_0, %c0_i32_1 : i32, i32, i32
  }
  func.func @transform_3(%arg0: i32) -> (i32, i32, i32) {
    %c0_i32 = arith.constant 0 : i32
    %c0_i32_0 = arith.constant 0 : i32
    %c0_i32_1 = arith.constant 0 : i32
    %c0_i32_2 = arith.constant 0 : i32
    return %c0_i32, %c0_i32_0, %c0_i32_1 : i32, i32, i32
  }
  func.func @transform_4(%arg0: i32) -> (i32, i32, i32) {
    %c0_i32 = arith.constant 0 : i32
    %c0_i32_0 = arith.constant 0 : i32
    %c0_i32_1 = arith.constant 0 : i32
    %c0_i32_2 = arith.constant 0 : i32
    return %c0_i32, %c0_i32_0, %c0_i32_1 : i32, i32, i32
  }
  func.func @transform_5(%arg0: i32) -> (i32, i32, i32) {
    %c0_i32 = arith.constant 0 : i32
    %c0_i32_0 = arith.constant 0 : i32
    %c0_i32_1 = arith.constant 0 : i32
    %c0_i32_2 = arith.constant 0 : i32
    return %c0_i32, %c0_i32_0, %c0_i32_1 : i32, i32, i32
  }
  func.func @transform_6(%arg0: i32) -> (i32, i32, i32) {
    %c0_i32 = arith.constant 0 : i32
    %c0_i32_0 = arith.constant 0 : i32
    %c0_i32_1 = arith.constant 0 : i32
    %c0_i32_2 = arith.constant 0 : i32
    return %c0_i32, %c0_i32_0, %c0_i32_1 : i32, i32, i32
  }
  func.func @transform_7(%arg0: i32) -> (i32, i32) {
    %c0_i32 = arith.constant 0 : i32
    %c0_i32_0 = arith.constant 0 : i32
    %c0_i32_1 = arith.constant 0 : i32
    return %c0_i32, %c0_i32_0 : i32, i32
  }
  func.func @transform_8(%arg0: i32) -> (i32, i32) {
    %c0_i32 = arith.constant 0 : i32
    %c0_i32_0 = arith.constant 0 : i32
    %c0_i32_1 = arith.constant 0 : i32
    return %c0_i32, %c0_i32_0 : i32, i32
  }
  func.func @transform_9(%arg0: i32) -> (i32, i32) {
    %c0_i32 = arith.constant 0 : i32
    %c0_i32_0 = arith.constant 0 : i32
    %c0_i32_1 = arith.constant 0 : i32
    return %c0_i32, %c0_i32_0 : i32, i32
  }
  func.func @transform_10(%arg0: i32) -> (i32, i32) {
    %c0_i32 = arith.constant 0 : i32
    %c0_i32_0 = arith.constant 0 : i32
    %c0_i32_1 = arith.constant 0 : i32
    return %c0_i32, %c0_i32_0 : i32, i32
  }
  func.func @transform_11(%arg0: i32) -> (i32, i32) {
    %c0_i32 = arith.constant 0 : i32
    %c0_i32_0 = arith.constant 0 : i32
    %c0_i32_1 = arith.constant 0 : i32
    return %c0_i32, %c0_i32_0 : i32, i32
  }
  func.func @transform_12(%arg0: i32) -> (i32, i32) {
    %c0_i32 = arith.constant 0 : i32
    %c0_i32_0 = arith.constant 0 : i32
    %c0_i32_1 = arith.constant 0 : i32
    return %c0_i32, %c0_i32_0 : i32, i32
  }
  func.func @transform_13(%arg0: i32) -> (i32, i32) {
    %c0_i32 = arith.constant 0 : i32
    %c0_i32_0 = arith.constant 0 : i32
    %c0_i32_1 = arith.constant 0 : i32
    return %c0_i32, %c0_i32_0 : i32, i32
  }
  func.func @transform_14(%arg0: i32) -> (i32, i32) {
    %c0_i32 = arith.constant 0 : i32
    %c0_i32_0 = arith.constant 0 : i32
    %c0_i32_1 = arith.constant 0 : i32
    return %c0_i32, %c0_i32_0 : i32, i32
  }
  func.func @transform_15(%arg0: i32) -> (i32, i32) {
    %c0_i32 = arith.constant 0 : i32
    %c0_i32_0 = arith.constant 0 : i32
    %c0_i32_1 = arith.constant 0 : i32
    return %c0_i32, %c0_i32_0 : i32, i32
  }
  func.func @transform_16(%arg0: i32) -> (i32, i32, i32) {
    %c0_i32 = arith.constant 0 : i32
    %c0_i32_0 = arith.constant 0 : i32
    %c0_i32_1 = arith.constant 0 : i32
    %c0_i32_2 = arith.constant 0 : i32
    return %c0_i32, %c0_i32_0, %c0_i32_1 : i32, i32, i32
  }
  func.func @transform_17(%arg0: i32) -> (i32, i32, i32) {
    %c0_i32 = arith.constant 0 : i32
    %c0_i32_0 = arith.constant 0 : i32
    %c0_i32_1 = arith.constant 0 : i32
    %c0_i32_2 = arith.constant 0 : i32
    return %c0_i32, %c0_i32_0, %c0_i32_1 : i32, i32, i32
  }
  func.func @transform_18(%arg0: i32) -> (i32, i32, i32) {
    %c0_i32 = arith.constant 0 : i32
    %c0_i32_0 = arith.constant 0 : i32
    %c0_i32_1 = arith.constant 0 : i32
    %c0_i32_2 = arith.constant 0 : i32
    return %c0_i32, %c0_i32_0, %c0_i32_1 : i32, i32, i32
  }
  func.func @transform_19(%arg0: i32) -> (i32, i32, i32) {
    %c0_i32 = arith.constant 0 : i32
    %c0_i32_0 = arith.constant 0 : i32
    %c0_i32_1 = arith.constant 0 : i32
    %c0_i32_2 = arith.constant 0 : i32
    return %c0_i32, %c0_i32_0, %c0_i32_1 : i32, i32, i32
  }
  func.func @transform_20(%arg0: i32) -> (i32, i32, i32) {
    %c0_i32 = arith.constant 0 : i32
    %c0_i32_0 = arith.constant 0 : i32
    %c0_i32_1 = arith.constant 0 : i32
    %c0_i32_2 = arith.constant 0 : i32
    return %c0_i32, %c0_i32_0, %c0_i32_1 : i32, i32, i32
  }
  func.func @transform_21(%arg0: i32) -> (i32, i32) {
    %c0_i32 = arith.constant 0 : i32
    %c0_i32_0 = arith.constant 0 : i32
    %c0_i32_1 = arith.constant 0 : i32
    return %c0_i32, %c0_i32_0 : i32, i32
  }
  func.func @transform_22(%arg0: i32) -> (i32, i32) {
    %c0_i32 = arith.constant 0 : i32
    %c0_i32_0 = arith.constant 0 : i32
    %c0_i32_1 = arith.constant 0 : i32
    return %c0_i32, %c0_i32_0 : i32, i32
  }
  func.func @transform_23(%arg0: i32) -> (i32, i32) {
    %c0_i32 = arith.constant 0 : i32
    %c0_i32_0 = arith.constant 0 : i32
    %c0_i32_1 = arith.constant 0 : i32
    return %c0_i32, %c0_i32_0 : i32, i32
  }
  func.func @transform_24(%arg0: i32) -> (i32, i32) {
    %c0_i32 = arith.constant 0 : i32
    %c0_i32_0 = arith.constant 0 : i32
    %c0_i32_1 = arith.constant 0 : i32
    return %c0_i32, %c0_i32_0 : i32, i32
  }
  func.func @transform_25(%arg0: i32) -> (i32, i32) {
    %c0_i32 = arith.constant 0 : i32
    %c0_i32_0 = arith.constant 0 : i32
    %c0_i32_1 = arith.constant 0 : i32
    return %c0_i32, %c0_i32_0 : i32, i32
  }
  func.func @transform_26(%arg0: i32) -> (i32, i32) {
    %c0_i32 = arith.constant 0 : i32
    %c0_i32_0 = arith.constant 0 : i32
    %c0_i32_1 = arith.constant 0 : i32
    return %c0_i32, %c0_i32_0 : i32, i32
  }
  func.func @transform_27(%arg0: i32) -> (i32, i32) {
    %c0_i32 = arith.constant 0 : i32
    %c0_i32_0 = arith.constant 0 : i32
    %c0_i32_1 = arith.constant 0 : i32
    return %c0_i32, %c0_i32_0 : i32, i32
  }
  func.func @transform_28(%arg0: i32) -> (i32, i32) {
    %c0_i32 = arith.constant 0 : i32
    %c0_i32_0 = arith.constant 0 : i32
    %c0_i32_1 = arith.constant 0 : i32
    return %c0_i32, %c0_i32_0 : i32, i32
  }
  func.func @transform_29(%arg0: i32) -> (i32, i32) {
    %c0_i32 = arith.constant 0 : i32
    %c0_i32_0 = arith.constant 0 : i32
    %c0_i32_1 = arith.constant 0 : i32
    return %c0_i32, %c0_i32_0 : i32, i32
  }
  func.func @transform_30(%arg0: i32) -> (i32, i32, i32) {
    %c0_i32 = arith.constant 0 : i32
    %c0_i32_0 = arith.constant 0 : i32
    %c0_i32_1 = arith.constant 0 : i32
    %c0_i32_2 = arith.constant 0 : i32
    return %c0_i32, %c0_i32_0, %c0_i32_1 : i32, i32, i32
  }
  func.func @transform_31(%arg0: i32) -> (i32, i32) {
    %c0_i32 = arith.constant 0 : i32
    %c0_i32_0 = arith.constant 0 : i32
    %c0_i32_1 = arith.constant 0 : i32
    return %c0_i32, %c0_i32_0 : i32, i32
  }
  func.func @transform_32(%arg0: i32) -> (i32, i32) {
    %c0_i32 = arith.constant 0 : i32
    %c0_i32_0 = arith.constant 0 : i32
    %c0_i32_1 = arith.constant 0 : i32
    return %c0_i32, %c0_i32_0 : i32, i32
  }
  func.func @transform_33(%arg0: i32) -> (i32, i32) {
    %c0_i32 = arith.constant 0 : i32
    %c0_i32_0 = arith.constant 0 : i32
    %c0_i32_1 = arith.constant 0 : i32
    return %c0_i32, %c0_i32_0 : i32, i32
  }
  func.func @transform_34(%arg0: i32) -> (i32, i32) {
    %c0_i32 = arith.constant 0 : i32
    %c0_i32_0 = arith.constant 0 : i32
    %c0_i32_1 = arith.constant 0 : i32
    return %c0_i32, %c0_i32_0 : i32, i32
  }
  func.func @transform_35(%arg0: i32) -> (i32, i32) {
    %c0_i32 = arith.constant 0 : i32
    %c0_i32_0 = arith.constant 0 : i32
    %c0_i32_1 = arith.constant 0 : i32
    return %c0_i32, %c0_i32_0 : i32, i32
  }
  func.func @transform_36(%arg0: i32) -> (i32, i32) {
    %c0_i32 = arith.constant 0 : i32
    %c0_i32_0 = arith.constant 0 : i32
    %c0_i32_1 = arith.constant 0 : i32
    return %c0_i32, %c0_i32_0 : i32, i32
  }
  func.func @transform_37(%arg0: i32) -> (i32, i32, i32) {
    %c0_i32 = arith.constant 0 : i32
    %c0_i32_0 = arith.constant 0 : i32
    %c0_i32_1 = arith.constant 0 : i32
    return %arg0, %c0_i32, %c0_i32_0 : i32, i32, i32
  }
  func.func @transform_38(%arg0: i32) -> (i32, i32, i32, i32) {
    %c0_i32 = arith.constant 0 : i32
    %c0_i32_0 = arith.constant 0 : i32
    %c0_i32_1 = arith.constant 0 : i32
    %c0_i32_2 = arith.constant 0 : i32
    return %c0_i32, %arg0, %c0_i32_0, %c0_i32_1 : i32, i32, i32, i32
  }
}

</mosaic_0001>

<bundles_post_ra>
// kernel: tpu_custom_call.1
= control target key start
LH: loop header
LB: loop body
LE: loop exit
PB: predicated region body
PF: predicated region fallthrough
CT: control target
= control target key end

     0   :  { %s10491_s6 = smov 1   ;;  %s10492_s10 = smov 2   ;;  %s11759_s0 = inlined_call_operand.smem [shape: u32[39], index: -1, kind: input, shape index: {}] }
   0x1   :  { %s10541_s5 = sld [smem:[%s11759_s0]]   ;;  %s10493_s14 = smov 3  }
   0x2   :  { %s10546_s9 = sld [smem:[%s11759_s0 + %s10491_s6]]   ;;  %s10494_s18 = smov 4  }
   0x3   :  { %s10551_s13 = sld [smem:[%s11759_s0 + %s10492_s10]]   ;;  %s10495_s22 = smov 5  }
   0x4   :  { %s10556_s17 = sld [smem:[%s11759_s0 + %s10493_s14]]   ;;  %s10496_s26 = smov 6  }
   0x5   :  { %s10561_s21 = sld [smem:[%s11759_s0 + %s10494_s18]]   ;;  %s10497_s30 = smov 7  }
   0x6   :  { %s10566_s25 = sld [smem:[%s11759_s0 + %s10495_s22]]   ;;  %s10498_s4 = smov 8  }
   0x7   :  { %11772 = sst [smem:[#allocation4_spill]] %s10541_s5  ;;  %s10499_s10 = smov 9  }
   0x8   :  { %11773 = sst [smem:[#allocation5_spill]] %s10546_s9  ;;  %s10500_s15 = smov 10  }
   0x9   :  { %s10571_s29 = sld [smem:[%s11759_s0 + %s10496_s26]]   ;;  %s10501_s20 = smov 11  }
   0xa   :  { %s10576_s3 = sld [smem:[%s11759_s0 + %s10497_s30]]   ;;  %s10502_s26 = smov 12  }
   0xb   :  { %s10581_s8 = sld [smem:[%s11759_s0 + %s10498_s4]]   ;;  %s10503_s1 = smov 13  }
   0xc   :  { %s10586_s14 = sld [smem:[%s11759_s0 + %s10499_s10]]   ;;  %s10504_s7 = smov 14  }
   0xd   :  { %s10591_s19 = sld [smem:[%s11759_s0 + %s10500_s15]]   ;;  %s10505_s15 = smov 15  }
   0xe   :  { %s10596_s24 = sld [smem:[%s11759_s0 + %s10501_s20]]   ;;  %s10506_s22 = smov 16  }
   0xf   :  { %s10601_s30 = sld [smem:[%s11759_s0 + %s10502_s26]]   ;;  %s10507_s28 = smov 17  }
  0x10   :  { %11774 = sst [smem:[#allocation6_spill]] %s10576_s3  ;;  %s10528_s10 = smov 38  }
  0x11   :  { %s10606_s6 = sld [smem:[%s11759_s0 + %s10503_s1]]   ;;  %s10527_s1 = smov 37  }
  0x12   :  { %s10611_s12 = sld [smem:[%s11759_s0 + %s10504_s7]]   ;;  %s10508_s7 = smov 18  }
  0x13   :  { %s10616_s20 = sld [smem:[%s11759_s0 + %s10505_s15]]   ;;  %s10509_s15 = smov 19  }
  0x14   :  { %s10621_s27 = sld [smem:[%s11759_s0 + %s10506_s22]]   ;;  %s10510_s22 = smov 20  }
  0x15   :  { %s10626_s4 = sld [smem:[%s11759_s0 + %s10507_s28]]   ;;  %s10511_s28 = smov 21  }
  0x16   :  { %s10631_s9 = sld [smem:[%s11759_s0 + %s10508_s7]]   ;;  %s10512_s7 = smov 22  }
  0x18   :  { %11775 = sst [smem:[#allocation7_spill]] %s10611_s12 }
  0x19   :  { %11776 = sst [smem:[#allocation8_spill]] %s10616_s20 }
  0x1a   :  { %s10636_s20 = sld [smem:[%s11759_s0 + %s10509_s15]]   ;;  %s10513_s15 = smov 23  }
  0x1b   :  { %11777 = sst [smem:[#allocation9_spill]] %s10626_s4 }
  0x1c   :  { %11778 = sst [smem:[#allocation10_spill]] %s10631_s9 }
  0x1d   :  { %s10641_s12 = sld [smem:[%s11759_s0 + %s10510_s22]]   ;;  %s10514_s22 = smov 24  }
  0x1e   :  { %s10646_s4 = sld [smem:[%s11759_s0 + %s10511_s28]]   ;;  %s10515_s28 = smov 25  }
  0x1f   :  { %s10651_s9 = sld [smem:[%s11759_s0 + %s10512_s7]]   ;;  %s10516_s7 = smov 26  }
  0x20   :  { %11779 = sst [smem:[#allocation11_spill]] %s10636_s20 }
  0x21   :  { %s10656_s20 = sld [smem:[%s11759_s0 + %s10513_s15]]   ;;  %s10517_s15 = smov 27  }
  0x23   :  { %11780 = sst [smem:[#allocation12_spill]] %s10641_s12 }
  0x24   :  { %11781 = sst [smem:[#allocation13_spill]] %s10646_s4 }
  0x25   :  { %11782 = sst [smem:[#allocation14_spill]] %s10651_s9 }
  0x26   :  { %s10661_s12 = sld [smem:[%s11759_s0 + %s10514_s22]]   ;;  %s10518_s22 = smov 28  }
  0x27   :  { %11783 = sst [smem:[#allocation15_spill]] %s10656_s20 }
  0x28   :  { %s10666_s4 = sld [smem:[%s11759_s0 + %s10515_s28]]   ;;  %s10519_s28 = smov 29  }
  0x29   :  { %s10671_s9 = sld [smem:[%s11759_s0 + %s10516_s7]]   ;;  %s10520_s7 = smov 30  }
  0x2a   :  { %s10676_s20 = sld [smem:[%s11759_s0 + %s10517_s15]]   ;;  %s10521_s15 = smov 31  }
  0x2c   :  { %11784 = sst [smem:[#allocation16_spill]] %s10661_s12 }
  0x2d   :  { %s10681_s12 = sld [smem:[%s11759_s0 + %s10518_s22]]   ;;  %s10522_s22 = smov 32  }
  0x2e   :  { %11785 = sst [smem:[#allocation17_spill]] %s10666_s4 }
  0x2f   :  { %11786 = sst [smem:[#allocation18_spill]] %s10671_s9 }
  0x30   :  { %11787 = sst [smem:[#allocation19_spill]] %s10676_s20 }
  0x31   :  { %s10686_s4 = sld [smem:[%s11759_s0 + %s10519_s28]]   ;;  %s10523_s28 = smov 33  }
  0x32   :  { %s10691_s9 = sld [smem:[%s11759_s0 + %s10520_s7]]   ;;  %s10524_s7 = smov 34  }
  0x33   :  { %11788 = sst [smem:[#allocation20_spill]] %s10681_s12 }
  0x34   :  { %s10696_s20 = sld [smem:[%s11759_s0 + %s10521_s15]]   ;;  %s10525_s15 = smov 35  }
  0x35   :  { %s10701_s12 = sld [smem:[%s11759_s0 + %s10522_s22]]   ;;  %s10526_s22 = smov 36  }
  0x37   :  { %11789 = sst [smem:[#allocation21_spill]] %s10686_s4 }
  0x38   :  { %11790 = sst [smem:[#allocation22_spill]] %s10691_s9 }
  0x39   :  { %s10706_s4 = sld [smem:[%s11759_s0 + %s10523_s28]]  }
  0x3a   :  { %11791 = sst [smem:[#allocation23_spill]] %s10696_s20 }
  0x3b   :  { %11792 = sst [smem:[#allocation24_spill]] %s10701_s12 }
  0x3c   :  { %s10711_s9 = sld [smem:[%s11759_s0 + %s10524_s7]]  }
  0x3d   :  { %s10716_s20 = sld [smem:[%s11759_s0 + %s10525_s15]]  }
  0x3e   :  { %s8593_s12 = sld [smem:[%s11759_s0 + %s10526_s22]]  }
  0x3f   :  { %11793 = sst [smem:[#allocation25_spill]] %s10706_s4 }
  0x40   :  { %s10724_s4 = sld [smem:[%s11759_s0 + %s10527_s1]]  }
  0x42   :  { %11794 = sst [smem:[#allocation26_spill]] %s10711_s9 }
  0x43   :  { %s10729_s9 = sld [smem:[%s11759_s0 + %s10528_s10]]  }
  0x44   :  { %v83_v0 = vstv %s8593_s12 }
  0x45   :  { %84 = vst [vmem:[#allocation2] sm:$0x1] %v83_v0 }
  0x46   :  { %s10731_s15 = smov 0   ;;  %s10733_s16 = smov 0  }
  0x47   :  { %s10735_s18 = smov 0  }
  0x48 LB: > { %s10744_s0 = sadd.s32 4294967295, %s10489_s18   ;;  %s10746_s12 = sadd.s32 1, %s10489_s18   ;;  %s10489_s18 = sphi %s10735_s18, %s11823_s18   ;;  %s10485_s16 = sphi %s10733_s16, %s11822_s16   ;;  %s10481_s15 = sphi %s10731_s15, %s11821_s15  }
  0x49   : > { %s907_s22 = ssub.s32 %s10489_s18, %s10746_s12  ;;  %s910_s23 = sadd.s32 1, %s10485_s16 }
  0x4a   : > { %p908_p0 = scmp.eq.s32.totalorder %s907_s22, 0  ;;  %p920_p1 = scmp.ne.s32.totalorder %s10485_s16, %s10481_s15 }
  0x4b   : > { %p921_p2 = scmp.eq.s32.totalorder %s10744_s0, 3  ;;  %p8600_p3 = scmp.ge.s32.totalorder %s10489_s18, 1 }
  0x4c   : > { %s10754_s26 = scalar_select %p908_p0, %s10485_s16, %s910_s23  }
  0x4d   : > { %p10756_p4 = por %p921_p2, %p920_p1  ;;  %p1063_p5 = scmp.lt.s32.totalorder %s10489_s18, 5 }
  0x4f   : > { %p1064_p6 = pnand %p8600_p3, %p1063_p5 }
  0x50   : > { %v10066_v1 = vld [vmem:[%s10561_s21] sm:$0xff] (!%p1064_p6)   ;;  %v10529_v2 = vmov (!%p1064_p6), 0.0   ;;  %s11796_s5 = sld [smem:[#allocation4_spill]] (!%p1064_p6)  ;;  %v10067_v3 = vld [vmem:[%s10561_s21 + $0x8] sm:$0xff] (!%p1064_p6)   ;;  %vm10530_vm0 = vmmov (!%p1064_p6), 0   ;;  %p1161_p7 = scmp.lt.s32.totalorder (!%p1064_p6), %s10744_s0, 3 }
  0x51   : > { %1067 = sbr.rel (%p1064_p6) target bundleno = 8539 (0x215b), region = 168  ;;  %9708 = vmatprep.subr.bf16.mxu1 (!%p1064_p6), %v10529_v2  ;;  %9700 = vmatprep.subr.bf16.mxu0 (!%p1064_p6), %v10529_v2  ;;  %v10068_v4 = vld [vmem:[%s10551_s13] sm:$0xff] (!%p1064_p6)   ;;  %vm1197_vm1 = vcmask (!%p1064_p6), 261120   ;;  %v10069_v5 = vld [vmem:[%s10551_s13 + $0x8] sm:$0xff] (!%p1064_p6)   ;;  %v10074_v10 = vld [vmem:[%s10551_s13 + $0x10] sm:$0xff] (!%p1064_p6)   ;;  %vm1362_vm2 = vcmask (!%p1064_p6), 64512  }
  0x52   : > { %9709 = vmatpush3.bf16.msra.mxu1 (!%p1064_p6), %v10066_v1  ;;  %9712 = vmatprep.mubr.msk.bf16.mxu1 (!%p1064_p6), %vm10530_vm0, %v10529_v2  ;;  %v10070_v8 = vld [vmem:[%s10571_s29] sm:$0xff] (!%p1064_p6)   ;;  %v10072_v9 = vld [vmem:[%s10571_s29 + $0x8] sm:$0xff] (!%p1064_p6)   ;;  %v10075_v11 = vld [vmem:[%s10551_s13 + $0x18] sm:$0xff] (!%p1064_p6)   ;;  %vm1409_vm3 = vcmask (!%p1064_p6), 46080   ;;  %vm1675_vm4 = vcmask (!%p1064_p6), 1042432   ;;  %vm1671_vm5 = vcmask (!%p1064_p6), 48128  }
  0x53   : > { %9710 = vmatprep.subr.bf16.mxu1 (!%p1064_p6), %v10529_v2  ;;  %9704 = vmatprep.mubr.msk.bf16.mxu0 (!%p1064_p6), %vm10530_vm0, %v10529_v2  ;;  %v8607_v12 = vld [vmem:[%s10566_s25] ss:$0 sm:$0xff] (!%p1064_p6)  ;;  %v10071_v27 = vld [vmem:[%s10561_s21 + $0x10] sm:$0xff] (!%p1064_p6)   ;;  %v10073_v28 = vld [vmem:[%s10561_s21 + $0x18] sm:$0xff] (!%p1064_p6)   ;;  %s11797_s3 = sld [smem:[#allocation6_spill]] (!%p1064_p6)  ;;  %s1158_s7 = sand.u32 (!%p1064_p6), 1, %s10481_s15  }
  0x54   : > { %9701 = vmatpush3.bf16.msra.mxu0 (!%p1064_p6), %v10068_v4  ;;  %v8603_v14 = vld [vmem:[%s10556_s17] ss:$0 sm:$0xff] (!%p1064_p6)  ;;  %v8629_v42 = vld [vmem:[%s10566_s25 + $0x1] ss:$0 sm:$0xff] (!%p1064_p6)  ;;  %v10076_v60 = vld [vmem:[%s10571_s29 + $0x10] sm:$0xff] (!%p1064_p6)   ;;  %s8601_s11 = sshll.u32 (!%p1064_p6), %s1158_s7, 4 }
  0x55   : > { %9702 = vmatprep.subr.bf16.mxu0 (!%p1064_p6), %v10529_v2  ;;  %v8620_v47 = vld [vmem:[%s10556_s17 + $0x1] ss:$0 sm:$0xff] (!%p1064_p6)  ;;  %v10077_v61 = vld [vmem:[%s10571_s29 + $0x18] sm:$0xff] (!%p1064_p6)   ;;  %s10940_s18 = scalar_lea.vmem (!%p1064_p6), [#allocation3], %s8601_s11  ;;  %vm2371_vm6 = vcmask (!%p1064_p6), 259072   ;;  %s11798_s15 = sld [smem:[#allocation10_spill]] (!%p1064_p6) }
  0x56   : > { %9711 = vmatpush3.bf16.msra.mxu1 (!%p1064_p6), %v10067_v3  ;;  %s11800_s23 = sld [smem:[#allocation7_spill]] (!%p1064_p6)  ;;  %s11803_s7 = sld [smem:[#allocation11_spill]] (!%p1064_p6)  ;;  %vm7748_vm7 = vcmask (!%p1064_p6), 1040384   ;;  %vm7749_vm8 = vcmask (!%p1064_p6), 1041408   ;;  %vm7744_vm9 = vcmask (!%p1064_p6), 23552   ;;  %vm8383_vm10 = vcmask (!%p1064_p6), 523264  }
  0x57   : > { %9724 = vmatprep.subr.bf16.mxu1 (!%p1064_p6), %v10529_v2  ;;  %s11804_s11 = sld [smem:[#allocation9_spill]] (!%p1064_p6)  ;;  %vm8427_vm11 = vcmask (!%p1064_p6), 0  }
  0x58   : > { %s10772_s28 = scalar_select %p1161_p7, %s10744_s0, 3  ;;  %9703 = vmatpush3.bf16.msra.mxu0 %v10069_v5 }
  0x59   : > { %9716 = vmatprep.subr.bf16.mxu0 %v10529_v2 }
  0x5a   : > { %s8602_s2 = sshll.u32 %s10772_s28, 3 }
  0x5b   : > { %s10778_s10 = scalar_lea.vmem %s11796_s5, %s8602_s2  ;;  %s11799_s22 = smov %s11798_s15 }
  0x5c   : > { %v1172_v6 = vld [vmem:[%s10778_s10] sm:$0x3f]  ;;  %s11801_s2 = sld [smem:[#allocation8_spill]] }
  0x5d   : > { %v10782_v7 = vpack.c.bf16 %v1172_v6, %v1172_v6 }
  0x5f   : > { %9713 = vmatmul.mubr.msk.bf16.vlgmr.msra.gmra.mrb[0].mxu1 %vm1197_vm1, %v10782_v7  ;;  %9705 = vmatmul.mubr.msk.bf16.vlgmr.msra.gmra.mrb[0].mxu0 %vm1197_vm1, %v10782_v7 }
  0x60   : > { %9726 = vmatprep.mubr.msk.bf16.mxu1 %vm10530_vm0, %v10529_v2  ;;  %9720 = vmatprep.mubr.msk.bf16.mxu0 %vm10530_vm0, %v10529_v2 }
  0x61   : > { %9717 = vmatpush3.bf16.msra.mxu0 %v10070_v8 }
  0x62   : > { %9718 = vmatprep.subr.bf16.mxu0 %v10529_v2 }
  0x65   : > { %9719 = vmatpush3.bf16.msra.mxu0 %v10072_v9 }
  0x66   : > { %9730 = vmatprep.subr.bf16.mxu0 %v10529_v2 }
  0x68   : > { %9721 = vmatmul.mubr.msk.bf16.vlgmr.msra.gmra.mrb[4].mxu0 %vm1197_vm1, %v10782_v7 }
  0x69   : > { %9731 = vmatpush3.bf16.msra.mxu0 %v10074_v10  ;;  %9734 = vmatprep.mubr.msk.bf16.mxu0 %vm10530_vm0, %v10529_v2 }
  0x6a   : > { %9732 = vmatprep.subr.bf16.mxu0 %v10529_v2 }
  0x6d   : > { %9733 = vmatpush3.bf16.msra.mxu0 %v10075_v11 }
  0x6e   : > { %9746 = vmatprep.subr.bf16.mxu0 %v10529_v2 }
  0x70   : > { %9735 = vmatmul.mubr.msk.bf16.vlgmr.msra.gmra.mrb[8].mxu0 %vm1197_vm1, %v10782_v7 }
  0x71   : > { %9750 = vmatprep.mubr.msk.bf16.mxu0 %vm10530_vm0, %v10529_v2  ;;  %9747 = vmatpush3.bf16.msra.mxu0 %v10076_v60 }
  0x72   : > { %9748 = vmatprep.subr.bf16.mxu0 %v10529_v2 }
  0x75   : > { %9749 = vmatpush3.bf16.msra.mxu0 %v10077_v61 }
  0x76   : > { %9760 = vmatprep.subr.bf16.mxu0 %v10529_v2 }
  0x78   : > { %9751 = vmatmul.mubr.msk.bf16.vlgmr.msra.gmra.mrb[12].mxu0 %vm1197_vm1, %v10782_v7 }
  0x79   : > { %9762 = vmatprep.mubr.msk.bf16.mxu0 %vm10530_vm0, %v10529_v2 }
 0x132   : > { %v1298_v13 = vpop.f32.mrb[0].mxu1  ;;  %v1235_v15 = vpop.f32.mrb[0].mxu0 }
 0x133   : > { %v1299_v16 = vadd.f32 %v8607_v12, %v1298_v13  ;;  %v9714_v17 = vpop.f32.mrb[1].mxu1  ;;  %v9706_v18 = vpop.f32.mrb[1].mxu0  ;;  %v1236_v25 = vadd.f32 %v8603_v14, %v1235_v15  ;;  %v10078_v14 = vld [vmem:[%s10561_s21 + $0x20] sm:$0xff]  }
 0x134   : > { %v1301_v19 = vpop.f32.mrb[2].mxu1  ;;  %v1238_v20 = vpop.f32.mrb[2].mxu0  ;;  %v10079_v18 = vld [vmem:[%s10561_s21 + $0x28] sm:$0xff]  }
 0x135   : > { %v1361_v21 = vpack.c.bf16 %v1299_v16, %v1299_v16  ;;  %v9715_v22 = vpop.f32.mrb[3].mxu1  ;;  %v9707_v23 = vpop.f32.mrb[3].mxu0  ;;  %v1360_v26 = vpack.c.bf16 %v1236_v25, %v1236_v25 }
 0x137   : > { %v1367_v24 = vsel %vm1362_vm2, %v1361_v21, 0 }
 0x138   : > { %9725 = vmatpush3.bf16.xpose.msra.mxu1 %v1367_v24 }
 0x139   : > { %9738 = vmatprep.subr.bf16.mxu1 %v10529_v2 }
 0x13b   : > { %v1354_v29 = vpop.f32.mrb[4].mxu0 }
 0x13c   : > { %v9722_v30 = vpop.f32.mrb[5].mxu0  ;;  %v1422_v52 = vpack.c.bf16 %v1354_v29, %v1354_v29  ;;  %v10080_v29 = vld [vmem:[%s10551_s13 + $0x20] sm:$0xff]  }
 0x13d   : > { %v1357_v31 = vpop.f32.mrb[6].mxu0 }
 0x13e   : > { %v9723_v32 = vpop.f32.mrb[7].mxu0  ;;  %v1724_v54 = vsel %vm1675_vm4, %v1422_v52, 0  ;;  %v10081_v31 = vld [vmem:[%s10551_s13 + $0x28] sm:$0xff]   ;;  %v10082_v52 = vld [vmem:[%s10571_s29 + $0x20] sm:$0xff]  }
 0x13f   : > { %9727 = vmatmul.mubr.msk.bf16.vlgmr.msra.gmra.mrb[4].mxu1 %vm1362_vm2, %v1360_v26  ;;  %v8657_v32 = vld [vmem:[%s10566_s25 + $0x2] ss:$0 sm:$0xff] }
 0x140   : > { %9739 = vmatpush3.bf16.msra.mxu1 %v10071_v27  ;;  %9742 = vmatprep.mubr.msk.bf16.mxu1 %vm10530_vm0, %v10529_v2 }
 0x141   : > { %9740 = vmatprep.subr.bf16.mxu1 %v10529_v2 }
 0x143   : > { %v1482_v33 = vpop.f32.mrb[8].mxu0 }
 0x144   : > { %9741 = vmatpush3.bf16.msra.mxu1 %v10073_v28  ;;  %v9736_v34 = vpop.f32.mrb[9].mxu0  ;;  %v1483_v51 = vadd.f32 %v8620_v47, %v1482_v33 }
 0x145   : > { %9754 = vmatprep.subr.bf16.mxu1 %v10529_v2  ;;  %v1485_v35 = vpop.f32.mrb[10].mxu0 }
 0x146   : > { %v9737_v36 = vpop.f32.mrb[11].mxu0  ;;  %v1610_v53 = vpack.c.bf16 %v1483_v51, %v1483_v51 }
 0x147   : > { %9743 = vmatmul.mubr.msk.bf16.vlgmr.msra.gmra.mrb[8].mxu1 %vm1197_vm1, %v10782_v7 }
 0x148   : > { %9756 = vmatprep.mubr.msk.bf16.mxu1 %vm10530_vm0, %v10529_v2 }
 0x14b   : > { %v1604_v15 = vpop.f32.mrb[12].mxu0 }
 0x14c   : > { %v9752_v16 = vpop.f32.mrb[13].mxu0  ;;  %v1670_v20 = vpack.c.bf16 %v1604_v15, %v1604_v15  ;;  %v10084_v15 = vld [vmem:[%s10561_s21 + $0x30] sm:$0xff]  }
 0x14d   : > { %v1607_v17 = vpop.f32.mrb[14].mxu0 }
 0x14e   : > { %v9753_v19 = vpop.f32.mrb[15].mxu0  ;;  %v1677_v21 = vsel %vm1675_vm4, %v1670_v20, 0 }
 0x14f   : > { %9761 = vmatpush3.bf16.msra.mxu0 %v1677_v21 }
 0x150   : > { %9772 = vmatprep.subr.bf16.mxu0 %v10529_v2 }
 0x212   : > { %v1403_v37 = vpop.f32.mrb[4].mxu1 }
 0x213   : > { %v9728_v38 = vpop.f32.mrb[5].mxu1  ;;  %v1410_v39 = vsel %vm1409_vm3, %v1403_v37, -inf }
 0x214   : > { %1411 = vmax.xlane.f32.xlu0 %v1410_v39  ;;  %v1406_v40 = vpop.f32.mrb[6].mxu1 }
 0x215   : > { %v9729_v41 = vpop.f32.mrb[7].mxu1 }
 0x21a   : > { %v1547_v43 = vpop.f32.mrb[8].mxu1 }
 0x21b   : > { %v1548_v44 = vadd.f32 %v8629_v42, %v1547_v43  ;;  %v9744_v45 = vpop.f32.mrb[9].mxu1 }
 0x21c   : > { %v1550_v46 = vpop.f32.mrb[10].mxu1  ;;  %v8648_v45 = vld [vmem:[%s10556_s17 + $0x2] ss:$0 sm:$0xff] }
 0x21d   : > { %v1611_v48 = vpack.c.bf16 %v1548_v44, %v1548_v44  ;;  %v9745_v49 = vpop.f32.mrb[11].mxu1 }
 0x21f   : > { %v1616_v50 = vsel %vm1362_vm2, %v1611_v48, 0 }
 0x220   : > { %9755 = vmatpush3.bf16.xpose.msra.mxu1 %v1616_v50 }
 0x221   : > { %9766 = vmatprep.subr.bf16.mxu1 %v10529_v2 }
 0x227   : > { %9757 = vmatmul.mubr.msk.bf16.vlgmr.msra.gmra.mrb[12].mxu1 %vm1362_vm2, %v1610_v53  ;;  %v10083_v53 = vld [vmem:[%s10571_s29 + $0x28] sm:$0xff]  }
 0x228   : > { %9767 = vmatpush3.bf16.msra.mxu1 %v1724_v54  ;;  %9768 = vmatprep.mubr.msk.bf16.mxu1 %vm10530_vm0, %v10529_v2 }
 0x229   : > { %9780 = vmatprep.subr.bf16.mxu1 %v10529_v2 }
 0x2a1   : > { %v1412_v55 = vpop.xlane.xlu0 %1411 }
 0x2a2   : > { %v1413_v56 = vsub.f32 %v1403_v37, %v1412_v55 }
 0x2a4   : > { %v1414_v57 = vmul.f32 1.442695, %v1413_v56 }
 0x2a6   : > { %10426 = vpow2.f32 %v1414_v57 }
 0x2b0   : > { %v10427_v58 = vpop.eup %10426 }
 0x2b1   : > { %v1416_v59 = vsel %vm1409_vm3, %v10427_v58, 0.0 }
 0x2b2   : > { %1417 = vadd.xlane.f32.xlu1 %v1416_v59 }
 0x2fa   : > { %v1652_v62 = vpop.f32.mrb[12].mxu1 }
 0x2fb   : > { %v9758_v63 = vpop.f32.mrb[13].mxu1  ;;  %v1658_v0 = vsel %vm1409_vm3, %v1652_v62, -inf }
 0x2fc   : > { %1659 = vmax.xlane.f32.xlu0 %v1658_v0  ;;  %v1655_v1 = vpop.f32.mrb[14].mxu1 }
 0x2fd   : > { %v9759_v3 = vpop.f32.mrb[15].mxu1 }
 0x33f   : > { %v1418_v4 = vpop.xlane.xlu1 %1417 }
 0x340   : > { %10428 = vrcp.f32 %v1418_v4 }
 0x34a   : > { %v10429_v5 = vpop.eup %10428 }
 0x34b   : > { %v10844_v6 = vmul.f32 %v10429_v5, %v10427_v58 }
 0x34d   : > { %v1421_v8 = vpack.c.bf16 %v10844_v6, %v10844_v6 }
 0x34f   : > { %9769 = vmatmul.mubr.msk.bf16.vlgmr.msra.gmra.mrb[16].mxu1 %vm1671_vm5, %v1421_v8 }
 0x350   : > { %9784 = vmatprep.mubr.msk.bf16.mxu1 %vm10530_vm0, %v10529_v2  ;;  %9781 = vmatpush3.bf16.msra.mxu1 %v10078_v14 }
 0x351   : > { %9782 = vmatprep.subr.bf16.mxu1 %v10529_v2 }
 0x354   : > { %9783 = vmatpush3.bf16.msra.mxu1 %v10079_v18  ;;  %v10085_v18 = vld [vmem:[%s10561_s21 + $0x38] sm:$0xff]  }
 0x355   : > { %9796 = vmatprep.subr.bf16.mxu1 %v10529_v2 }
 0x357   : > { %9785 = vmatmul.mubr.msk.bf16.vlgmr.msra.gmra.mrb[20].mxu1 %vm1197_vm1, %v10782_v7 }
 0x358   : > { %9798 = vmatprep.mubr.msk.bf16.mxu1 %vm10530_vm0, %v10529_v2 }
 0x389   : > { %v1660_v9 = vpop.xlane.xlu0 %1659 }
 0x38a   : > { %v1661_v10 = vsub.f32 %v1652_v62, %v1660_v9  ;;  %v10086_v9 = vld [vmem:[%s10551_s13 + $0x30] sm:$0xff]  }
 0x38c   : > { %v1662_v11 = vmul.f32 1.442695, %v1661_v10  ;;  %v10087_v10 = vld [vmem:[%s10551_s13 + $0x38] sm:$0xff]  }
 0x38e   : > { %10430 = vpow2.f32 %v1662_v11 }
 0x398   : > { %v10431_v12 = vpop.eup %10430 }
 0x399   : > { %v1664_v13 = vsel %vm1409_vm3, %v10431_v12, 0.0 }
 0x39a   : > { %1665 = vadd.xlane.f32.xlu1 %v1664_v13 }
 0x422   : > { %v1760_v22 = vpop.f32.mrb[16].mxu1 }
 0x423   : > { %v9770_v23 = vpop.f32.mrb[17].mxu1 }
 0x424   : > { %v1763_v24 = vpop.f32.mrb[18].mxu1 }
 0x425   : > { %v9771_v25 = vpop.f32.mrb[19].mxu1 }
 0x427   : > { %v1666_v26 = vpop.xlane.xlu1 %1665 }
 0x428   : > { %10432 = vrcp.f32 %v1666_v26 }
 0x42a   : > { %v1890_v33 = vpop.f32.mrb[20].mxu1 }
 0x42b   : > { %v1891_v34 = vadd.f32 %v8657_v32, %v1890_v33  ;;  %v9786_v35 = vpop.f32.mrb[21].mxu1  ;;  %v8675_v32 = vld [vmem:[%s10556_s17 + $0x3] ss:$0 sm:$0xff] }
 0x42c   : > { %v1893_v36 = vpop.f32.mrb[22].mxu1 }
 0x42d   : > { %v1954_v37 = vpack.c.bf16 %v1891_v34, %v1891_v34  ;;  %v9787_v38 = vpop.f32.mrb[23].mxu1 }
 0x42e   : > { %v10088_v38 = vld [vmem:[%s10571_s29 + $0x30] sm:$0xff]  }
 0x42f   : > { %v1959_v39 = vsel %vm1362_vm2, %v1954_v37, 0 }
 0x430   : > { %9797 = vmatpush3.bf16.xpose.msra.mxu1 %v1959_v39  ;;  %v10089_v39 = vld [vmem:[%s10571_s29 + $0x38] sm:$0xff]  }
 0x431   : > { %9808 = vmatprep.subr.bf16.mxu1 %v10529_v2 }
 0x432   : > { %v10433_v27 = vpop.eup %10432 }
 0x433   : > { %v10862_v28 = vmul.f32 %v10433_v27, %v10431_v12  ;;  %v8684_v27 = vld [vmem:[%s10566_s25 + $0x3] ss:$0 sm:$0xff] }
 0x435   : > { %v1669_v30 = vpack.c.bf16 %v10862_v28, %v10862_v28  ;;  %v1719_v13 = vadd.f32 %v10862_v28, %v10844_v6 }
 0x437   : > { %9763 = vmatmul.mubr.msk.bf16.vlgmr.msra.gmra.mrb[16].mxu0 %vm1671_vm5, %v1669_v30 }
 0x438   : > { %9773 = vmatpush3.bf16.msra.mxu0 %v10080_v29  ;;  %9776 = vmatprep.mubr.msk.bf16.mxu0 %vm10530_vm0, %v10529_v2 }
 0x439   : > { %9774 = vmatprep.subr.bf16.mxu0 %v10529_v2 }
 0x43c   : > { %9775 = vmatpush3.bf16.msra.mxu0 %v10081_v31 }
 0x43d   : > { %9788 = vmatprep.subr.bf16.mxu0 %v10529_v2 }
 0x43f   : > { %9777 = vmatmul.mubr.msk.bf16.vlgmr.msra.gmra.mrb[20].mxu0 %vm1197_vm1, %v10782_v7 }
 0x440   : > { %9792 = vmatprep.mubr.msk.bf16.mxu0 %vm10530_vm0, %v10529_v2  ;;  %9789 = vmatpush3.bf16.msra.mxu0 %v10082_v52 }
 0x441   : > { %9790 = vmatprep.subr.bf16.mxu0 %v10529_v2 }
 0x444   : > { %9791 = vmatpush3.bf16.msra.mxu0 %v10083_v53 }
 0x445   : > { %9802 = vmatprep.subr.bf16.mxu0 %v10529_v2 }
 0x447   : > { %9793 = vmatmul.mubr.msk.bf16.vlgmr.msra.gmra.mrb[24].mxu0 %vm1197_vm1, %v10782_v7 }
 0x448   : > { %9804 = vmatprep.mubr.msk.bf16.mxu0 %vm10530_vm0, %v10529_v2 }
 0x50a   : > { %v1713_v40 = vpop.f32.mrb[16].mxu0 }
 0x50b   : > { %v10880_v41 = vadd.f32 %v1760_v22, %v1713_v40  ;;  %v9764_v42 = vpop.f32.mrb[17].mxu0 }
 0x50c   : > { %v1716_v43 = vpop.f32.mrb[18].mxu0 }
 0x50d   : > { %v9765_v44 = vpop.f32.mrb[19].mxu0 }
 0x512   : > { %v1825_v46 = vpop.f32.mrb[20].mxu0 }
 0x513   : > { %v1826_v47 = vadd.f32 %v8648_v45, %v1825_v46  ;;  %v9778_v48 = vpop.f32.mrb[21].mxu0 }
 0x514   : > { %v1828_v49 = vpop.f32.mrb[22].mxu0 }
 0x515   : > { %v1953_v50 = vpack.c.bf16 %v1826_v47, %v1826_v47  ;;  %v9779_v51 = vpop.f32.mrb[23].mxu0 }
 0x517   : > { %9799 = vmatmul.mubr.msk.bf16.vlgmr.msra.gmra.mrb[24].mxu1 %vm1362_vm2, %v1953_v50 }
 0x518   : > { %9812 = vmatprep.mubr.msk.bf16.mxu1 %vm10530_vm0, %v10529_v2  ;;  %9809 = vmatpush3.bf16.msra.mxu1 %v10086_v9 }
 0x519   : > { %9810 = vmatprep.subr.bf16.mxu1 %v10529_v2 }
 0x51a   : > { %v1947_v0 = vpop.f32.mrb[24].mxu0 }
 0x51b   : > { %v9794_v1 = vpop.f32.mrb[25].mxu0  ;;  %v2013_v5 = vpack.c.bf16 %v1947_v0, %v1947_v0 }
 0x51c   : > { %v1950_v3 = vpop.f32.mrb[26].mxu0  ;;  %9811 = vmatpush3.bf16.msra.mxu1 %v10087_v10  ;;  %v8697_v1 = vld [vmem:[%s11797_s3] ss:$0 sm:$0xff] }
 0x51d   : > { %v9795_v4 = vpop.f32.mrb[27].mxu0  ;;  %v2018_v8 = vsel %vm1675_vm4, %v2013_v5, 0  ;;  %9824 = vmatprep.subr.bf16.mxu1 %v10529_v2  ;;  %v10466_v3 = vld [vmem:[%s10778_s10] sm:$0x3f]  ;;  %s11802_s10 = sld [smem:[#allocation12_spill]] }
 0x51e   : > { %9803 = vmatpush3.bf16.msra.mxu0 %v2018_v8 }
 0x51f   : > { %9816 = vmatprep.subr.bf16.mxu0 %v10529_v2  ;;  %9813 = vmatmul.mubr.msk.bf16.vlgmr.msra.gmra.mrb[28].mxu1 %vm1197_vm1, %v10782_v7 }
 0x520   : > { %9828 = vmatprep.mubr.msk.bf16.mxu1 %vm10530_vm0, %v10529_v2  ;;  %9825 = vmatpush3.bf16.msra.mxu1 %v10088_v38 }
 0x521   : > { %9826 = vmatprep.subr.bf16.mxu1 %v10529_v2 }
 0x524   : > { %9827 = vmatpush3.bf16.msra.mxu1 %v10089_v39 }
 0x525   : > { %9838 = vmatprep.subr.bf16.mxu1 %v10529_v2 }
 0x527   : > { %9829 = vmatmul.mubr.msk.bf16.vlgmr.msra.gmra.mrb[32].mxu1 %vm1197_vm1, %v10782_v7 }
 0x528   : > { %9840 = vmatprep.mubr.msk.bf16.mxu1 %vm10530_vm0, %v10529_v2 }
 0x5ea   : > { %v1995_v54 = vpop.f32.mrb[24].mxu1 }
 0x5eb   : > { %v9800_v55 = vpop.f32.mrb[25].mxu1  ;;  %v2001_v56 = vsel %vm1409_vm3, %v1995_v54, -inf }
 0x5ec   : > { %2002 = vmax.xlane.f32.xlu0 %v2001_v56  ;;  %v1998_v57 = vpop.f32.mrb[26].mxu1 }
 0x5ed   : > { %v9801_v58 = vpop.f32.mrb[27].mxu1 }
 0x5f2   : > { %v2121_v6 = vpop.f32.mrb[28].mxu1 }
 0x5f3   : > { %v9814_v19 = vpop.f32.mrb[29].mxu1  ;;  %v2122_v36 = vadd.f32 %v8675_v32, %v2121_v6  ;;  %v2410_v6 = vld [vmem:[%s10591_s19 + $0x48] sm:$0xff]  ;;  %v2404_v32 = vld [vmem:[%s10591_s19 + $0x18] sm:$0xff] }
 0x5f4   : > { %v2124_v20 = vpop.f32.mrb[30].mxu1 }
 0x5f5   : > { %v9815_v21 = vpop.f32.mrb[31].mxu1  ;;  %v2249_v37 = vpack.c.bf16 %v2122_v36, %v2122_v36 }
 0x679   : > { %v2003_v59 = vpop.xlane.xlu0 %2002 }
 0x67a   : > { %v2004_v60 = vsub.f32 %v1995_v54, %v2003_v59 }
 0x67c   : > { %v2005_v61 = vmul.f32 1.442695, %v2004_v60 }
 0x67e   : > { %10434 = vpow2.f32 %v2005_v61 }
 0x688   : > { %v10435_v62 = vpop.eup %10434 }
 0x689   : > { %v2007_v63 = vsel %vm1409_vm3, %v10435_v62, 0.0 }
 0x68a   : > { %2008 = vadd.xlane.f32.xlu1 %v2007_v63 }
 0x717   : > { %v2009_v11 = vpop.xlane.xlu1 %2008 }
 0x718   : > { %10436 = vrcp.f32 %v2009_v11 }
 0x722   : > { %v10437_v12 = vpop.eup %10436 }
 0x723   : > { %v2011_v14 = vmul.f32 %v10437_v12, %v10435_v62 }
 0x725   : > { %v10909_v16 = vadd.f32 %v2011_v14, %v1719_v13  ;;  %v2012_v17 = vpack.c.bf16 %v2011_v14, %v2011_v14 }
 0x727   : > { %9805 = vmatmul.mubr.msk.bf16.vlgmr.msra.gmra.mrb[28].mxu0 %vm1671_vm5, %v2012_v17  ;;  %v2402_v17 = vld [vmem:[%s10591_s19 + $0x8] sm:$0xff] }
 0x728   : > { %9817 = vmatpush3.bf16.msra.mxu0 %v10084_v15  ;;  %9820 = vmatprep.mubr.msk.bf16.mxu0 %vm10530_vm0, %v10529_v2  ;;  %v2401_v15 = vld [vmem:[%s10591_s19] sm:$0xff]  ;;  %v8702_v20 = vcombine.low %v2402_v17, %v2410_v6  ;;  %v8703_v21 = vcombine.high %v2402_v17, %v2410_v6  ;;  %v2423_v17 = vld [vmem:[%s10591_s19 + $0xb0] sm:$0xff]  ;;  %v2424_v6 = vld [vmem:[%s10591_s19 + $0xb8] sm:$0xff] }
 0x729   : > { %9818 = vmatprep.subr.bf16.mxu0 %v10529_v2 }
 0x72c   : > { %9819 = vmatpush3.bf16.msra.mxu0 %v10085_v18 }
 0x72d   : > { %9832 = vmatprep.subr.bf16.mxu0 %v10529_v2 }
 0x72f   : > { %9821 = vmatmul.mubr.msk.bf16.vlgmr.msra.gmra.mrb[32].mxu0 %vm1197_vm1, %v10782_v7  ;;  %v2243_v7 = vpop.f32.mrb[32].mxu1 }
 0x730   : > { %9834 = vmatprep.mubr.msk.bf16.mxu0 %vm10530_vm0, %v10529_v2  ;;  %v9830_v50 = vpop.f32.mrb[33].mxu1  ;;  %v2309_v53 = vpack.c.bf16 %v2243_v7, %v2243_v7  ;;  %v2428_v7 = vld [vmem:[%s10591_s19 + $0xd8] sm:$0xff] }
 0x731   : > { %v2246_v51 = vpop.f32.mrb[34].mxu1 }
 0x732   : > { %v9831_v52 = vpop.f32.mrb[35].mxu1  ;;  %v2314_v54 = vsel %vm1675_vm4, %v2309_v53, 0 }
 0x733   : > { %9839 = vmatpush3.bf16.msra.mxu1 %v2314_v54  ;;  %v2405_v54 = vld [vmem:[%s10591_s19 + $0x20] sm:$0xff] }
 0x734   : > { %2721 = vmatprep.subr.bf16.mxu1 %v8703_v21 }
 0x7fa   : > { %v2054_v22 = vpop.f32.mrb[28].mxu0 }
 0x7fb   : > { %v2061_v23 = vadd.f32 %v2054_v22, %v10880_v41  ;;  %v9806_v24 = vpop.f32.mrb[29].mxu0  ;;  %v2417_v22 = vld [vmem:[%s10591_s19 + $0x80] sm:$0xff] }
 0x7fc   : > { %v2057_v25 = vpop.f32.mrb[30].mxu0  ;;  %v2418_v24 = vld [vmem:[%s10591_s19 + $0x88] sm:$0xff] }
 0x7fd   : > { %v9807_v26 = vpop.f32.mrb[31].mxu0 }
 0x7fe   : > { %v2426_v26 = vld [vmem:[%s10591_s19 + $0xc8] sm:$0xff] }
 0x802   : > { %v2186_v28 = vpop.f32.mrb[32].mxu0 }
 0x803   : > { %v2187_v29 = vadd.f32 %v8684_v27, %v2186_v28  ;;  %v9822_v30 = vpop.f32.mrb[33].mxu0  ;;  %v8718_v28 = vcombine.low %v2418_v24, %v2426_v26 }
 0x804   : > { %v2189_v31 = vpop.f32.mrb[34].mxu0  ;;  %v2403_v30 = vld [vmem:[%s10591_s19 + $0x10] sm:$0xff] }
 0x805   : > { %v2250_v33 = vpack.c.bf16 %v2187_v29, %v2187_v29  ;;  %v9823_v34 = vpop.f32.mrb[35].mxu0  ;;  %v8719_v29 = vcombine.high %v2418_v24, %v2426_v26  ;;  %v2411_v31 = vld [vmem:[%s10591_s19 + $0x50] sm:$0xff]  ;;  %v10090_v26 = vld [vmem:[%s10601_s30 + $0x40] sm:$0xff]  }
 0x806   : > { %v2412_v34 = vld [vmem:[%s10591_s19 + $0x58] sm:$0xff]  ;;  %v8704_v36 = vcombine.low %v2403_v30, %v2411_v31 }
 0x807   : > { %v2255_v35 = vsel %vm1362_vm2, %v2250_v33, 0  ;;  %v8705_v33 = vcombine.high %v2403_v30, %v2411_v31  ;;  %v8707_v38 = vcombine.high %v2404_v32, %v2412_v34  ;;  %v10094_v30 = vld [vmem:[%s10601_s30 + $0x48] sm:$0xff]  }
 0x808   : > { %9833 = vmatpush3.bf16.xpose.msra.mxu0 %v2255_v35  ;;  %v10531_v35 = vmov 0   ;;  %v10095_v31 = vld [vmem:[%s10601_s30 + $0xc8] sm:$0xff]  }
 0x80f   : > { %9835 = vmatmul.mubr.msk.bf16.vlgmr.msra.gmra.mrb[36].mxu0 %vm1362_vm2, %v2249_v37  ;;  %v8706_v37 = vcombine.low %v2404_v32, %v2412_v34  ;;  %v10096_v32 = vld [vmem:[%s10601_s30 + $0x8] sm:$0xff]   ;;  %v10098_v34 = vld [vmem:[%s10601_s30 + $0x50] sm:$0xff]  }
 0x810   : > { %2712 = vmatprep.mubr.bf16.mxu0 %v10531_v35 }
 0x8e2   : > { %v2291_v40 = vpop.f32.mrb[36].mxu0 }
 0x8e3   : > { %v9836_v41 = vpop.f32.mrb[37].mxu0  ;;  %v2297_v42 = vsel %vm1409_vm3, %v2291_v40, -inf }
 0x8e4   : > { %2298 = vmax.xlane.f32.xlu0 %v2297_v42  ;;  %v2294_v43 = vpop.f32.mrb[38].mxu0 }
 0x8e5   : > { %v9837_v44 = vpop.f32.mrb[39].mxu0  ;;  %v8698_v43 = vld [vmem:[%s10581_s8] ss:$0 sm:$0xff] }
 0x971   : > { %v2299_v45 = vpop.xlane.xlu0 %2298 }
 0x972   : > { %v2300_v46 = vsub.f32 %v2291_v40, %v2299_v45  ;;  %v8699_v45 = vld [vmem:[%s10586_s14] ss:$0 sm:$0xff] }
 0x974   : > { %v2301_v47 = vmul.f32 1.442695, %v2300_v46 }
 0x976   : > { %10438 = vpow2.f32 %v2301_v47  ;;  %v2419_v47 = vld [vmem:[%s10591_s19 + $0x90] sm:$0xff] }
 0x980   : > { %v10439_v48 = vpop.eup %10438 }
 0x981   : > { %v2303_v49 = vsel %vm1409_vm3, %v10439_v48, 0.0 }
 0x982   : > { %2304 = vadd.xlane.f32.xlu1 %v2303_v49  ;;  %v2420_v49 = vld [vmem:[%s10591_s19 + $0x98] sm:$0xff] }
 0x983   : > { %v8723_v53 = vcombine.high %v2420_v49, %v2428_v7 }
 0xa0f   : > { %v2305_v55 = vpop.xlane.xlu1 %2304 }
 0xa10   : > { %10440 = vrcp.f32 %v2305_v55  ;;  %v2413_v55 = vld [vmem:[%s10591_s19 + $0x60] sm:$0xff] }
 0xa1a   : > { %v10441_v56 = vpop.eup %10440 }
 0xa1b   : > { %v2307_v57 = vmul.f32 %v10441_v56, %v10439_v48  ;;  %v2427_v48 = vld [vmem:[%s10591_s19 + $0xd0] sm:$0xff]  ;;  %v2406_v56 = vld [vmem:[%s10591_s19 + $0x28] sm:$0xff] }
 0xa1c   : > { %v8721_v52 = vcombine.high %v2419_v47, %v2427_v48 }
 0xa1d   : > { %v2356_v58 = vadd.f32 %v2307_v57, %v10909_v16  ;;  %v2308_v59 = vpack.c.bf16 %v2307_v57, %v2307_v57  ;;  %v2409_v16 = vld [vmem:[%s10591_s19 + $0x40] sm:$0xff]  ;;  %v2414_v57 = vld [vmem:[%s10591_s19 + $0x68] sm:$0xff] }
 0xa1e   : > { %v8701_v18 = vcombine.high %v2401_v15, %v2409_v16  ;;  %v8700_v19 = vcombine.low %v2401_v15, %v2409_v16 }
 0xa1f   : > { %v2358_v60 = vmul.f32 0.25, %v2356_v58  ;;  %9841 = vmatmul.mubr.msk.bf16.vlgmr.msra.gmra.mrb[36].mxu1 %vm1671_vm5, %v2308_v59  ;;  %v8720_v58 = vcombine.low %v2419_v47, %v2427_v48  ;;  %v8722_v59 = vcombine.low %v2420_v49, %v2428_v7  ;;  %v10110_v47 = vld [vmem:[%s10601_s30 + $0x68] sm:$0xff]  }
 0xa20   : > { %2680 = vmatprep.subr.bf16.mxu0 %v8701_v18  ;;  %2722 = vmatpush1.bf16.msra.mxu1 %v8702_v20  ;;  %v2431_v18 = vld [vmem:[%s10591_s19 + $0xf0] sm:$0xff]  ;;  %v10111_v48 = vld [vmem:[%s10601_s30 + $0xe8] sm:$0xff]  }
 0xa21   : > { %2359 = vst.msk [vmem:[%s10940_s18] sm:$0x3f] %vm1409_vm3, %v2358_v60  ;;  %2681 = vmatpush1.bf16.msra.mxu0 %v8700_v19  ;;  %2723 = vmatprep.subr.bf16.mxu1 %v8719_v29  ;;  %v8709_v60 = vcombine.high %v2405_v54, %v2413_v55  ;;  %v2432_v19 = vld [vmem:[%s10591_s19 + $0xf8] sm:$0xff]  ;;  %v8728_v24 = vcombine.low %v2423_v17, %v2431_v18  ;;  %v10093_v29 = vld [vmem:[%s10601_s30 + $0x80] sm:$0xff]   ;;  %v10112_v49 = vld [vmem:[%s10601_s30 + $0x28] sm:$0xff]  }
 0xa22   : > { %2753 = vmatprep.mubr.bf16.mxu1 %v10531_v35  ;;  %v10113_v7 = vld [vmem:[%s10601_s30 + $0xa8] sm:$0xff]  }
 0xa24   : > { %2724 = vmatpush1.bf16.msra.mxu1 %v8718_v28  ;;  %v10092_v28 = vld [vmem:[%s10601_s30] sm:$0xff]  }
 0xa25   : > { %2803 = vmatprep.subr.bf16.mxu1 %v8707_v38  ;;  %v10101_v38 = vld [vmem:[%s10601_s30 + $0x90] sm:$0xff]  }
 0xaf2   : > { %v2350_v61 = vpop.f32.mrb[36].mxu1 }
 0xaf3   : > { %v2357_v62 = vadd.f32 %v2350_v61, %v2061_v23  ;;  %v9842_v63 = vpop.f32.mrb[37].mxu1  ;;  %v2425_v23 = vld [vmem:[%s10591_s19 + $0xc0] sm:$0xff]  ;;  %v8711_v61 = vcombine.high %v2406_v56, %v2414_v57 }
 0xaf4   : > { %v2353_v0 = vpop.f32.mrb[38].mxu1  ;;  %v8717_v25 = vcombine.high %v2417_v22, %v2425_v23  ;;  %v8716_v27 = vcombine.low %v2417_v22, %v2425_v23  ;;  %v2429_v63 = vld [vmem:[%s10591_s19 + $0xe0] sm:$0xff]  ;;  %v8729_v22 = vcombine.high %v2423_v17, %v2431_v18  ;;  %v8731_v23 = vcombine.high %v2424_v6, %v2432_v19 }
 0xaf5   : > { %v2360_v4 = vadd.f32 %v10466_v3, %v2357_v62  ;;  %v9843_v5 = vpop.f32.mrb[39].mxu1  ;;  %v2421_v62 = vld [vmem:[%s10591_s19 + $0xa0] sm:$0xff]  ;;  %v2422_v0 = vld [vmem:[%s10591_s19 + $0xa8] sm:$0xff]  ;;  %v8708_v3 = vcombine.low %v2405_v54, %v2413_v55  ;;  %v10117_v54 = vld [vmem:[%s10601_s30 + $0xb0] sm:$0xff]  }
 0xaf6   : > { %2682 = vmatprep.subr.bf16.mxu0 %v8717_v25  ;;  %v8725_v5 = vcombine.high %v2421_v62, %v2429_v63  ;;  %v8730_v25 = vcombine.low %v2424_v6, %v2432_v19  ;;  %v10118_v55 = vld [vmem:[%s10601_s30 + $0x78] sm:$0xff]  }
 0xaf7   : > { %v2368_v8 = vadd.f32 %v8697_v1, %v2360_v4  ;;  %2683 = vmatpush1.bf16.msra.mxu0 %v8716_v27  ;;  %v2430_v1 = vld [vmem:[%s10591_s19 + $0xe8] sm:$0xff]  ;;  %v8710_v4 = vcombine.low %v2406_v56, %v2414_v57  ;;  %v10091_v27 = vld [vmem:[%s10601_s30 + $0xc0] sm:$0xff]   ;;  %v10119_v56 = vld [vmem:[%s10601_s30 + $0xf8] sm:$0xff]  }
 0xaf8   : > { %2762 = vmatprep.subr.bf16.mxu0 %v8705_v33  ;;  %v10097_v33 = vld [vmem:[%s10601_s30 + $0x88] sm:$0xff]   ;;  %v10120_v57 = vld [vmem:[%s10601_s30 + $0x38] sm:$0xff]  }
 0xaf9   : > { %v2372_v9 = vsel %vm2371_vm6, %v2368_v8, 0.0 }
 0xafa   : > { %2373 = vadd.xlane.f32.xlu0 %v2372_v9  ;;  %v2407_v9 = vld [vmem:[%s10591_s19 + $0x30] sm:$0xff] }
 0xb87   : > { %v2374_v10 = vpop.xlane.xlu0 %2373 }
 0xb88   : > { %v2376_v11 = vmul.f32 0.03125, %v2374_v10  ;;  %v2415_v10 = vld [vmem:[%s10591_s19 + $0x70] sm:$0xff] }
 0xb89   : > { %v8713_v15 = vcombine.high %v2407_v9, %v2415_v10  ;;  %v8712_v20 = vcombine.low %v2407_v9, %v2415_v10 }
 0xb8a   : > { %v2377_v12 = vsub.f32 %v2368_v8, %v2376_v11  ;;  %v8727_v8 = vcombine.high %v2422_v0, %v2430_v1  ;;  %v2408_v11 = vld [vmem:[%s10591_s19 + $0x38] sm:$0xff] }
 0xb8c   : > { %v2378_v13 = vmul.f32 %v2377_v12, %v2377_v12 }
 0xb8e   : > { %v2379_v14 = vsel %vm2371_vm6, %v2378_v13, 0.0  ;;  %v8724_v13 = vcombine.low %v2421_v62, %v2429_v63 }
 0xb8f   : > { %2380 = vadd.xlane.f32.xlu1 %v2379_v14  ;;  %v8726_v14 = vcombine.low %v2422_v0, %v2430_v1  ;;  %v11055_v1 = vld [vmem:[%s10596_s24] sm:$0xff] }
 0xc1c   : > { %v2381_v39 = vpop.xlane.xlu1 %2380 }
 0xc1d   : > { %v2382_v40 = vmul.f32 0.03125, %v2381_v39  ;;  %v10102_v39 = vld [vmem:[%s10601_s30 + $0x58] sm:$0xff]  }
 0xc1f   : > { %v2383_v41 = vadd.f32 1e-05, %v2382_v40  ;;  %v10103_v40 = vld [vmem:[%s10601_s30 + $0xd8] sm:$0xff]  }
 0xc21   : > { %10442 = vrsqrt.f32 %v2383_v41  ;;  %v10104_v41 = vld [vmem:[%s10601_s30 + $0x18] sm:$0xff]  }
 0xc2b   : > { %v10443_v42 = vpop.eup %10442 }
 0xc2c   : > { %v2385_v44 = vmul.f32 %v10443_v42, %v2377_v12  ;;  %v2416_v12 = vld [vmem:[%s10591_s19 + $0x78] sm:$0xff] }
 0xc2d   : > { %v8715_v16 = vcombine.high %v2408_v11, %v2416_v12  ;;  %v8714_v21 = vcombine.low %v2408_v11, %v2416_v12  ;;  %v10105_v42 = vld [vmem:[%s10601_s30 + $0x98] sm:$0xff]  }
 0xc2e   : > { %v2392_v46 = vmul.f32 %v8698_v43, %v2385_v44  ;;  %v10106_v43 = vld [vmem:[%s10601_s30 + $0x60] sm:$0xff]  }
 0xc2f   : > { %v10107_v44 = vld [vmem:[%s10601_s30 + $0xe0] sm:$0xff]  }
 0xc30   : > { %v10968_v50 = vadd.f32 %v8699_v45, %v2392_v46  ;;  %v10108_v45 = vld [vmem:[%s10601_s30 + $0x20] sm:$0xff]  }
 0xc31   : > { %v10109_v46 = vld [vmem:[%s10601_s30 + $0xa0] sm:$0xff]  }
 0xc32   : > { %v10972_v51 = vpack.c.bf16 %v10968_v50, %v10968_v50 }
 0xc34   : > { %8732 = vmatmul.mubr.msk.bf16.vlgmr.msra.gmra.mrb[40].mxu0 %vm1197_vm1, %v10972_v51  ;;  %8733 = vmatmul.mubr.msk.bf16.vlgmr.msra.gmra.mrb[40].mxu1 %vm1197_vm1, %v10972_v51 }
 0xc35   : > { %2763 = vmatpush1.bf16.msra.mxu0 %v8704_v36  ;;  %2804 = vmatpush1.bf16.msra.mxu1 %v8706_v37  ;;  %v10099_v36 = vld [vmem:[%s10601_s30 + $0xd0] sm:$0xff]  }
 0xc36   : > { %2764 = vmatprep.subr.bf16.mxu0 %v8721_v52  ;;  %2805 = vmatprep.subr.bf16.mxu1 %v8723_v53  ;;  %v10100_v37 = vld [vmem:[%s10601_s30 + $0x10] sm:$0xff]  }
 0xc37   : > { %2794 = vmatprep.mubr.bf16.mxu0 %v10531_v35  ;;  %2835 = vmatprep.mubr.bf16.mxu1 %v10531_v35  ;;  %v10115_v52 = vld [vmem:[%s10601_s30 + $0xf0] sm:$0xff]  }
 0xc38   : > { %v10116_v53 = vld [vmem:[%s10601_s30 + $0x30] sm:$0xff]  }
 0xc39   : > { %2765 = vmatpush1.bf16.msra.mxu0 %v8720_v58  ;;  %2806 = vmatpush1.bf16.msra.mxu1 %v8722_v59  ;;  %v10121_v58 = vld [vmem:[%s10601_s30 + $0xb8] sm:$0xff]   ;;  %v10122_v59 = vld [vmem:[%s10601_s30 + $0x140] sm:$0xff]  }
 0xc3a   : > { %2844 = vmatprep.subr.bf16.mxu0 %v8709_v60  ;;  %2885 = vmatprep.subr.bf16.mxu1 %v8711_v61  ;;  %v10123_v60 = vld [vmem:[%s10601_s30 + $0x1c0] sm:$0xff]   ;;  %v2437_v61 = vlaneseq }
 0xc3c   : > { %8734 = vmatmul.mubr.msk.bf16.vlgmr.msra.gmra.mrb[44].mxu0 %vm1197_vm1, %v10972_v51  ;;  %8735 = vmatmul.mubr.msk.bf16.vlgmr.msra.gmra.mrb[44].mxu1 %vm1197_vm1, %v10972_v51  ;;  %v11046_v62 = vshrl.u32 %v2437_v61, 7 }
 0xc3d   : > { %2845 = vmatpush1.bf16.msra.mxu0 %v8708_v3  ;;  %2886 = vmatpush1.bf16.msra.mxu1 %v8710_v4 }
 0xc3e   : > { %2846 = vmatprep.subr.bf16.mxu0 %v8725_v5  ;;  %2887 = vmatprep.subr.bf16.mxu1 %v8727_v8  ;;  %v11049_v63 = vsub.s32 0, %v11046_v62  ;;  %v11052_v0 = vsub.s32 2, %v11046_v62  ;;  %v11058_v3 = vsub.s32 1, %v11046_v62  ;;  %v11061_v4 = vsub.s32 3, %v11046_v62 }
 0xc3f   : > { %2876 = vmatprep.mubr.bf16.mxu0 %v10531_v35  ;;  %2917 = vmatprep.mubr.bf16.mxu1 %v10531_v35 }
 0xc40   : > { %v2440_v5 = vrot.slane %v11055_v1, %v11049_v63  ;;  %v2448_v8 = vrot.slane %v11055_v1, %v11052_v0  ;;  %v2444_v9 = vrot.slane %v11055_v1, %v11058_v3  ;;  %v2452_v10 = vrot.slane %v11055_v1, %v11061_v4 }
 0xc41   : > { %2847 = vmatpush1.bf16.msra.mxu0 %v8724_v13  ;;  %2888 = vmatpush1.bf16.msra.mxu1 %v8726_v14 }
 0xc42   : > { %2926 = vmatprep.subr.bf16.mxu0 %v8713_v15  ;;  %2967 = vmatprep.subr.bf16.mxu1 %v8715_v16 }
 0xc44   : > { %8736 = vmatmul.mubr.msk.bf16.vlgmr.msra.gmra.mrb[48].mxu0 %vm1197_vm1, %v10972_v51  ;;  %8737 = vmatmul.mubr.msk.bf16.vlgmr.msra.gmra.mrb[48].mxu1 %vm1197_vm1, %v10972_v51 }
 0xc45   : > { %2927 = vmatpush1.bf16.msra.mxu0 %v8712_v20  ;;  %2968 = vmatpush1.bf16.msra.mxu1 %v8714_v21  ;;  %v11072_v20 = vsub.s32 5, %v11046_v62  ;;  %v11075_v21 = vsub.s32 7, %v11046_v62 }
 0xc46   : > { %2928 = vmatprep.subr.bf16.mxu0 %v8729_v22  ;;  %2969 = vmatprep.subr.bf16.mxu1 %v8731_v23 }
 0xc47   : > { %2958 = vmatprep.mubr.bf16.mxu0 %v10531_v35  ;;  %2999 = vmatprep.mubr.bf16.mxu1 %v10531_v35 }
 0xc49   : > { %2929 = vmatpush1.bf16.msra.mxu0 %v8728_v24  ;;  %2970 = vmatpush1.bf16.msra.mxu1 %v8730_v25 }
 0xc4a   : > { %9269 = vmatprep.subr.bf16.mxu0 %v10090_v26  ;;  %9291 = vmatprep.subr.bf16.mxu1 %v10091_v27 }
 0xc4c   : > { %8738 = vmatmul.mubr.msk.bf16.vlgmr.msra.gmra.mrb[52].mxu0 %vm1197_vm1, %v10972_v51  ;;  %8739 = vmatmul.mubr.msk.bf16.vlgmr.msra.gmra.mrb[52].mxu1 %vm1197_vm1, %v10972_v51  ;;  %v10114_v51 = vld [vmem:[%s10601_s30 + $0x70] sm:$0xff]  }
 0xc4d   : > { %9270 = vmatpush3.bf16.msra.mxu0 %v10092_v28  ;;  %9292 = vmatpush3.bf16.msra.mxu1 %v10093_v29 }
 0xc4e   : > { %9271 = vmatprep.subr.bf16.mxu0 %v10094_v30  ;;  %9293 = vmatprep.subr.bf16.mxu1 %v10095_v31  ;;  %v2460_v30 = vrot.slane %v11055_v1, %v11072_v20  ;;  %v2468_v31 = vrot.slane %v11055_v1, %v11075_v21 }
 0xc51   : > { %9272 = vmatpush3.bf16.msra.mxu0 %v10096_v32  ;;  %9294 = vmatpush3.bf16.msra.mxu1 %v10097_v33  ;;  %v10124_v32 = vld [vmem:[%s10601_s30 + $0x100] sm:$0xff]  }
 0xc52   : > { %9273 = vmatprep.subr.bf16.mxu0 %v10098_v34  ;;  %9295 = vmatprep.subr.bf16.mxu1 %v10099_v36  ;;  %v10125_v33 = vld [vmem:[%s10601_s30 + $0x180] sm:$0xff]  }
 0xc55   : > { %9274 = vmatpush3.bf16.msra.mxu0 %v10100_v37  ;;  %9296 = vmatpush3.bf16.msra.mxu1 %v10101_v38  ;;  %v10126_v37 = vld [vmem:[%s10601_s30 + $0x148] sm:$0xff]  }
 0xc56   : > { %9275 = vmatprep.subr.bf16.mxu0 %v10102_v39  ;;  %9297 = vmatprep.subr.bf16.mxu1 %v10103_v40  ;;  %v10127_v38 = vld [vmem:[%s10601_s30 + $0x1c8] sm:$0xff]  }
 0xc59   : > { %9276 = vmatpush3.bf16.msra.mxu0 %v10104_v41  ;;  %9298 = vmatpush3.bf16.msra.mxu1 %v10105_v42 }
 0xc5a   : > { %9277 = vmatprep.subr.bf16.mxu0 %v10106_v43  ;;  %9299 = vmatprep.subr.bf16.mxu1 %v10107_v44 }
 0xc5d   : > { %9278 = vmatpush3.bf16.msra.mxu0 %v10108_v45  ;;  %9300 = vmatpush3.bf16.msra.mxu1 %v10109_v46 }
 0xc5e   : > { %9279 = vmatprep.subr.bf16.mxu0 %v10110_v47  ;;  %9301 = vmatprep.subr.bf16.mxu1 %v10111_v48  ;;  %v10128_v47 = vld [vmem:[%s10601_s30 + $0x108] sm:$0xff]  }
 0xc5f   : > { %v10129_v48 = vld [vmem:[%s10601_s30 + $0x188] sm:$0xff]  }
 0xc61   : > { %9280 = vmatpush3.bf16.msra.mxu0 %v10112_v49  ;;  %9302 = vmatpush3.bf16.msra.mxu1 %v10113_v7 }
 0xc62   : > { %9281 = vmatprep.subr.bf16.mxu0 %v10114_v51  ;;  %9303 = vmatprep.subr.bf16.mxu1 %v10115_v52  ;;  %v10130_v51 = vld [vmem:[%s10601_s30 + $0x150] sm:$0xff]  }
 0xc63   : > { %v10131_v52 = vld [vmem:[%s10601_s30 + $0x1d0] sm:$0xff]  }
 0xc65   : > { %9282 = vmatpush3.bf16.msra.mxu0 %v10116_v53  ;;  %9304 = vmatpush3.bf16.msra.mxu1 %v10117_v54 }
 0xc66   : > { %9283 = vmatprep.subr.bf16.mxu0 %v10118_v55  ;;  %9305 = vmatprep.subr.bf16.mxu1 %v10119_v56 }
 0xc69   : > { %9284 = vmatpush3.bf16.msra.mxu0 %v10120_v57  ;;  %9306 = vmatpush3.bf16.msra.mxu1 %v10121_v58  ;;  %v10132_v57 = vld [vmem:[%s10601_s30 + $0x110] sm:$0xff]  }
 0xc6a   : > { %9313 = vmatprep.subr.bf16.mxu0 %v10122_v59  ;;  %9335 = vmatprep.subr.bf16.mxu1 %v10123_v60  ;;  %v10133_v58 = vld [vmem:[%s10601_s30 + $0x190] sm:$0xff]   ;;  %v10134_v59 = vld [vmem:[%s10601_s30 + $0x158] sm:$0xff]  }
 0xc6b   : > { %v10135_v60 = vld [vmem:[%s10601_s30 + $0x1d8] sm:$0xff]  }
 0xd07   : > { %v2714_v11 = vpop.f32.mrb[40].mxu0  ;;  %v2755_v12 = vpop.f32.mrb[40].mxu1 }
 0xd08   : > { %v2715_v13 = vadd.f32 %v2714_v11, %v2440_v5  ;;  %v2756_v14 = vadd.f32 %v2755_v12, %v2448_v8  ;;  %v2716_v15 = vpop.f32.mrb[41].mxu0  ;;  %v2757_v16 = vpop.f32.mrb[41].mxu1  ;;  %v10136_v12 = vld [vmem:[%s10601_s30 + $0x118] sm:$0xff]  }
 0xd09   : > { %v2717_v17 = vadd.f32 %v2716_v15, %v2444_v9  ;;  %v2758_v18 = vadd.f32 %v2757_v16, %v2452_v10  ;;  %v2718_v6 = vpop.f32.mrb[42].mxu0  ;;  %v2759_v19 = vpop.f32.mrb[42].mxu1 }
 0xd0a   : > { %v3008_v22 = vmax.f32 %v2715_v13, 0.0  ;;  %v3010_v23 = vmax.f32 %v2756_v14, 0.0  ;;  %v2719_v24 = vpop.f32.mrb[43].mxu0  ;;  %v2760_v25 = vpop.f32.mrb[43].mxu1  ;;  %v10137_v13 = vld [vmem:[%s10601_s30 + $0x198] sm:$0xff]   ;;  %v11104_v14 = vsub.s32 6, %v11046_v62 }
 0xd0b   : > { %v3009_v26 = vmax.f32 %v2717_v17, 0.0  ;;  %v3011_v27 = vmax.f32 %v2758_v18, 0.0  ;;  %v10138_v17 = vld [vmem:[%s10601_s30 + $0x160] sm:$0xff]   ;;  %v11109_v6 = vld [vmem:[%s10596_s24 + $0x8] sm:$0xff]  ;;  %v11116_v24 = vsub.s32 4, %v11046_v62 }
 0xd0c   : > { %v3024_v34 = vpack.c.bf16 %v3008_v22, %v3008_v22  ;;  %v3026_v36 = vpack.c.bf16 %v3010_v23, %v3010_v23  ;;  %v10139_v18 = vld [vmem:[%s10601_s30 + $0x1e0] sm:$0xff]   ;;  %v2496_v19 = vrot.slane %v11109_v6, %v11104_v14  ;;  %v10142_v25 = vld [vmem:[%s10601_s30 + $0x168] sm:$0xff]  }
 0xd0d   : > { %v3025_v28 = vpack.c.bf16 %v3009_v26, %v3009_v26  ;;  %v3027_v29 = vpack.c.bf16 %v3011_v27, %v3011_v27  ;;  %v10140_v22 = vld [vmem:[%s10601_s30 + $0x120] sm:$0xff]   ;;  %v10143_v26 = vld [vmem:[%s10601_s30 + $0x1e8] sm:$0xff]  }
 0xd0e   : > { %v10141_v23 = vld [vmem:[%s10601_s30 + $0x1a0] sm:$0xff]  }
 0xd0f   : > { %v11085_v39 = vpop.f32.mrb[44].mxu0  ;;  %v11087_v40 = vpop.f32.mrb[44].mxu1  ;;  %4103 = vmatprep.mubr.bf16.mxu0 %v3025_v28  ;;  %4143 = vmatprep.mubr.bf16.mxu1 %v3027_v29 }
 0xd10   : > { %v2798_v41 = vpop.f32.mrb[45].mxu0  ;;  %v2839_v42 = vpop.f32.mrb[45].mxu1  ;;  %4104 = vmatmul.mubr.bf16.vlgmr.msra.gmra.mrb[56].mxu0 %v3024_v34  ;;  %4144 = vmatmul.mubr.bf16.vlgmr.msra.gmra.mrb[56].mxu1 %v3026_v36  ;;  %v10145_v34 = vld [vmem:[%s10601_s30 + $0x1a8] sm:$0xff]   ;;  %v2456_v36 = vrot.slane %v11055_v1, %v11116_v24 }
 0xd11   : > { %v2799_v43 = vadd.f32 %v2798_v41, %v2460_v30  ;;  %v2840_v44 = vadd.f32 %v2839_v42, %v2468_v31  ;;  %9314 = vmatpush3.bf16.msra.mxu0 %v10124_v32  ;;  %9336 = vmatpush3.bf16.msra.mxu1 %v10125_v33  ;;  %v2800_v45 = vpop.f32.mrb[46].mxu0  ;;  %v2841_v46 = vpop.f32.mrb[46].mxu1  ;;  %v10144_v33 = vld [vmem:[%s10601_s30 + $0x128] sm:$0xff]   ;;  %v10146_v42 = vld [vmem:[%s10601_s30 + $0x170] sm:$0xff]  }
 0xd12   : > { %v2801_v49 = vpop.f32.mrb[47].mxu0  ;;  %v2842_v7 = vpop.f32.mrb[47].mxu1  ;;  %9315 = vmatprep.subr.bf16.mxu0 %v10126_v37  ;;  %9337 = vmatprep.subr.bf16.mxu1 %v10127_v38  ;;  %v2464_v37 = vrot.slane %v11055_v1, %v11104_v14  ;;  %v2484_v45 = vrot.slane %v11109_v6, %v11061_v4  ;;  %v10148_v46 = vld [vmem:[%s10601_s30 + $0x130] sm:$0xff]  }
 0xd13   : > { %v3013_v53 = vmax.f32 %v2799_v43, 0.0  ;;  %v3015_v54 = vmax.f32 %v2840_v44, 0.0  ;;  %v10147_v43 = vld [vmem:[%s10601_s30 + $0x1f0] sm:$0xff]   ;;  %v2476_v44 = vrot.slane %v11109_v6, %v11058_v3  ;;  %v10150_v49 = vld [vmem:[%s10601_s30 + $0x178] sm:$0xff]  }
 0xd14   : > { %v10149_v1 = vld [vmem:[%s10601_s30 + $0x1b0] sm:$0xff]   ;;  %v10151_v7 = vld [vmem:[%s10601_s30 + $0x1f8] sm:$0xff]  }
 0xd15   : > { %v3029_v55 = vpack.c.bf16 %v3013_v53, %v3013_v53  ;;  %v3031_v56 = vpack.c.bf16 %v3015_v54, %v3015_v54  ;;  %9316 = vmatpush3.bf16.msra.mxu0 %v10128_v47  ;;  %9338 = vmatpush3.bf16.msra.mxu1 %v10129_v48  ;;  %v2797_v47 = vadd.f32 %v11085_v39, %v2456_v36  ;;  %v10152_v53 = vld [vmem:[%s10601_s30 + $0x138] sm:$0xff]   ;;  %v10154_v39 = vld [vmem:[%s10601_s30 + $0x240] sm:$0xff]   ;;  %v10174_v36 = vld [vmem:[%s10601_s30 + $0x268] sm:$0xff]  }
 0xd16   : > { %9317 = vmatprep.subr.bf16.mxu0 %v10130_v51  ;;  %9339 = vmatprep.subr.bf16.mxu1 %v10131_v52  ;;  %v2838_v48 = vadd.f32 %v11087_v40, %v2464_v37  ;;  %v10153_v54 = vld [vmem:[%s10601_s30 + $0x1b8] sm:$0xff]   ;;  %v10155_v40 = vld [vmem:[%s10601_s30 + $0x2c0] sm:$0xff]   ;;  %v10175_v37 = vld [vmem:[%s10601_s30 + $0x2e8] sm:$0xff]  }
 0xd17   : > { %v11097_v61 = vpop.f32.mrb[48].mxu0  ;;  %v11099_v5 = vpop.f32.mrb[48].mxu1  ;;  %4183 = vmatprep.mubr.bf16.mxu0 %v3029_v55  ;;  %4223 = vmatprep.mubr.bf16.mxu1 %v3031_v56  ;;  %v3012_v55 = vmax.f32 %v2797_v47, 0.0  ;;  %v10180_v47 = vld [vmem:[%s10601_s30 + $0x230] sm:$0xff]  }
 0xd18   : > { %v2880_v8 = vpop.f32.mrb[49].mxu0  ;;  %v2921_v9 = vpop.f32.mrb[49].mxu1  ;;  %v3014_v56 = vmax.f32 %v2838_v48, 0.0 }
 0xd19   : > { %9318 = vmatpush3.bf16.msra.mxu0 %v10132_v57  ;;  %9340 = vmatpush3.bf16.msra.mxu1 %v10133_v58  ;;  %v2882_v10 = vpop.f32.mrb[50].mxu0  ;;  %v2923_v11 = vpop.f32.mrb[50].mxu1  ;;  %v2881_v51 = vadd.f32 %v2880_v8, %v2476_v44  ;;  %v2922_v52 = vadd.f32 %v2921_v9, %v2484_v45  ;;  %v10157_v9 = vld [vmem:[%s10601_s30 + $0x280] sm:$0xff]   ;;  %v2480_v44 = vrot.slane %v11109_v6, %v11052_v0  ;;  %v10179_v45 = vld [vmem:[%s10601_s30 + $0x2f0] sm:$0xff]  }
 0xd1a   : > { %v2883_v15 = vpop.f32.mrb[51].mxu0  ;;  %v2924_v16 = vpop.f32.mrb[51].mxu1  ;;  %9319 = vmatprep.subr.bf16.mxu0 %v10134_v59  ;;  %9341 = vmatprep.subr.bf16.mxu1 %v10135_v60  ;;  %v10156_v59 = vld [vmem:[%s10601_s30 + $0x200] sm:$0xff]   ;;  %v3028_v60 = vpack.c.bf16 %v3012_v55, %v3012_v55  ;;  %v3030_v8 = vpack.c.bf16 %v3014_v56, %v3014_v56  ;;  %v10158_v11 = vld [vmem:[%s10601_s30 + $0x248] sm:$0xff]   ;;  %v10184_v55 = vld [vmem:[%s10601_s30 + $0x238] sm:$0xff]  }
 0xd1b   : > { %v3017_v57 = vmax.f32 %v2881_v51, 0.0  ;;  %v3019_v58 = vmax.f32 %v2922_v52, 0.0  ;;  %v10160_v15 = vld [vmem:[%s10601_s30 + $0x208] sm:$0xff]   ;;  %v2920_v51 = vadd.f32 %v11099_v5, %v2480_v44  ;;  %v10183_v52 = vld [vmem:[%s10601_s30 + $0x2f8] sm:$0xff]   ;;  %v10187_v5 = vld [vmem:[%s10601_s30 + $0x3c0] sm:$0xff]  }
 0xd1c   : > { %v10161_v16 = vld [vmem:[%s10601_s30 + $0x288] sm:$0xff]  }
 0xd1d   : > { %9320 = vmatpush3.bf16.msra.mxu0 %v10136_v12  ;;  %9342 = vmatpush3.bf16.msra.mxu1 %v10137_v13  ;;  %v3033_v10 = vpack.c.bf16 %v3017_v57, %v3017_v57  ;;  %v10159_v12 = vld [vmem:[%s10601_s30 + $0x2c8] sm:$0xff]   ;;  %v3035_v13 = vpack.c.bf16 %v3019_v58, %v3019_v58 }
 0xd1e   : > { %9321 = vmatprep.subr.bf16.mxu0 %v10138_v17  ;;  %9343 = vmatprep.subr.bf16.mxu1 %v10139_v18  ;;  %v10162_v17 = vld [vmem:[%s10601_s30 + $0x250] sm:$0xff]  }
 0xd1f   : > { %v11120_v27 = vpop.f32.mrb[52].mxu0  ;;  %v3001_v28 = vpop.f32.mrb[52].mxu1  ;;  %v10163_v18 = vld [vmem:[%s10601_s30 + $0x2d0] sm:$0xff]  }
 0xd20   : > { %v11122_v29 = vadd.f32 %v3001_v28, %v2496_v19  ;;  %v11124_v30 = vpop.f32.mrb[53].mxu0  ;;  %v11126_v31 = vpop.f32.mrb[53].mxu1  ;;  %v10164_v19 = vld [vmem:[%s10601_s30 + $0x210] sm:$0xff]   ;;  %v10169_v28 = vld [vmem:[%s10601_s30 + $0x298] sm:$0xff]  }
 0xd21   : > { %9322 = vmatpush3.bf16.msra.mxu0 %v10140_v22  ;;  %9344 = vmatpush3.bf16.msra.mxu1 %v10141_v23  ;;  %v2964_v32 = vpop.f32.mrb[54].mxu0  ;;  %v3005_v62 = vpop.f32.mrb[54].mxu1  ;;  %v10165_v22 = vld [vmem:[%s10601_s30 + $0x290] sm:$0xff]   ;;  %v10166_v23 = vld [vmem:[%s10601_s30 + $0x258] sm:$0xff]  }
 0xd22   : > { %v2965_v38 = vpop.f32.mrb[55].mxu0  ;;  %v3006_v41 = vpop.f32.mrb[55].mxu1  ;;  %9323 = vmatprep.subr.bf16.mxu0 %v10142_v25  ;;  %9345 = vmatprep.subr.bf16.mxu1 %v10143_v26  ;;  %v10167_v25 = vld [vmem:[%s10601_s30 + $0x2d8] sm:$0xff]   ;;  %v10170_v32 = vld [vmem:[%s10601_s30 + $0x260] sm:$0xff]  }
 0xd23   : > { %v10168_v26 = vld [vmem:[%s10601_s30 + $0x218] sm:$0xff]   ;;  %v10171_v62 = vld [vmem:[%s10601_s30 + $0x2e0] sm:$0xff]   ;;  %v10176_v38 = vld [vmem:[%s10601_s30 + $0x228] sm:$0xff]   ;;  %v2472_v41 = vrot.slane %v11109_v6, %v11049_v63 }
 0xd25   : > { %9324 = vmatpush3.bf16.msra.mxu0 %v10144_v33  ;;  %9346 = vmatpush3.bf16.msra.mxu1 %v10145_v34  ;;  %v10172_v33 = vld [vmem:[%s10601_s30 + $0x220] sm:$0xff]   ;;  %v2879_v48 = vadd.f32 %v11097_v61, %v2472_v41  ;;  %v10185_v61 = vld [vmem:[%s10601_s30 + $0x2b8] sm:$0xff]   ;;  %v10210_v41 = vld [vmem:[%s10601_s30 + $0x370] sm:$0xff]  }
 0xd26   : > { %9325 = vmatprep.subr.bf16.mxu0 %v10146_v42  ;;  %9347 = vmatprep.subr.bf16.mxu1 %v10147_v43  ;;  %v10173_v34 = vld [vmem:[%s10601_s30 + $0x2a0] sm:$0xff]   ;;  %v10177_v42 = vld [vmem:[%s10601_s30 + $0x2a8] sm:$0xff]   ;;  %v10178_v43 = vld [vmem:[%s10601_s30 + $0x270] sm:$0xff]  }
 0xd27   : > { %v3016_v56 = vmax.f32 %v2879_v48, 0.0  ;;  %v10217_v48 = vld [vmem:[%s10601_s30 + $0x3b8] sm:$0xff]  }
 0xd29   : > { %9326 = vmatpush3.bf16.msra.mxu0 %v10148_v46  ;;  %9348 = vmatpush3.bf16.msra.mxu1 %v10149_v1  ;;  %v2492_v46 = vrot.slane %v11109_v6, %v11072_v20  ;;  %v2500_v1 = vrot.slane %v11109_v6, %v11075_v21 }
 0xd2a   : > { %9327 = vmatprep.subr.bf16.mxu0 %v10150_v49  ;;  %9349 = vmatprep.subr.bf16.mxu1 %v10151_v7  ;;  %v10181_v49 = vld [vmem:[%s10601_s30 + $0x2b0] sm:$0xff]   ;;  %v10182_v7 = vld [vmem:[%s10601_s30 + $0x278] sm:$0xff]  }
 0xd2d   : > { %9328 = vmatpush3.bf16.msra.mxu0 %v10152_v53  ;;  %9350 = vmatpush3.bf16.msra.mxu1 %v10153_v54  ;;  %v2963_v53 = vadd.f32 %v11124_v30, %v2492_v46  ;;  %v3004_v54 = vadd.f32 %v11126_v31, %v2500_v1  ;;  %v10188_v30 = vld [vmem:[%s10601_s30 + $0x300] sm:$0xff]   ;;  %v10214_v46 = vld [vmem:[%s10601_s30 + $0x378] sm:$0xff]  }
 0xd2e   : > { %9357 = vmatprep.subr.bf16.mxu0 %v10154_v39  ;;  %9379 = vmatprep.subr.bf16.mxu1 %v10155_v40  ;;  %v10186_v39 = vld [vmem:[%s10601_s30 + $0x340] sm:$0xff]   ;;  %v3018_v40 = vmax.f32 %v2920_v51, 0.0  ;;  %v10215_v1 = vld [vmem:[%s10601_s30 + $0x3f8] sm:$0xff]  }
 0xd2f   : > { %v3021_v57 = vmax.f32 %v2963_v53, 0.0  ;;  %v3023_v58 = vmax.f32 %v3004_v54, 0.0  ;;  %v10189_v31 = vld [vmem:[%s10601_s30 + $0x380] sm:$0xff]  }
 0xd30   : > { %4184 = vmatmul.mubr.bf16.vlgmr.msra.gmra.mrb[60].mxu0 %v3028_v60  ;;  %4224 = vmatmul.mubr.bf16.vlgmr.msra.gmra.mrb[60].mxu1 %v3030_v8  ;;  %v3034_v60 = vpack.c.bf16 %v3018_v40, %v3018_v40  ;;  %v10190_v8 = vld [vmem:[%s10601_s30 + $0x348] sm:$0xff]  }
 0xd31   : > { %9358 = vmatpush3.bf16.msra.mxu0 %v10156_v59  ;;  %4263 = vmatprep.mubr.bf16.mxu0 %v3033_v10  ;;  %v3032_v59 = vpack.c.bf16 %v3016_v56, %v3016_v56  ;;  %v10191_v10 = vld [vmem:[%s10601_s30 + $0x3c8] sm:$0xff]  }
 0xd32   : > { %9380 = vmatpush3.bf16.msra.mxu1 %v10157_v9  ;;  %4303 = vmatprep.mubr.bf16.mxu1 %v3035_v13  ;;  %v3037_v9 = vpack.c.bf16 %v3021_v57, %v3021_v57  ;;  %v10193_v13 = vld [vmem:[%s10601_s30 + $0x388] sm:$0xff]  }
 0xd33   : > { %9359 = vmatprep.subr.bf16.mxu0 %v10158_v11  ;;  %9381 = vmatprep.subr.bf16.mxu1 %v10159_v12  ;;  %v3039_v11 = vpack.c.bf16 %v3023_v58, %v3023_v58  ;;  %v10192_v12 = vld [vmem:[%s10601_s30 + $0x308] sm:$0xff]  }
 0xd35   : > { %9360 = vmatpush3.bf16.msra.mxu0 %v10160_v15  ;;  %v10194_v15 = vld [vmem:[%s10601_s30 + $0x350] sm:$0xff]  }
 0xd36   : > { %9382 = vmatpush3.bf16.msra.mxu1 %v10161_v16  ;;  %9361 = vmatprep.subr.bf16.mxu0 %v10162_v17  ;;  %v10195_v16 = vld [vmem:[%s10601_s30 + $0x3d0] sm:$0xff]  }
 0xd37   : > { %9383 = vmatprep.subr.bf16.mxu1 %v10163_v18  ;;  %v10196_v17 = vld [vmem:[%s10601_s30 + $0x310] sm:$0xff]  }
 0xd38   : > { %v10197_v18 = vld [vmem:[%s10601_s30 + $0x390] sm:$0xff]  }
 0xd39   : > { %9362 = vmatpush3.bf16.msra.mxu0 %v10164_v19  ;;  %v10198_v19 = vld [vmem:[%s10601_s30 + $0x358] sm:$0xff]  }
 0xd3a   : > { %9384 = vmatpush3.bf16.msra.mxu1 %v10165_v22  ;;  %9363 = vmatprep.subr.bf16.mxu0 %v10166_v23  ;;  %v10199_v22 = vld [vmem:[%s10601_s30 + $0x3d8] sm:$0xff]  }
 0xd3b   : > { %9385 = vmatprep.subr.bf16.mxu1 %v10167_v25  ;;  %v10200_v23 = vld [vmem:[%s10601_s30 + $0x318] sm:$0xff]  }
 0xd3c   : > { %v10201_v25 = vld [vmem:[%s10601_s30 + $0x398] sm:$0xff]  }
 0xd3d   : > { %9364 = vmatpush3.bf16.msra.mxu0 %v10168_v26  ;;  %v10202_v26 = vld [vmem:[%s10601_s30 + $0x360] sm:$0xff]  }
 0xd3e   : > { %9386 = vmatpush3.bf16.msra.mxu1 %v10169_v28  ;;  %9365 = vmatprep.subr.bf16.mxu0 %v10170_v32  ;;  %v10203_v28 = vld [vmem:[%s10601_s30 + $0x3e0] sm:$0xff]  }
 0xd3f   : > { %9387 = vmatprep.subr.bf16.mxu1 %v10171_v62  ;;  %v10204_v32 = vld [vmem:[%s10601_s30 + $0x320] sm:$0xff]  }
 0xd40   : > { %v10205_v62 = vld [vmem:[%s10601_s30 + $0x3a0] sm:$0xff]  }
 0xd41   : > { %9366 = vmatpush3.bf16.msra.mxu0 %v10172_v33  ;;  %v10206_v33 = vld [vmem:[%s10601_s30 + $0x368] sm:$0xff]  }
 0xd42   : > { %9388 = vmatpush3.bf16.msra.mxu1 %v10173_v34  ;;  %9367 = vmatprep.subr.bf16.mxu0 %v10174_v36  ;;  %v10207_v34 = vld [vmem:[%s10601_s30 + $0x3e8] sm:$0xff]  }
 0xd43   : > { %9389 = vmatprep.subr.bf16.mxu1 %v10175_v37  ;;  %v10208_v36 = vld [vmem:[%s10601_s30 + $0x328] sm:$0xff]   ;;  %v2488_v37 = vrot.slane %v11109_v6, %v11116_v24  ;;  %v10216_v6 = vld [vmem:[%s10601_s30 + $0x338] sm:$0xff]  }
 0xd45   : > { %9368 = vmatpush3.bf16.msra.mxu0 %v10176_v38  ;;  %v10209_v38 = vld [vmem:[%s10601_s30 + $0x3a8] sm:$0xff]   ;;  %v2961_v44 = vadd.f32 %v11120_v27, %v2488_v37 }
 0xd46   : > { %9390 = vmatpush3.bf16.msra.mxu1 %v10177_v42  ;;  %9369 = vmatprep.subr.bf16.mxu0 %v10178_v43  ;;  %v10211_v42 = vld [vmem:[%s10601_s30 + $0x3f0] sm:$0xff]  }
 0xd47   : > { %9391 = vmatprep.subr.bf16.mxu1 %v10179_v45  ;;  %v10212_v43 = vld [vmem:[%s10601_s30 + $0x330] sm:$0xff]  }
 0xd48   : > { %v10213_v45 = vld [vmem:[%s10601_s30 + $0x3b0] sm:$0xff]  }
 0xd49   : > { %9370 = vmatpush3.bf16.msra.mxu0 %v10180_v47  ;;  %v3020_v47 = vmax.f32 %v2961_v44, 0.0 }
 0xd4a   : > { %9392 = vmatpush3.bf16.msra.mxu1 %v10181_v49  ;;  %9371 = vmatprep.subr.bf16.mxu0 %v10182_v7  ;;  %v3022_v49 = vmax.f32 %v11122_v29, 0.0  ;;  %v8740_v29 = vld [vmem:[%s10606_s6] ss:$0 sm:$0xff] }
 0xd4b   : > { %9393 = vmatprep.subr.bf16.mxu1 %v10183_v52  ;;  %v3036_v7 = vpack.c.bf16 %v3020_v47, %v3020_v47 }
 0xd4c   : > { %v3038_v27 = vpack.c.bf16 %v3022_v49, %v3022_v49 }
 0xd4d   : > { %9372 = vmatpush3.bf16.msra.mxu0 %v10184_v55 }
 0xd4e   : > { %9394 = vmatpush3.bf16.msra.mxu1 %v10185_v61  ;;  %9401 = vmatprep.subr.bf16.mxu0 %v10186_v39 }
 0xd4f   : > { %9423 = vmatprep.subr.bf16.mxu1 %v10187_v5 }
 0xd50   : > { %4264 = vmatmul.mubr.bf16.vlgmr.msra.gmra.mrb[64].mxu0 %v3032_v59 }
 0xd51   : > { %4304 = vmatmul.mubr.bf16.vlgmr.msra.gmra.mrb[64].mxu1 %v3034_v60  ;;  %9402 = vmatpush3.bf16.msra.mxu0 %v10188_v30 }
 0xd52   : > { %4343 = vmatprep.mubr.bf16.mxu0 %v3037_v9  ;;  %9424 = vmatpush3.bf16.msra.mxu1 %v10189_v31 }
 0xd53   : > { %4383 = vmatprep.mubr.bf16.mxu1 %v3039_v11  ;;  %9403 = vmatprep.subr.bf16.mxu0 %v10190_v8 }
 0xd54   : > { %9425 = vmatprep.subr.bf16.mxu1 %v10191_v10 }
 0xd55   : > { %9404 = vmatpush3.bf16.msra.mxu0 %v10192_v12 }
 0xd56   : > { %9426 = vmatpush3.bf16.msra.mxu1 %v10193_v13  ;;  %9405 = vmatprep.subr.bf16.mxu0 %v10194_v15 }
 0xd57   : > { %9427 = vmatprep.subr.bf16.mxu1 %v10195_v16 }
 0xd59   : > { %9406 = vmatpush3.bf16.msra.mxu0 %v10196_v17 }
 0xd5a   : > { %9428 = vmatpush3.bf16.msra.mxu1 %v10197_v18  ;;  %9407 = vmatprep.subr.bf16.mxu0 %v10198_v19 }
 0xd5b   : > { %9429 = vmatprep.subr.bf16.mxu1 %v10199_v22 }
 0xd5d   : > { %9408 = vmatpush3.bf16.msra.mxu0 %v10200_v23 }
 0xd5e   : > { %9430 = vmatpush3.bf16.msra.mxu1 %v10201_v25  ;;  %9409 = vmatprep.subr.bf16.mxu0 %v10202_v26 }
 0xd5f   : > { %9431 = vmatprep.subr.bf16.mxu1 %v10203_v28 }
 0xd61   : > { %9410 = vmatpush3.bf16.msra.mxu0 %v10204_v32 }
 0xd62   : > { %9432 = vmatpush3.bf16.msra.mxu1 %v10205_v62  ;;  %9411 = vmatprep.subr.bf16.mxu0 %v10206_v33 }
 0xd63   : > { %9433 = vmatprep.subr.bf16.mxu1 %v10207_v34 }
 0xd65   : > { %9412 = vmatpush3.bf16.msra.mxu0 %v10208_v36 }
 0xd66   : > { %9434 = vmatpush3.bf16.msra.mxu1 %v10209_v38  ;;  %9413 = vmatprep.subr.bf16.mxu0 %v10210_v41 }
 0xd67   : > { %9435 = vmatprep.subr.bf16.mxu1 %v10211_v42 }
 0xd69   : > { %9414 = vmatpush3.bf16.msra.mxu0 %v10212_v43 }
 0xd6a   : > { %9436 = vmatpush3.bf16.msra.mxu1 %v10213_v45  ;;  %9415 = vmatprep.subr.bf16.mxu0 %v10214_v46 }
 0xd6b   : > { %9437 = vmatprep.subr.bf16.mxu1 %v10215_v1 }
 0xd6d   : > { %9416 = vmatpush3.bf16.msra.mxu0 %v10216_v6 }
 0xd6e   : > { %9438 = vmatpush3.bf16.msra.mxu1 %v10217_v48  ;;  %9844 = vmatprep.subr.bf16.mxu0 %v10529_v2 }
 0xd6f   : > { %9852 = vmatprep.subr.bf16.mxu1 %v10529_v2 }
 0xd70   : > { %4344 = vmatmul.mubr.bf16.vlgmr.msra.gmra.mrb[68].mxu0 %v3036_v7 }
 0xd71   : > { %4384 = vmatmul.mubr.bf16.vlgmr.msra.gmra.mrb[68].mxu1 %v3038_v27  ;;  %9848 = vmatprep.mubr.msk.bf16.mxu0 %vm10530_vm0, %v10529_v2 }
 0xd72   : > { %9856 = vmatprep.mubr.msk.bf16.mxu1 %vm10530_vm0, %v10529_v2 }
 0xde3   : > { %v9285_v51 = vpop.f32.mrb[56].mxu0  ;;  %v9307_v52 = vpop.f32.mrb[56].mxu1 }
 0xde4   : > { %v9286_v53 = vpop.f32.mrb[57].mxu0  ;;  %v9308_v54 = vpop.f32.mrb[57].mxu1 }
 0xde5   : > { %v9287_v55 = vadd.f32 %v9286_v53, %v9285_v51  ;;  %v9309_v56 = vadd.f32 %v9308_v54, %v9307_v52  ;;  %v9288_v61 = vpop.f32.mrb[58].mxu0  ;;  %v9310_v39 = vpop.f32.mrb[58].mxu1  ;;  %v10218_v53 = vld [vmem:[%s10621_s27] sm:$0xff]  }
 0xde6   : > { %v9289_v40 = vpop.f32.mrb[59].mxu0  ;;  %v9311_v5 = vpop.f32.mrb[59].mxu1  ;;  %v10219_v54 = vld [vmem:[%s11798_s15] sm:$0xff]   ;;  %9845 = vmatpush3.bf16.msra.mxu0 %v10218_v53  ;;  %s11805_s15 = sld [smem:[#allocation13_spill]] }
 0xde7   : > { %v4106_v57 = vadd.f32 %v9287_v55, %v8740_v29  ;;  %9853 = vmatpush3.bf16.msra.mxu1 %v10219_v54  ;;  %9846 = vmatprep.subr.bf16.mxu0 %v10529_v2  ;;  %v10221_v55 = vld [vmem:[%s11799_s22 + $0x8] sm:$0xff]   ;;  %v8869_v5 = vld [vmem:[%s11800_s23] ss:$0 sm:$0xff]  ;;  %s11806_s23 = sld [smem:[#allocation16_spill]] }
 0xde8   : > { %9854 = vmatprep.subr.bf16.mxu1 %v10529_v2 }
 0xde9   : > { %v4146_v58 = vadd.f32 %v9309_v56, %v4106_v57 }
 0xdeb   : > { %9855 = vmatpush3.bf16.msra.mxu1 %v10221_v55 }
 0xdec   : > { %9868 = vmatprep.subr.bf16.mxu1 %v10529_v2 }
 0xe03   : > { %v9329_v30 = vpop.f32.mrb[60].mxu0  ;;  %v9351_v59 = vpop.f32.mrb[60].mxu1 }
 0xe04   : > { %v9330_v31 = vpop.f32.mrb[61].mxu0  ;;  %v9352_v60 = vpop.f32.mrb[61].mxu1 }
 0xe05   : > { %v9331_v8 = vadd.f32 %v9330_v31, %v9329_v30  ;;  %v9353_v9 = vadd.f32 %v9352_v60, %v9351_v59  ;;  %v9332_v10 = vpop.f32.mrb[62].mxu0  ;;  %v9354_v11 = vpop.f32.mrb[62].mxu1  ;;  %v10222_v31 = vld [vmem:[%s11802_s10] sm:$0xff]  }
 0xe06   : > { %v9333_v12 = vpop.f32.mrb[63].mxu0  ;;  %v9355_v13 = vpop.f32.mrb[63].mxu1  ;;  %v10225_v10 = vld [vmem:[%s10621_s27 + $0x18] sm:$0xff]   ;;  %v10226_v11 = vld [vmem:[%s11802_s10 + $0x10] sm:$0xff]  }
 0xe07   : > { %v4186_v15 = vadd.f32 %v9331_v8, %v4146_v58  ;;  %v8870_v58 = vld [vmem:[%s11801_s2] ss:$0 sm:$0xff]  ;;  %v10223_v8 = vld [vmem:[%s11802_s10 + $0x8] sm:$0xff]   ;;  %v10227_v12 = vld [vmem:[%s11802_s10 + $0x18] sm:$0xff]   ;;  %s11807_s2 = sld [smem:[#allocation14_spill]] }
 0xe08   : > { %v8875_v13 = vld [vmem:[%s11803_s7] ss:$0 sm:$0xff] }
 0xe09   : > { %v4226_v16 = vadd.f32 %v9353_v9, %v4186_v15  ;;  %v10224_v9 = vld [vmem:[%s10621_s27 + $0x10] sm:$0xff]  }
 0xe23   : > { %v9373_v17 = vpop.f32.mrb[64].mxu0 }
 0xe24   : > { %v9395_v18 = vpop.f32.mrb[64].mxu1  ;;  %v9374_v19 = vpop.f32.mrb[65].mxu0 }
 0xe25   : > { %v9375_v22 = vadd.f32 %v9374_v19, %v9373_v17  ;;  %v9396_v23 = vpop.f32.mrb[65].mxu1  ;;  %v9376_v25 = vpop.f32.mrb[66].mxu0 }
 0xe26   : > { %v9397_v26 = vadd.f32 %v9396_v23, %v9395_v18  ;;  %v9398_v28 = vpop.f32.mrb[66].mxu1  ;;  %v9377_v32 = vpop.f32.mrb[67].mxu0 }
 0xe27   : > { %v4266_v62 = vadd.f32 %v9375_v22, %v4226_v16  ;;  %v9399_v33 = vpop.f32.mrb[67].mxu1  ;;  %v8871_v32 = vld [vmem:[%s11804_s11] ss:$0 sm:$0xff] }
 0xe29   : > { %v4306_v34 = vadd.f32 %v9397_v26, %v4266_v62 }
 0xe43   : > { %v9417_v36 = vpop.f32.mrb[68].mxu0 }
 0xe44   : > { %v9439_v37 = vpop.f32.mrb[68].mxu1  ;;  %v9418_v38 = vpop.f32.mrb[69].mxu0 }
 0xe45   : > { %v9419_v41 = vadd.f32 %v9418_v38, %v9417_v36  ;;  %v9440_v42 = vpop.f32.mrb[69].mxu1  ;;  %v9420_v43 = vpop.f32.mrb[70].mxu0  ;;  %v10228_v38 = vld [vmem:[%s11799_s22 + $0x10] sm:$0xff]  }
 0xe46   : > { %v9441_v44 = vadd.f32 %v9440_v42, %v9439_v37  ;;  %v9442_v45 = vpop.f32.mrb[70].mxu1  ;;  %v9421_v46 = vpop.f32.mrb[71].mxu0  ;;  %v10229_v43 = vld [vmem:[%s11799_s22 + $0x18] sm:$0xff]  }
 0xe47   : > { %v4346_v1 = vadd.f32 %v9419_v41, %v4306_v34  ;;  %v9443_v6 = vpop.f32.mrb[71].mxu1 }
 0xe49   : > { %v4386_v47 = vadd.f32 %v9441_v44, %v4346_v1 }
 0xe4b   : > { %v4391_v48 = vadd.f32 %v4386_v47, %v10968_v50  ;;  %v10220_v50 = vld [vmem:[%s10621_s27 + $0x8] sm:$0xff]  }
 0xe4c   : > { %9847 = vmatpush3.bf16.msra.mxu0 %v10220_v50  ;;  %v8897_v50 = vld [vmem:[%s11803_s7 + $0x1] ss:$0 sm:$0xff] }
 0xe4d   : > { %v4394_v49 = vsel %vm2371_vm6, %v4391_v48, 0.0  ;;  %9860 = vmatprep.subr.bf16.mxu0 %v10529_v2 }
 0xe4e   : > { %4395 = vadd.xlane.f32.xlu0 %v4394_v49 }
 0xedb   : > { %v4396_v7 = vpop.xlane.xlu0 %4395 }
 0xedc   : > { %v4397_v27 = vmul.f32 0.03125, %v4396_v7 }
 0xede   : > { %v4398_v51 = vsub.f32 %v4391_v48, %v4397_v27 }
 0xee0   : > { %v4399_v52 = vmul.f32 %v4398_v51, %v4398_v51 }
 0xee2   : > { %v4400_v29 = vsel %vm2371_vm6, %v4399_v52, 0.0 }
 0xee3   : > { %4401 = vadd.xlane.f32.xlu1 %v4400_v29 }
 0xf70   : > { %v4402_v56 = vpop.xlane.xlu1 %4401 }
 0xf71   : > { %v4403_v61 = vmul.f32 0.03125, %v4402_v56 }
 0xf73   : > { %v4404_v39 = vadd.f32 1e-05, %v4403_v61 }
 0xf75   : > { %10444 = vrsqrt.f32 %v4404_v39 }
 0xf7f   : > { %v10445_v40 = vpop.eup %10444 }
 0xf80   : > { %v4406_v57 = vmul.f32 %v10445_v40, %v4398_v51 }
 0xf82   : > { %v4413_v30 = vmul.f32 %v8869_v5, %v4406_v57  ;;  %v8888_v57 = vld [vmem:[%s11804_s11 + $0x1] ss:$0 sm:$0xff] }
 0xf84   : > { %v11248_v59 = vadd.f32 %v8870_v58, %v4413_v30 }
 0xf86   : > { %v11253_v60 = vpack.c.bf16 %v11248_v59, %v11248_v59 }
 0xf88   : > { %9849 = vmatmul.mubr.msk.bf16.vlgmr.msra.gmra.mrb[72].mxu0 %vm1197_vm1, %v11253_v60  ;;  %9857 = vmatmul.mubr.msk.bf16.vlgmr.msra.gmra.mrb[72].mxu1 %vm1197_vm1, %v11253_v60 }
 0xf89   : > { %9861 = vmatpush3.bf16.msra.mxu0 %v10222_v31  ;;  %9864 = vmatprep.mubr.msk.bf16.mxu0 %vm10530_vm0, %v10529_v2 }
 0xf8a   : > { %9862 = vmatprep.subr.bf16.mxu0 %v10529_v2  ;;  %9870 = vmatprep.mubr.msk.bf16.mxu1 %vm10530_vm0, %v10529_v2 }
 0xf8d   : > { %9863 = vmatpush3.bf16.msra.mxu0 %v10223_v8 }
 0xf8e   : > { %9874 = vmatprep.subr.bf16.mxu0 %v10529_v2 }
 0xf90   : > { %9865 = vmatmul.mubr.msk.bf16.vlgmr.msra.gmra.mrb[76].mxu0 %vm1197_vm1, %v11253_v60 }
 0xf91   : > { %9875 = vmatpush3.bf16.msra.mxu0 %v10224_v9  ;;  %9878 = vmatprep.mubr.msk.bf16.mxu0 %vm10530_vm0, %v10529_v2 }
 0xf92   : > { %9876 = vmatprep.subr.bf16.mxu0 %v10529_v2 }
 0xf95   : > { %9877 = vmatpush3.bf16.msra.mxu0 %v10225_v10 }
 0xf96   : > { %9890 = vmatprep.subr.bf16.mxu0 %v10529_v2 }
 0xf98   : > { %9879 = vmatmul.mubr.msk.bf16.vlgmr.msra.gmra.mrb[80].mxu0 %vm1197_vm1, %v11253_v60 }
 0xf99   : > { %9891 = vmatpush3.bf16.msra.mxu0 %v10226_v11  ;;  %9894 = vmatprep.mubr.msk.bf16.mxu0 %vm10530_vm0, %v10529_v2 }
 0xf9a   : > { %9892 = vmatprep.subr.bf16.mxu0 %v10529_v2 }
 0xf9d   : > { %9893 = vmatpush3.bf16.msra.mxu0 %v10227_v12 }
 0xf9e   : > { %9904 = vmatprep.subr.bf16.mxu0 %v10529_v2 }
 0xfa0   : > { %9895 = vmatmul.mubr.msk.bf16.vlgmr.msra.gmra.mrb[84].mxu0 %vm1197_vm1, %v11253_v60 }
 0xfa1   : > { %9906 = vmatprep.mubr.msk.bf16.mxu0 %vm10530_vm0, %v10529_v2 }
0x105b   : > { %v4482_v15 = vpop.f32.mrb[72].mxu0  ;;  %v4545_v16 = vpop.f32.mrb[72].mxu1 }
0x105c   : > { %v4546_v17 = vadd.f32 %v8875_v13, %v4545_v16  ;;  %v9850_v18 = vpop.f32.mrb[73].mxu0  ;;  %v9858_v19 = vpop.f32.mrb[73].mxu1  ;;  %v4483_v33 = vadd.f32 %v8871_v32, %v4482_v15 }
0x105d   : > { %v4485_v22 = vpop.f32.mrb[74].mxu0  ;;  %v4548_v23 = vpop.f32.mrb[74].mxu1 }
0x105e   : > { %v4608_v25 = vpack.c.bf16 %v4546_v17, %v4546_v17  ;;  %v9851_v26 = vpop.f32.mrb[75].mxu0  ;;  %v9859_v28 = vpop.f32.mrb[75].mxu1  ;;  %v4607_v41 = vpack.c.bf16 %v4483_v33, %v4483_v33 }
0x105f   : > { %v10230_v28 = vld [vmem:[%s11799_s22 + $0x20] sm:$0xff]  }
0x1060   : > { %v4613_v62 = vsel %vm1362_vm2, %v4608_v25, 0 }
0x1061   : > { %9869 = vmatpush3.bf16.xpose.msra.mxu1 %v4613_v62  ;;  %v10231_v62 = vld [vmem:[%s11799_s22 + $0x28] sm:$0xff]  }
0x1062   : > { %9882 = vmatprep.subr.bf16.mxu1 %v10529_v2 }
0x1063   : > { %v4601_v34 = vpop.f32.mrb[76].mxu0 }
0x1064   : > { %v9866_v36 = vpop.f32.mrb[77].mxu0  ;;  %v4667_v31 = vpack.c.bf16 %v4601_v34, %v4601_v34 }
0x1065   : > { %v4604_v37 = vpop.f32.mrb[78].mxu0 }
0x1066   : > { %v9867_v42 = vpop.f32.mrb[79].mxu0  ;;  %v4967_v9 = vsel %vm1675_vm4, %v4667_v31, 0 }
0x1068   : > { %9871 = vmatmul.mubr.msk.bf16.vlgmr.msra.gmra.mrb[76].mxu1 %vm1362_vm2, %v4607_v41 }
0x1069   : > { %9883 = vmatpush3.bf16.msra.mxu1 %v10228_v38  ;;  %9886 = vmatprep.mubr.msk.bf16.mxu1 %vm10530_vm0, %v10529_v2 }
0x106a   : > { %9884 = vmatprep.subr.bf16.mxu1 %v10529_v2 }
0x106b   : > { %v4727_v44 = vpop.f32.mrb[80].mxu0 }
0x106c   : > { %v9880_v45 = vpop.f32.mrb[81].mxu0  ;;  %v4728_v30 = vadd.f32 %v8888_v57, %v4727_v44  ;;  %v8916_v57 = vld [vmem:[%s11804_s11 + $0x2] ss:$0 sm:$0xff] }
0x106d   : > { %v4730_v46 = vpop.f32.mrb[82].mxu0  ;;  %9885 = vmatpush3.bf16.msra.mxu1 %v10229_v43 }
0x106e   : > { %v9881_v1 = vpop.f32.mrb[83].mxu0  ;;  %9898 = vmatprep.subr.bf16.mxu1 %v10529_v2  ;;  %v4855_v8 = vpack.c.bf16 %v4728_v30, %v4728_v30  ;;  %v8925_v46 = vld [vmem:[%s11803_s7 + $0x2] ss:$0 sm:$0xff] }
0x1070   : > { %9887 = vmatmul.mubr.msk.bf16.vlgmr.msra.gmra.mrb[80].mxu1 %vm1197_vm1, %v11253_v60 }
0x1071   : > { %9900 = vmatprep.mubr.msk.bf16.mxu1 %vm10530_vm0, %v10529_v2 }
0x1073   : > { %v4849_v6 = vpop.f32.mrb[84].mxu0 }
0x1074   : > { %v4915_v47 = vpack.c.bf16 %v4849_v6, %v4849_v6  ;;  %v9896_v48 = vpop.f32.mrb[85].mxu0 }
0x1075   : > { %v4852_v49 = vpop.f32.mrb[86].mxu0 }
0x1076   : > { %v4920_v7 = vsel %vm1675_vm4, %v4915_v47, 0  ;;  %v9897_v27 = vpop.f32.mrb[87].mxu0 }
0x1077   : > { %9905 = vmatpush3.bf16.msra.mxu0 %v4920_v7 }
0x1078   : > { %9916 = vmatprep.subr.bf16.mxu0 %v10529_v2 }
0x113b   : > { %v4649_v51 = vpop.f32.mrb[76].mxu1 }
0x113c   : > { %v9872_v52 = vpop.f32.mrb[77].mxu1  ;;  %v4655_v29 = vsel %vm1409_vm3, %v4649_v51, -inf }
0x113d   : > { %4656 = vmax.xlane.f32.xlu0 %v4655_v29  ;;  %v4652_v53 = vpop.f32.mrb[78].mxu1  ;;  %v10232_v29 = vld [vmem:[%s10621_s27 + $0x20] sm:$0xff]  }
0x113e   : > { %v9873_v54 = vpop.f32.mrb[79].mxu1 }
0x113f   : > { %v10233_v54 = vld [vmem:[%s10621_s27 + $0x28] sm:$0xff]  }
0x1143   : > { %v4792_v55 = vpop.f32.mrb[80].mxu1 }
0x1144   : > { %v4793_v56 = vadd.f32 %v8897_v50, %v4792_v55  ;;  %v9888_v61 = vpop.f32.mrb[81].mxu1  ;;  %v10234_v50 = vld [vmem:[%s11802_s10 + $0x20] sm:$0xff]   ;;  %v10235_v55 = vld [vmem:[%s11802_s10 + $0x28] sm:$0xff]  }
0x1145   : > { %v4795_v39 = vpop.f32.mrb[82].mxu1 }
0x1146   : > { %v4856_v40 = vpack.c.bf16 %v4793_v56, %v4793_v56  ;;  %v9889_v5 = vpop.f32.mrb[83].mxu1 }
0x1148   : > { %v4861_v58 = vsel %vm1362_vm2, %v4856_v40, 0 }
0x1149   : > { %9899 = vmatpush3.bf16.xpose.msra.mxu1 %v4861_v58 }
0x114a   : > { %9910 = vmatprep.subr.bf16.mxu1 %v10529_v2 }
0x1150   : > { %9901 = vmatmul.mubr.msk.bf16.vlgmr.msra.gmra.mrb[84].mxu1 %vm1362_vm2, %v4855_v8 }
0x1151   : > { %9911 = vmatpush3.bf16.msra.mxu1 %v4967_v9  ;;  %9912 = vmatprep.mubr.msk.bf16.mxu1 %vm10530_vm0, %v10529_v2  ;;  %v10236_v9 = vld [vmem:[%s10621_s27 + $0x30] sm:$0xff]  }
0x1152   : > { %9924 = vmatprep.subr.bf16.mxu1 %v10529_v2 }
0x11ca   : > { %v4657_v10 = vpop.xlane.xlu0 %4656 }
0x11cb   : > { %v4658_v11 = vsub.f32 %v4649_v51, %v4657_v10 }
0x11cd   : > { %v4659_v12 = vmul.f32 1.442695, %v4658_v11 }
0x11cf   : > { %10446 = vpow2.f32 %v4659_v12  ;;  %v10237_v12 = vld [vmem:[%s10621_s27 + $0x38] sm:$0xff]  }
0x11d9   : > { %v10447_v13 = vpop.eup %10446 }
0x11da   : > { %v4661_v15 = vsel %vm1409_vm3, %v10447_v13, 0.0 }
0x11db   : > { %4662 = vadd.xlane.f32.xlu0 %v4661_v15 }
0x1223   : > { %v4897_v16 = vpop.f32.mrb[84].mxu1 }
0x1224   : > { %v9902_v17 = vpop.f32.mrb[85].mxu1  ;;  %v4903_v18 = vsel %vm1409_vm3, %v4897_v16, -inf }
0x1225   : > { %4904 = vmax.xlane.f32.xlu1 %v4903_v18  ;;  %v4900_v19 = vpop.f32.mrb[86].mxu1  ;;  %v10238_v18 = vld [vmem:[%s11802_s10 + $0x30] sm:$0xff]  }
0x1226   : > { %v9903_v22 = vpop.f32.mrb[87].mxu1 }
0x1268   : > { %v4663_v23 = vpop.xlane.xlu0 %4662 }
0x1269   : > { %10448 = vrcp.f32 %v4663_v23  ;;  %v10239_v23 = vld [vmem:[%s11802_s10 + $0x38] sm:$0xff]  }
0x1273   : > { %v10449_v25 = vpop.eup %10448 }
0x1274   : > { %v11315_v26 = vmul.f32 %v10449_v25, %v10447_v13 }
0x1276   : > { %v4666_v32 = vpack.c.bf16 %v11315_v26, %v11315_v26 }
0x1278   : > { %9913 = vmatmul.mubr.msk.bf16.vlgmr.msra.gmra.mrb[88].mxu1 %vm1671_vm5, %v4666_v32 }
0x1279   : > { %9925 = vmatpush3.bf16.msra.mxu1 %v10230_v28  ;;  %9928 = vmatprep.mubr.msk.bf16.mxu1 %vm10530_vm0, %v10529_v2 }
0x127a   : > { %9926 = vmatprep.subr.bf16.mxu1 %v10529_v2 }
0x127d   : > { %9927 = vmatpush3.bf16.msra.mxu1 %v10231_v62 }
0x127e   : > { %9940 = vmatprep.subr.bf16.mxu1 %v10529_v2 }
0x1280   : > { %9929 = vmatmul.mubr.msk.bf16.vlgmr.msra.gmra.mrb[92].mxu1 %vm1197_vm1, %v11253_v60 }
0x1281   : > { %9942 = vmatprep.mubr.msk.bf16.mxu1 %vm10530_vm0, %v10529_v2 }
0x12b2   : > { %v4905_v33 = vpop.xlane.xlu1 %4904 }
0x12b3   : > { %v4906_v34 = vsub.f32 %v4897_v16, %v4905_v33 }
0x12b5   : > { %v4907_v36 = vmul.f32 1.442695, %v4906_v34 }
0x12b7   : > { %10450 = vpow2.f32 %v4907_v36 }
0x12c1   : > { %v10451_v37 = vpop.eup %10450 }
0x12c2   : > { %v4909_v38 = vsel %vm1409_vm3, %v10451_v37, 0.0 }
0x12c3   : > { %4910 = vadd.xlane.f32.xlu1 %v4909_v38 }
0x134b   : > { %v5003_v41 = vpop.f32.mrb[88].mxu1 }
0x134c   : > { %v9914_v42 = vpop.f32.mrb[89].mxu1 }
0x134d   : > { %v5006_v43 = vpop.f32.mrb[90].mxu1 }
0x134e   : > { %v9915_v44 = vpop.f32.mrb[91].mxu1 }
0x1350   : > { %v4911_v45 = vpop.xlane.xlu1 %4910 }
0x1351   : > { %10452 = vrcp.f32 %v4911_v45 }
0x1353   : > { %v5133_v1 = vpop.f32.mrb[92].mxu1 }
0x1354   : > { %v5134_v6 = vadd.f32 %v8925_v46, %v5133_v1  ;;  %v9930_v47 = vpop.f32.mrb[93].mxu1 }
0x1355   : > { %v5136_v48 = vpop.f32.mrb[94].mxu1 }
0x1356   : > { %v5197_v49 = vpack.c.bf16 %v5134_v6, %v5134_v6  ;;  %v9931_v7 = vpop.f32.mrb[95].mxu1 }
0x1358   : > { %v5202_v27 = vsel %vm1362_vm2, %v5197_v49, 0 }
0x1359   : > { %9941 = vmatpush3.bf16.xpose.msra.mxu1 %v5202_v27 }
0x135a   : > { %9952 = vmatprep.subr.bf16.mxu1 %v10529_v2 }
0x135b   : > { %v10453_v51 = vpop.eup %10452 }
0x135c   : > { %v11334_v52 = vmul.f32 %v10453_v51, %v10451_v37 }
0x135e   : > { %v4914_v53 = vpack.c.bf16 %v11334_v52, %v11334_v52  ;;  %v4962_v51 = vadd.f32 %v11334_v52, %v11315_v26 }
0x1360   : > { %9907 = vmatmul.mubr.msk.bf16.vlgmr.msra.gmra.mrb[88].mxu0 %vm1671_vm5, %v4914_v53  ;;  %v10240_v53 = vld [vmem:[%s11799_s22 + $0x30] sm:$0xff]  }
0x1361   : > { %9917 = vmatpush3.bf16.msra.mxu0 %v10232_v29  ;;  %9920 = vmatprep.mubr.msk.bf16.mxu0 %vm10530_vm0, %v10529_v2 }
0x1362   : > { %9918 = vmatprep.subr.bf16.mxu0 %v10529_v2 }
0x1365   : > { %9919 = vmatpush3.bf16.msra.mxu0 %v10233_v54 }
0x1366   : > { %9932 = vmatprep.subr.bf16.mxu0 %v10529_v2 }
0x1368   : > { %9921 = vmatmul.mubr.msk.bf16.vlgmr.msra.gmra.mrb[92].mxu0 %vm1197_vm1, %v11253_v60 }
0x1369   : > { %9933 = vmatpush3.bf16.msra.mxu0 %v10234_v50  ;;  %9936 = vmatprep.mubr.msk.bf16.mxu0 %vm10530_vm0, %v10529_v2 }
0x136a   : > { %9934 = vmatprep.subr.bf16.mxu0 %v10529_v2 }
0x136d   : > { %9935 = vmatpush3.bf16.msra.mxu0 %v10235_v55  ;;  %v10241_v55 = vld [vmem:[%s11799_s22 + $0x38] sm:$0xff]  }
0x136e   : > { %9946 = vmatprep.subr.bf16.mxu0 %v10529_v2 }
0x1370   : > { %9937 = vmatmul.mubr.msk.bf16.vlgmr.msra.gmra.mrb[96].mxu0 %vm1197_vm1, %v11253_v60 }
0x1371   : > { %9948 = vmatprep.mubr.msk.bf16.mxu0 %vm10530_vm0, %v10529_v2 }
0x1433   : > { %v4956_v56 = vpop.f32.mrb[88].mxu0 }
0x1434   : > { %v11357_v61 = vadd.f32 %v5003_v41, %v4956_v56  ;;  %v9908_v39 = vpop.f32.mrb[89].mxu0 }
0x1435   : > { %v4959_v40 = vpop.f32.mrb[90].mxu0 }
0x1436   : > { %v9909_v5 = vpop.f32.mrb[91].mxu0 }
0x1437   : > { %v8952_v5 = vld [vmem:[%s11803_s7 + $0x3] ss:$0 sm:$0xff] }
0x143b   : > { %v5068_v58 = vpop.f32.mrb[92].mxu0 }
0x143c   : > { %v5069_v30 = vadd.f32 %v8916_v57, %v5068_v58  ;;  %v9922_v31 = vpop.f32.mrb[93].mxu0 }
0x143d   : > { %v5071_v8 = vpop.f32.mrb[94].mxu0 }
0x143e   : > { %v5196_v10 = vpack.c.bf16 %v5069_v30, %v5069_v30  ;;  %v9923_v11 = vpop.f32.mrb[95].mxu0 }
0x1440   : > { %9943 = vmatmul.mubr.msk.bf16.vlgmr.msra.gmra.mrb[96].mxu1 %vm1362_vm2, %v5196_v10  ;;  %v8943_v10 = vld [vmem:[%s11804_s11 + $0x3] ss:$0 sm:$0xff] }
0x1441   : > { %9953 = vmatpush3.bf16.msra.mxu1 %v10236_v9  ;;  %9956 = vmatprep.mubr.msk.bf16.mxu1 %vm10530_vm0, %v10529_v2 }
0x1442   : > { %9954 = vmatprep.subr.bf16.mxu1 %v10529_v2 }
0x1443   : > { %v5190_v13 = vpop.f32.mrb[96].mxu0 }
0x1444   : > { %v5256_v15 = vpack.c.bf16 %v5190_v13, %v5190_v13  ;;  %v9938_v16 = vpop.f32.mrb[97].mxu0 }
0x1445   : > { %v5193_v17 = vpop.f32.mrb[98].mxu0  ;;  %9955 = vmatpush3.bf16.msra.mxu1 %v10237_v12 }
0x1446   : > { %v5261_v19 = vsel %vm1675_vm4, %v5256_v15, 0  ;;  %v9939_v22 = vpop.f32.mrb[99].mxu0  ;;  %9968 = vmatprep.subr.bf16.mxu1 %v10529_v2 }
0x1447   : > { %9947 = vmatpush3.bf16.msra.mxu0 %v5261_v19 }
0x1448   : > { %9957 = vmatmul.mubr.msk.bf16.vlgmr.msra.gmra.mrb[100].mxu1 %vm1197_vm1, %v11253_v60  ;;  %9960 = vmatprep.subr.bf16.mxu0 %v10529_v2 }
0x1449   : > { %9969 = vmatpush3.bf16.msra.mxu1 %v10238_v18  ;;  %9972 = vmatprep.mubr.msk.bf16.mxu1 %vm10530_vm0, %v10529_v2 }
0x144a   : > { %9970 = vmatprep.subr.bf16.mxu1 %v10529_v2 }
0x144d   : > { %9971 = vmatpush3.bf16.msra.mxu1 %v10239_v23 }
0x144e   : > { %9982 = vmatprep.subr.bf16.mxu1 %v10529_v2 }
0x1450   : > { %9973 = vmatmul.mubr.msk.bf16.vlgmr.msra.gmra.mrb[104].mxu1 %vm1197_vm1, %v11253_v60 }
0x1451   : > { %9984 = vmatprep.mubr.msk.bf16.mxu1 %vm10530_vm0, %v10529_v2 }
0x1513   : > { %v5238_v25 = vpop.f32.mrb[96].mxu1 }
0x1514   : > { %v9944_v28 = vpop.f32.mrb[97].mxu1  ;;  %v5244_v32 = vsel %vm1409_vm3, %v5238_v25, -inf }
0x1515   : > { %5245 = vmax.xlane.f32.xlu0 %v5244_v32  ;;  %v5241_v62 = vpop.f32.mrb[98].mxu1 }
0x1516   : > { %v9945_v33 = vpop.f32.mrb[99].mxu1 }
0x151b   : > { %v5364_v34 = vpop.f32.mrb[100].mxu1 }
0x151c   : > { %v9958_v36 = vpop.f32.mrb[101].mxu1 }
0x151d   : > { %v5367_v37 = vpop.f32.mrb[102].mxu1 }
0x151e   : > { %v9959_v38 = vpop.f32.mrb[103].mxu1 }
0x1523   : > { %v5486_v41 = vpop.f32.mrb[104].mxu1 }
0x1524   : > { %v5552_v42 = vpack.c.bf16 %v5486_v41, %v5486_v41  ;;  %v9974_v43 = vpop.f32.mrb[105].mxu1 }
0x1525   : > { %v5489_v44 = vpop.f32.mrb[106].mxu1  ;;  %v8966_v43 = vld [vmem:[%s11805_s15] ss:$0 sm:$0xff]  ;;  %s11808_s15 = sld [smem:[#allocation15_spill]] }
0x1526   : > { %v5557_v45 = vsel %vm1675_vm4, %v5552_v42, 0  ;;  %v9975_v46 = vpop.f32.mrb[107].mxu1 }
0x1527   : > { %9983 = vmatpush3.bf16.msra.mxu1 %v5557_v45 }
0x15a2   : > { %v5246_v1 = vpop.xlane.xlu0 %5245 }
0x15a3   : > { %v5247_v6 = vsub.f32 %v5238_v25, %v5246_v1 }
0x15a5   : > { %v5248_v47 = vmul.f32 1.442695, %v5247_v6 }
0x15a7   : > { %10454 = vpow2.f32 %v5248_v47 }
0x15b1   : > { %v10455_v48 = vpop.eup %10454 }
0x15b2   : > { %v5250_v49 = vsel %vm1409_vm3, %v10455_v48, 0.0 }
0x15b3   : > { %5251 = vadd.xlane.f32.xlu1 %v5250_v49 }
0x1640   : > { %v5252_v7 = vpop.xlane.xlu1 %5251 }
0x1641   : > { %10456 = vrcp.f32 %v5252_v7 }
0x164b   : > { %v10457_v27 = vpop.eup %10456 }
0x164c   : > { %v5254_v29 = vmul.f32 %v10457_v27, %v10455_v48  ;;  %v5643_v27 = vld [vmem:[%s11806_s23] sm:$0xff] }
0x164e   : > { %v5303_v54 = vadd.f32 %v5254_v29, %v4962_v51  ;;  %v5255_v50 = vpack.c.bf16 %v5254_v29, %v5254_v29  ;;  %v5651_v51 = vld [vmem:[%s11806_s23 + $0x40] sm:$0xff]  ;;  %v5644_v29 = vld [vmem:[%s11806_s23 + $0x8] sm:$0xff] }
0x1650   : > { %9949 = vmatmul.mubr.msk.bf16.vlgmr.msra.gmra.mrb[100].mxu0 %vm1671_vm5, %v5255_v50 }
0x1651   : > { %9961 = vmatpush3.bf16.msra.mxu0 %v10240_v53  ;;  %9964 = vmatprep.mubr.msk.bf16.mxu0 %vm10530_vm0, %v10529_v2  ;;  %v5652_v53 = vld [vmem:[%s11806_s23 + $0x48] sm:$0xff] }
0x1652   : > { %9962 = vmatprep.subr.bf16.mxu0 %v10529_v2  ;;  %v8971_v50 = vcombine.low %v5644_v29, %v5652_v53 }
0x1655   : > { %9963 = vmatpush3.bf16.msra.mxu0 %v10241_v55  ;;  %v8972_v55 = vcombine.high %v5644_v29, %v5652_v53  ;;  %v5649_v29 = vld [vmem:[%s11806_s23 + $0x30] sm:$0xff]  ;;  %v5650_v53 = vld [vmem:[%s11806_s23 + $0x38] sm:$0xff] }
0x1656   : > { %9976 = vmatprep.subr.bf16.mxu0 %v10529_v2 }
0x1657   : > { %5963 = vmatprep.subr.bf16.mxu1 %v8972_v55 }
0x1658   : > { %9965 = vmatmul.mubr.msk.bf16.vlgmr.msra.gmra.mrb[104].mxu0 %vm1197_vm1, %v11253_v60  ;;  %v5365_v60 = vadd.f32 %v8943_v10, %v5364_v34 }
0x1659   : > { %9978 = vmatprep.mubr.msk.bf16.mxu0 %vm10530_vm0, %v10529_v2 }
0x165a   : > { %v5492_v12 = vpack.c.bf16 %v5365_v60, %v5365_v60 }
0x1723   : > { %v5297_v26 = vpop.f32.mrb[100].mxu0 }
0x1724   : > { %v5304_v52 = vadd.f32 %v5297_v26, %v11357_v61  ;;  %v9950_v56 = vpop.f32.mrb[101].mxu0  ;;  %v5659_v26 = vld [vmem:[%s11806_s23 + $0x80] sm:$0xff] }
0x1725   : > { %v5300_v39 = vpop.f32.mrb[102].mxu0  ;;  %v5660_v56 = vld [vmem:[%s11806_s23 + $0x88] sm:$0xff] }
0x1726   : > { %v9951_v40 = vpop.f32.mrb[103].mxu0 }
0x1727   : > { %v5668_v40 = vld [vmem:[%s11806_s23 + $0xc8] sm:$0xff] }
0x172b   : > { %v5429_v57 = vpop.f32.mrb[104].mxu0 }
0x172c   : > { %v5430_v58 = vadd.f32 %v8952_v5, %v5429_v57  ;;  %v9966_v30 = vpop.f32.mrb[105].mxu0  ;;  %v8987_v57 = vcombine.low %v5660_v56, %v5668_v40 }
0x172d   : > { %v5432_v31 = vpop.f32.mrb[106].mxu0  ;;  %v5645_v30 = vld [vmem:[%s11806_s23 + $0x10] sm:$0xff] }
0x172e   : > { %v5493_v8 = vpack.c.bf16 %v5430_v58, %v5430_v58  ;;  %v9967_v9 = vpop.f32.mrb[107].mxu0  ;;  %v8988_v58 = vcombine.high %v5660_v56, %v5668_v40  ;;  %v5653_v31 = vld [vmem:[%s11806_s23 + $0x50] sm:$0xff]  ;;  %v5666_v40 = vld [vmem:[%s11806_s23 + $0xb8] sm:$0xff] }
0x172f   : > { %v8973_v9 = vcombine.low %v5645_v30, %v5653_v31  ;;  %v8974_v10 = vcombine.high %v5645_v30, %v5653_v31  ;;  %v5665_v56 = vld [vmem:[%s11806_s23 + $0xb0] sm:$0xff] }
0x1730   : > { %v5498_v11 = vsel %vm1362_vm2, %v5493_v8, 0  ;;  %v5646_v8 = vld [vmem:[%s11806_s23 + $0x18] sm:$0xff] }
0x1731   : > { %9977 = vmatpush3.bf16.xpose.msra.mxu0 %v5498_v11  ;;  %v5654_v11 = vld [vmem:[%s11806_s23 + $0x58] sm:$0xff] }
0x1732   : > { %v8975_v60 = vcombine.low %v5646_v8, %v5654_v11 }
0x1738   : > { %9979 = vmatmul.mubr.msk.bf16.vlgmr.msra.gmra.mrb[108].mxu0 %vm1362_vm2, %v5492_v12  ;;  %v8976_v12 = vcombine.high %v5646_v8, %v5654_v11 }
0x1739   : > { %5954 = vmatprep.mubr.bf16.mxu0 %v10531_v35 }
0x180b   : > { %v5534_v61 = vpop.f32.mrb[108].mxu0 }
0x180c   : > { %v9980_v13 = vpop.f32.mrb[109].mxu0  ;;  %v5540_v15 = vsel %vm1409_vm3, %v5534_v61, -inf }
0x180d   : > { %5541 = vmax.xlane.f32.xlu0 %v5540_v15  ;;  %v5537_v16 = vpop.f32.mrb[110].mxu0 }
0x180e   : > { %v9981_v17 = vpop.f32.mrb[111].mxu0 }
0x180f   : > { %v8967_v17 = vld [vmem:[%s11807_s2] ss:$0 sm:$0xff]  ;;  %s11809_s2 = sld [smem:[#allocation18_spill]] }
0x1815   : > { %v10243_v11 = vld [vmem:[%s11809_s2 + $0xc0] sm:$0xff]  }
0x189a   : > { %v5542_v18 = vpop.xlane.xlu0 %5541 }
0x189b   : > { %v5543_v19 = vsub.f32 %v5534_v61, %v5542_v18 }
0x189d   : > { %v5544_v22 = vmul.f32 1.442695, %v5543_v19  ;;  %v8968_v19 = vld [vmem:[%s11808_s15] ss:$0 sm:$0xff]  ;;  %s11810_s15 = sld [smem:[#allocation17_spill]] }
0x189f   : > { %10458 = vpow2.f32 %v5544_v22 }
0x18a3   : > { %s11811_s3 = smov %s11810_s15 }
0x18a9   : > { %v10459_v23 = vpop.eup %10458 }
0x18aa   : > { %v5546_v25 = vsel %vm1409_vm3, %v10459_v23, 0.0 }
0x18ab   : > { %5547 = vadd.xlane.f32.xlu1 %v5546_v25  ;;  %v5669_v25 = vld [vmem:[%s11806_s23 + $0xd0] sm:$0xff] }
0x1938   : > { %v5548_v28 = vpop.xlane.xlu1 %5547 }
0x1939   : > { %10460 = vrcp.f32 %v5548_v28  ;;  %v5662_v28 = vld [vmem:[%s11806_s23 + $0x98] sm:$0xff] }
0x1943   : > { %v10461_v32 = vpop.eup %10460 }
0x1944   : > { %v5550_v62 = vmul.f32 %v10461_v32, %v10459_v23  ;;  %v5661_v23 = vld [vmem:[%s11806_s23 + $0x90] sm:$0xff]  ;;  %v5670_v32 = vld [vmem:[%s11806_s23 + $0xd8] sm:$0xff] }
0x1946   : > { %v5599_v33 = vadd.f32 %v5550_v62, %v5303_v54  ;;  %v5551_v34 = vpack.c.bf16 %v5550_v62, %v5550_v62  ;;  %v8969_v54 = vcombine.low %v5643_v27, %v5651_v51 }
0x1948   : > { %v5601_v36 = vmul.f32 0.25, %v5599_v33  ;;  %9985 = vmatmul.mubr.msk.bf16.vlgmr.msra.gmra.mrb[108].mxu1 %vm1671_vm5, %v5551_v34  ;;  %v8990_v34 = vcombine.high %v5661_v23, %v5669_v25 }
0x1949   : > { %5995 = vmatprep.mubr.bf16.mxu1 %v10531_v35  ;;  %5964 = vmatpush1.bf16.msra.mxu1 %v8971_v50 }
0x194a   : > { %8965 = vst.msk [vmem:[%s10940_s18 + $0x8] sm:$0x3f] %vm1409_vm3, %v5601_v36  ;;  %5965 = vmatprep.subr.bf16.mxu1 %v8988_v58  ;;  %v8992_v36 = vcombine.high %v5662_v28, %v5670_v32 }
0x194d   : > { %5966 = vmatpush1.bf16.msra.mxu1 %v8987_v57 }
0x194e   : > { %6045 = vmatprep.subr.bf16.mxu1 %v8976_v12  ;;  %v10245_v12 = vld [vmem:[%s11809_s2 + $0x80] sm:$0xff]  }
0x1a1b   : > { %v5593_v37 = vpop.f32.mrb[108].mxu1 }
0x1a1c   : > { %v5600_v38 = vadd.f32 %v5593_v37, %v5304_v52  ;;  %v9986_v41 = vpop.f32.mrb[109].mxu1  ;;  %v5667_v52 = vld [vmem:[%s11806_s23 + $0xc0] sm:$0xff] }
0x1a1d   : > { %v5596_v42 = vpop.f32.mrb[110].mxu1  ;;  %v8986_v39 = vcombine.high %v5659_v26, %v5667_v52  ;;  %v8985_v5 = vcombine.low %v5659_v26, %v5667_v52  ;;  %v5647_v37 = vld [vmem:[%s11806_s23 + $0x20] sm:$0xff]  ;;  %v5648_v41 = vld [vmem:[%s11806_s23 + $0x28] sm:$0xff] }
0x1a1e   : > { %v5604_v44 = vadd.f32 %v5600_v38, %v11248_v59  ;;  %v9987_v45 = vpop.f32.mrb[111].mxu1  ;;  %v8970_v59 = vcombine.high %v5643_v27, %v5651_v51  ;;  %v5655_v38 = vld [vmem:[%s11806_s23 + $0x60] sm:$0xff]  ;;  %v5656_v42 = vld [vmem:[%s11806_s23 + $0x68] sm:$0xff] }
0x1a1f   : > { %v8978_v45 = vcombine.high %v5647_v37, %v5655_v38 }
0x1a20   : > { %v5612_v46 = vadd.f32 %v8966_v43, %v5604_v44  ;;  %5922 = vmatprep.subr.bf16.mxu0 %v8970_v59  ;;  %v8989_v43 = vcombine.low %v5661_v23, %v5669_v25  ;;  %v8991_v44 = vcombine.low %v5662_v28, %v5670_v32  ;;  %v5657_v59 = vld [vmem:[%s11806_s23 + $0x70] sm:$0xff]  ;;  %v10254_v23 = vld [vmem:[%s11809_s2 + $0x58] sm:$0xff]  }
0x1a21   : > { %5923 = vmatpush1.bf16.msra.mxu0 %v8969_v54  ;;  %v5658_v54 = vld [vmem:[%s11806_s23 + $0x78] sm:$0xff]  ;;  %v8982_v26 = vcombine.high %v5649_v29, %v5657_v59  ;;  %v8981_v57 = vcombine.low %v5649_v29, %v5657_v59 }
0x1a22   : > { %v5615_v1 = vsel %vm2371_vm6, %v5612_v46, 0.0  ;;  %5924 = vmatprep.subr.bf16.mxu0 %v8986_v39  ;;  %v8984_v52 = vcombine.high %v5650_v53, %v5658_v54  ;;  %v5673_v39 = vld [vmem:[%s11806_s23 + $0xf0] sm:$0xff]  ;;  %v8983_v58 = vcombine.low %v5650_v53, %v5658_v54  ;;  %v10255_v25 = vld [vmem:[%s11809_s2 + $0xd8] sm:$0xff]  }
0x1a23   : > { %5616 = vadd.xlane.f32.xlu0 %v5615_v1  ;;  %v5663_v1 = vld [vmem:[%s11806_s23 + $0xa0] sm:$0xff]  ;;  %v8998_v30 = vcombine.high %v5665_v56, %v5673_v39  ;;  %v8997_v8 = vcombine.low %v5665_v56, %v5673_v39  ;;  %v10256_v28 = vld [vmem:[%s11809_s2 + $0x18] sm:$0xff]  }
0x1a24   : > { %v10257_v32 = vld [vmem:[%s11809_s2 + $0x98] sm:$0xff]  }
0x1a25   : > { %5925 = vmatpush1.bf16.msra.mxu0 %v8985_v5  ;;  %v5674_v5 = vld [vmem:[%s11806_s23 + $0xf8] sm:$0xff] }
0x1a26   : > { %6004 = vmatprep.subr.bf16.mxu0 %v8974_v10  ;;  %v9000_v31 = vcombine.high %v5666_v40, %v5674_v5  ;;  %v10242_v10 = vld [vmem:[%s11809_s2 + $0x40] sm:$0xff]  }
0x1ab0   : > { %v5617_v6 = vpop.xlane.xlu0 %5616 }
0x1ab1   : > { %v5618_v47 = vmul.f32 0.03125, %v5617_v6  ;;  %v5671_v6 = vld [vmem:[%s11806_s23 + $0xe0] sm:$0xff] }
0x1ab2   : > { %v8994_v27 = vcombine.high %v5663_v1, %v5671_v6  ;;  %v8993_v50 = vcombine.low %v5663_v1, %v5671_v6  ;;  %v10269_v1 = vld [vmem:[%s11809_s2 + $0xb0] sm:$0xff]   ;;  %v10270_v6 = vld [vmem:[%s11809_s2 + $0x78] sm:$0xff]  }
0x1ab3   : > { %v5619_v48 = vsub.f32 %v5612_v46, %v5618_v47  ;;  %v8980_v46 = vcombine.high %v5648_v41, %v5656_v42  ;;  %v5664_v47 = vld [vmem:[%s11806_s23 + $0xa8] sm:$0xff] }
0x1ab5   : > { %v5620_v49 = vmul.f32 %v5619_v48, %v5619_v48 }
0x1ab7   : > { %v5621_v7 = vsel %vm2371_vm6, %v5620_v49, 0.0  ;;  %v8977_v49 = vcombine.low %v5647_v37, %v5655_v38  ;;  %v10261_v37 = vld [vmem:[%s11809_s2 + $0xa0] sm:$0xff]   ;;  %v10262_v38 = vld [vmem:[%s11809_s2 + $0x68] sm:$0xff]  }
0x1ab8   : > { %5622 = vadd.xlane.f32.xlu1 %v5621_v7  ;;  %v8979_v7 = vcombine.low %v5648_v41, %v5656_v42  ;;  %v10263_v41 = vld [vmem:[%s11809_s2 + $0xe8] sm:$0xff]  }
0x1ab9   : > { %v10264_v42 = vld [vmem:[%s11809_s2 + $0x28] sm:$0xff]  }
0x1b45   : > { %v5623_v61 = vpop.xlane.xlu1 %5622 }
0x1b46   : > { %v5624_v13 = vmul.f32 0.03125, %v5623_v61  ;;  %v10246_v61 = vld [vmem:[%s11809_s2 + $0x48] sm:$0xff]  }
0x1b48   : > { %v5625_v15 = vadd.f32 1e-05, %v5624_v13  ;;  %v10247_v13 = vld [vmem:[%s11809_s2 + $0xc8] sm:$0xff]  }
0x1b4a   : > { %10462 = vrsqrt.f32 %v5625_v15  ;;  %v10248_v15 = vld [vmem:[%s11809_s2 + $0x8] sm:$0xff]  }
0x1b54   : > { %v10463_v16 = vpop.eup %10462 }
0x1b55   : > { %v5627_v18 = vmul.f32 %v10463_v16, %v5619_v48  ;;  %v5672_v48 = vld [vmem:[%s11806_s23 + $0xe8] sm:$0xff] }
0x1b56   : > { %v8996_v51 = vcombine.high %v5664_v47, %v5672_v48  ;;  %v8995_v55 = vcombine.low %v5664_v47, %v5672_v48  ;;  %v10249_v16 = vld [vmem:[%s11809_s2 + $0x88] sm:$0xff]   ;;  %v10271_v47 = vld [vmem:[%s11809_s2 + $0xf8] sm:$0xff]  }
0x1b57   : > { %v5634_v22 = vmul.f32 %v8967_v17, %v5627_v18  ;;  %v10250_v17 = vld [vmem:[%s11809_s2 + $0x50] sm:$0xff]   ;;  %v10272_v48 = vld [vmem:[%s11809_s2 + $0x38] sm:$0xff]  }
0x1b58   : > { %v10251_v18 = vld [vmem:[%s11809_s2 + $0xd0] sm:$0xff]  }
0x1b59   : > { %v11431_v62 = vadd.f32 %v8968_v19, %v5634_v22  ;;  %v10252_v19 = vld [vmem:[%s11809_s2 + $0x10] sm:$0xff]  }
0x1b5a   : > { %v10253_v22 = vld [vmem:[%s11809_s2 + $0x90] sm:$0xff]  }
0x1b5b   : > { %v11435_v33 = vpack.c.bf16 %v11431_v62, %v11431_v62 }
0x1b5d   : > { %9001 = vmatmul.mubr.msk.bf16.vlgmr.msra.gmra.mrb[112].mxu0 %vm1197_vm1, %v11435_v33  ;;  %9002 = vmatmul.mubr.msk.bf16.vlgmr.msra.gmra.mrb[112].mxu1 %vm1197_vm1, %v11435_v33 }
0x1b5e   : > { %6005 = vmatpush1.bf16.msra.mxu0 %v8973_v9  ;;  %6046 = vmatpush1.bf16.msra.mxu1 %v8975_v60  ;;  %v8999_v9 = vcombine.low %v5666_v40, %v5674_v5  ;;  %v10244_v60 = vld [vmem:[%s11809_s2] sm:$0xff]  }
0x1b5f   : > { %6006 = vmatprep.subr.bf16.mxu0 %v8990_v34  ;;  %6047 = vmatprep.subr.bf16.mxu1 %v8992_v36  ;;  %v10259_v34 = vld [vmem:[%s11809_s2 + $0xe0] sm:$0xff]  }
0x1b60   : > { %6036 = vmatprep.mubr.bf16.mxu0 %v10531_v35  ;;  %6077 = vmatprep.mubr.bf16.mxu1 %v10531_v35  ;;  %v10260_v36 = vld [vmem:[%s11809_s2 + $0x20] sm:$0xff]  }
0x1b62   : > { %6007 = vmatpush1.bf16.msra.mxu0 %v8989_v43  ;;  %6048 = vmatpush1.bf16.msra.mxu1 %v8991_v44  ;;  %v10265_v43 = vld [vmem:[%s11809_s2 + $0xa8] sm:$0xff]   ;;  %v10266_v44 = vld [vmem:[%s11809_s2 + $0x70] sm:$0xff]  }
0x1b63   : > { %6086 = vmatprep.subr.bf16.mxu0 %v8978_v45  ;;  %6127 = vmatprep.subr.bf16.mxu1 %v8980_v46  ;;  %v10267_v45 = vld [vmem:[%s11809_s2 + $0xf0] sm:$0xff]  }
0x1b64   : > { %v10268_v46 = vld [vmem:[%s11809_s2 + $0x30] sm:$0xff]  }
0x1b65   : > { %9003 = vmatmul.mubr.msk.bf16.vlgmr.msra.gmra.mrb[116].mxu0 %vm1197_vm1, %v11435_v33  ;;  %9004 = vmatmul.mubr.msk.bf16.vlgmr.msra.gmra.mrb[116].mxu1 %vm1197_vm1, %v11435_v33 }
0x1b66   : > { %6087 = vmatpush1.bf16.msra.mxu0 %v8977_v49  ;;  %6128 = vmatpush1.bf16.msra.mxu1 %v8979_v7  ;;  %v10273_v49 = vld [vmem:[%s11809_s2 + $0xb8] sm:$0xff]   ;;  %v10274_v7 = vld [vmem:[%s11809_s2 + $0x140] sm:$0xff]  }
0x1b67   : > { %6088 = vmatprep.subr.bf16.mxu0 %v8994_v27  ;;  %6129 = vmatprep.subr.bf16.mxu1 %v8996_v51  ;;  %v10275_v27 = vld [vmem:[%s11809_s2 + $0x1c0] sm:$0xff]  }
0x1b68   : > { %6118 = vmatprep.mubr.bf16.mxu0 %v10531_v35  ;;  %6159 = vmatprep.mubr.bf16.mxu1 %v10531_v35  ;;  %v11510_v51 = vld [vmem:[%s11810_s15] sm:$0xff]  ;;  %s11812_s15 = sld [smem:[#allocation19_spill]] }
0x1b69   : > { %v5682_v29 = vrot.slane %v11510_v51, %v11049_v63  ;;  %v5690_v59 = vrot.slane %v11510_v51, %v11052_v0  ;;  %v5686_v53 = vrot.slane %v11510_v51, %v11058_v3  ;;  %v5694_v54 = vrot.slane %v11510_v51, %v11061_v4 }
0x1b6a   : > { %6089 = vmatpush1.bf16.msra.mxu0 %v8993_v50  ;;  %6130 = vmatpush1.bf16.msra.mxu1 %v8995_v55 }
0x1b6b   : > { %6168 = vmatprep.subr.bf16.mxu0 %v8982_v26  ;;  %6209 = vmatprep.subr.bf16.mxu1 %v8984_v52 }
0x1b6d   : > { %9005 = vmatmul.mubr.msk.bf16.vlgmr.msra.gmra.mrb[120].mxu0 %vm1197_vm1, %v11435_v33  ;;  %9006 = vmatmul.mubr.msk.bf16.vlgmr.msra.gmra.mrb[120].mxu1 %vm1197_vm1, %v11435_v33 }
0x1b6e   : > { %6169 = vmatpush1.bf16.msra.mxu0 %v8981_v57  ;;  %6210 = vmatpush1.bf16.msra.mxu1 %v8983_v58 }
0x1b6f   : > { %6170 = vmatprep.subr.bf16.mxu0 %v8998_v30  ;;  %6211 = vmatprep.subr.bf16.mxu1 %v9000_v31 }
0x1b70   : > { %6200 = vmatprep.mubr.bf16.mxu0 %v10531_v35  ;;  %6241 = vmatprep.mubr.bf16.mxu1 %v10531_v35 }
0x1b72   : > { %6171 = vmatpush1.bf16.msra.mxu0 %v8997_v8  ;;  %6212 = vmatpush1.bf16.msra.mxu1 %v8999_v9 }
0x1b73   : > { %9497 = vmatprep.subr.bf16.mxu0 %v10242_v10  ;;  %9519 = vmatprep.subr.bf16.mxu1 %v10243_v11 }
0x1b75   : > { %9007 = vmatmul.mubr.msk.bf16.vlgmr.msra.gmra.mrb[124].mxu0 %vm1197_vm1, %v11435_v33  ;;  %9008 = vmatmul.mubr.msk.bf16.vlgmr.msra.gmra.mrb[124].mxu1 %vm1197_vm1, %v11435_v33  ;;  %v10258_v33 = vld [vmem:[%s11809_s2 + $0x60] sm:$0xff]  }
0x1b76   : > { %9498 = vmatpush3.bf16.msra.mxu0 %v10244_v60  ;;  %9520 = vmatpush3.bf16.msra.mxu1 %v10245_v12 }
0x1b77   : > { %9499 = vmatprep.subr.bf16.mxu0 %v10246_v61  ;;  %9521 = vmatprep.subr.bf16.mxu1 %v10247_v13  ;;  %v5702_v61 = vrot.slane %v11510_v51, %v11072_v20  ;;  %v5710_v13 = vrot.slane %v11510_v51, %v11075_v21 }
0x1b7a   : > { %9500 = vmatpush3.bf16.msra.mxu0 %v10248_v15  ;;  %9522 = vmatpush3.bf16.msra.mxu1 %v10249_v16  ;;  %v10276_v15 = vld [vmem:[%s11809_s2 + $0x100] sm:$0xff]  }
0x1b7b   : > { %9501 = vmatprep.subr.bf16.mxu0 %v10250_v17  ;;  %9523 = vmatprep.subr.bf16.mxu1 %v10251_v18  ;;  %v10277_v16 = vld [vmem:[%s11809_s2 + $0x180] sm:$0xff]  }
0x1b7e   : > { %9502 = vmatpush3.bf16.msra.mxu0 %v10252_v19  ;;  %9524 = vmatpush3.bf16.msra.mxu1 %v10253_v22  ;;  %v10278_v19 = vld [vmem:[%s11809_s2 + $0x148] sm:$0xff]  }
0x1b7f   : > { %9503 = vmatprep.subr.bf16.mxu0 %v10254_v23  ;;  %9525 = vmatprep.subr.bf16.mxu1 %v10255_v25  ;;  %v10279_v22 = vld [vmem:[%s11809_s2 + $0x1c8] sm:$0xff]  }
0x1b82   : > { %9504 = vmatpush3.bf16.msra.mxu0 %v10256_v28  ;;  %9526 = vmatpush3.bf16.msra.mxu1 %v10257_v32 }
0x1b83   : > { %9505 = vmatprep.subr.bf16.mxu0 %v10258_v33  ;;  %9527 = vmatprep.subr.bf16.mxu1 %v10259_v34 }
0x1b86   : > { %9506 = vmatpush3.bf16.msra.mxu0 %v10260_v36  ;;  %9528 = vmatpush3.bf16.msra.mxu1 %v10261_v37 }
0x1b87   : > { %9507 = vmatprep.subr.bf16.mxu0 %v10262_v38  ;;  %9529 = vmatprep.subr.bf16.mxu1 %v10263_v41  ;;  %v10280_v38 = vld [vmem:[%s11809_s2 + $0x108] sm:$0xff]  }
0x1b88   : > { %v10281_v41 = vld [vmem:[%s11809_s2 + $0x188] sm:$0xff]  }
0x1b8a   : > { %9508 = vmatpush3.bf16.msra.mxu0 %v10264_v42  ;;  %9530 = vmatpush3.bf16.msra.mxu1 %v10265_v43 }
0x1b8b   : > { %9509 = vmatprep.subr.bf16.mxu0 %v10266_v44  ;;  %9531 = vmatprep.subr.bf16.mxu1 %v10267_v45  ;;  %v10282_v44 = vld [vmem:[%s11809_s2 + $0x150] sm:$0xff]  }
0x1b8c   : > { %v10283_v45 = vld [vmem:[%s11809_s2 + $0x1d0] sm:$0xff]  }
0x1b8e   : > { %9510 = vmatpush3.bf16.msra.mxu0 %v10268_v46  ;;  %9532 = vmatpush3.bf16.msra.mxu1 %v10269_v1 }
0x1b8f   : > { %9511 = vmatprep.subr.bf16.mxu0 %v10270_v6  ;;  %9533 = vmatprep.subr.bf16.mxu1 %v10271_v47 }
0x1b92   : > { %9512 = vmatpush3.bf16.msra.mxu0 %v10272_v48  ;;  %9534 = vmatpush3.bf16.msra.mxu1 %v10273_v49  ;;  %v10284_v48 = vld [vmem:[%s11809_s2 + $0x110] sm:$0xff]  }
0x1b93   : > { %9541 = vmatprep.subr.bf16.mxu0 %v10274_v7  ;;  %9563 = vmatprep.subr.bf16.mxu1 %v10275_v27  ;;  %v10285_v49 = vld [vmem:[%s11809_s2 + $0x190] sm:$0xff]   ;;  %v10286_v7 = vld [vmem:[%s11809_s2 + $0x158] sm:$0xff]  }
0x1b94   : > { %v10287_v27 = vld [vmem:[%s11809_s2 + $0x1d8] sm:$0xff]  }
0x1c30   : > { %v5956_v50 = vpop.f32.mrb[112].mxu0  ;;  %v5997_v55 = vpop.f32.mrb[112].mxu1 }
0x1c31   : > { %v5957_v26 = vadd.f32 %v5956_v50, %v5682_v29  ;;  %v5998_v52 = vadd.f32 %v5997_v55, %v5690_v59  ;;  %v5958_v56 = vpop.f32.mrb[113].mxu0  ;;  %v5999_v39 = vpop.f32.mrb[113].mxu1 }
0x1c32   : > { %v5959_v40 = vadd.f32 %v5958_v56, %v5686_v53  ;;  %v6000_v5 = vadd.f32 %v5999_v39, %v5694_v54  ;;  %v5960_v57 = vpop.f32.mrb[114].mxu0  ;;  %v6001_v58 = vpop.f32.mrb[114].mxu1 }
0x1c33   : > { %v6250_v30 = vmax.f32 %v5957_v26, 0.0  ;;  %v6252_v31 = vmax.f32 %v5998_v52, 0.0  ;;  %v5961_v8 = vpop.f32.mrb[115].mxu0  ;;  %v6002_v9 = vpop.f32.mrb[115].mxu1  ;;  %v10288_v26 = vld [vmem:[%s11809_s2 + $0x118] sm:$0xff]   ;;  %v11549_v57 = vld [vmem:[%s11811_s3 + $0x8] sm:$0xff] }
0x1c34   : > { %v6251_v10 = vmax.f32 %v5959_v40, 0.0  ;;  %v6253_v11 = vmax.f32 %v6000_v5, 0.0  ;;  %v10289_v52 = vld [vmem:[%s11809_s2 + $0x198] sm:$0xff]   ;;  %v10290_v40 = vld [vmem:[%s11809_s2 + $0x160] sm:$0xff]   ;;  %v5738_v58 = vrot.slane %v11549_v57, %v11104_v14  ;;  %v10294_v8 = vld [vmem:[%s11809_s2 + $0x168] sm:$0xff]   ;;  %s11815_s3 = sld [smem:[#allocation5_spill]] }
0x1c35   : > { %v6266_v17 = vpack.c.bf16 %v6250_v30, %v6250_v30  ;;  %v6268_v18 = vpack.c.bf16 %v6252_v31, %v6252_v31  ;;  %v10291_v5 = vld [vmem:[%s11809_s2 + $0x1e0] sm:$0xff]   ;;  %v10295_v9 = vld [vmem:[%s11809_s2 + $0x1e8] sm:$0xff]  }
0x1c36   : > { %v6267_v60 = vpack.c.bf16 %v6251_v10, %v6251_v10  ;;  %v6269_v12 = vpack.c.bf16 %v6253_v11, %v6253_v11  ;;  %v10292_v30 = vld [vmem:[%s11809_s2 + $0x120] sm:$0xff]  }
0x1c37   : > { %v10293_v31 = vld [vmem:[%s11809_s2 + $0x1a0] sm:$0xff]  }
0x1c38   : > { %v11528_v23 = vpop.f32.mrb[116].mxu0  ;;  %v11530_v25 = vpop.f32.mrb[116].mxu1  ;;  %7345 = vmatprep.mubr.bf16.mxu0 %v6267_v60  ;;  %7385 = vmatprep.mubr.bf16.mxu1 %v6269_v12 }
0x1c39   : > { %v6040_v28 = vpop.f32.mrb[117].mxu0  ;;  %v6081_v32 = vpop.f32.mrb[117].mxu1  ;;  %7346 = vmatmul.mubr.bf16.vlgmr.msra.gmra.mrb[128].mxu0 %v6266_v17  ;;  %7386 = vmatmul.mubr.bf16.vlgmr.msra.gmra.mrb[128].mxu1 %v6268_v18  ;;  %v10297_v17 = vld [vmem:[%s11809_s2 + $0x1a8] sm:$0xff]   ;;  %v5698_v18 = vrot.slane %v11510_v51, %v11116_v24 }
0x1c3a   : > { %v6041_v33 = vadd.f32 %v6040_v28, %v5702_v61  ;;  %v6082_v34 = vadd.f32 %v6081_v32, %v5710_v13  ;;  %9542 = vmatpush3.bf16.msra.mxu0 %v10276_v15  ;;  %9564 = vmatpush3.bf16.msra.mxu1 %v10277_v16  ;;  %v6042_v36 = vpop.f32.mrb[118].mxu0  ;;  %v6083_v37 = vpop.f32.mrb[118].mxu1  ;;  %v10296_v16 = vld [vmem:[%s11809_s2 + $0x128] sm:$0xff]   ;;  %v10298_v32 = vld [vmem:[%s11809_s2 + $0x170] sm:$0xff]   ;;  %s1167_s5 = scalar_lea.vmem %s11815_s3, %s10772_s28  ;;  %s11817_s3 = sld [smem:[#allocation21_spill]] }
0x1c3b   : > { %v6043_v42 = vpop.f32.mrb[119].mxu0  ;;  %v6084_v43 = vpop.f32.mrb[119].mxu1  ;;  %9543 = vmatprep.subr.bf16.mxu0 %v10278_v19  ;;  %9565 = vmatprep.subr.bf16.mxu1 %v10279_v22  ;;  %v5706_v19 = vrot.slane %v11510_v51, %v11104_v14  ;;  %v5726_v36 = vrot.slane %v11549_v57, %v11061_v4  ;;  %v10300_v37 = vld [vmem:[%s11809_s2 + $0x130] sm:$0xff]   ;;  %v6039_v51 = vadd.f32 %v11528_v23, %v5698_v18  ;;  %v10304_v4 = vld [vmem:[%s11809_s2 + $0x138] sm:$0xff]   ;;  %v10306_v23 = vld [vmem:[%s11809_s2 + $0x240] sm:$0xff]  }
0x1c3c   : > { %v6255_v46 = vmax.f32 %v6041_v33, 0.0  ;;  %v6257_v1 = vmax.f32 %v6082_v34, 0.0  ;;  %v10299_v33 = vld [vmem:[%s11809_s2 + $0x1f0] sm:$0xff]   ;;  %v5718_v34 = vrot.slane %v11549_v57, %v11058_v3  ;;  %v10303_v42 = vld [vmem:[%s11809_s2 + $0x1f8] sm:$0xff]   ;;  %v10328_v18 = vld [vmem:[%s11809_s2 + $0x228] sm:$0xff]  }
0x1c3d   : > { %v10301_v14 = vld [vmem:[%s11809_s2 + $0x1b0] sm:$0xff]  }
0x1c3e   : > { %v6271_v6 = vpack.c.bf16 %v6255_v46, %v6255_v46  ;;  %v6273_v47 = vpack.c.bf16 %v6257_v1, %v6257_v1  ;;  %9544 = vmatpush3.bf16.msra.mxu0 %v10280_v38  ;;  %9566 = vmatpush3.bf16.msra.mxu1 %v10281_v41  ;;  %v6080_v38 = vadd.f32 %v11530_v25, %v5706_v19  ;;  %v10302_v41 = vld [vmem:[%s11809_s2 + $0x178] sm:$0xff]   ;;  %v6254_v46 = vmax.f32 %v6039_v51, 0.0  ;;  %v10307_v25 = vld [vmem:[%s11809_s2 + $0x2c0] sm:$0xff]   ;;  %v10333_v51 = vld [vmem:[%s11809_s2 + $0x2b0] sm:$0xff]  }
0x1c3f   : > { %9545 = vmatprep.subr.bf16.mxu0 %v10282_v44  ;;  %9567 = vmatprep.subr.bf16.mxu1 %v10283_v45  ;;  %v10305_v45 = vld [vmem:[%s11809_s2 + $0x1b8] sm:$0xff]   ;;  %v5714_v19 = vrot.slane %v11549_v57, %v11049_v63 }
0x1c40   : > { %v11540_v29 = vpop.f32.mrb[120].mxu0  ;;  %v11542_v59 = vpop.f32.mrb[120].mxu1  ;;  %7425 = vmatprep.mubr.bf16.mxu0 %v6271_v6  ;;  %7465 = vmatprep.mubr.bf16.mxu1 %v6273_v47  ;;  %v6256_v1 = vmax.f32 %v6080_v38, 0.0 }
0x1c41   : > { %v6122_v53 = vpop.f32.mrb[121].mxu0  ;;  %v6163_v54 = vpop.f32.mrb[121].mxu1 }
0x1c42   : > { %9546 = vmatpush3.bf16.msra.mxu0 %v10284_v48  ;;  %9568 = vmatpush3.bf16.msra.mxu1 %v10285_v49  ;;  %v6124_v50 = vpop.f32.mrb[122].mxu0  ;;  %v6165_v55 = vpop.f32.mrb[122].mxu1  ;;  %v6123_v43 = vadd.f32 %v6122_v53, %v5718_v34  ;;  %v6164_v44 = vadd.f32 %v6163_v54, %v5726_v36  ;;  %v10308_v48 = vld [vmem:[%s11809_s2 + $0x200] sm:$0xff]   ;;  %v6270_v49 = vpack.c.bf16 %v6254_v46, %v6254_v46  ;;  %v10310_v54 = vld [vmem:[%s11809_s2 + $0x248] sm:$0xff]  }
0x1c43   : > { %v6125_v56 = vpop.f32.mrb[123].mxu0  ;;  %v6166_v39 = vpop.f32.mrb[123].mxu1  ;;  %9547 = vmatprep.subr.bf16.mxu0 %v10286_v7  ;;  %9569 = vmatprep.subr.bf16.mxu1 %v10287_v27  ;;  %v6272_v7 = vpack.c.bf16 %v6256_v1, %v6256_v1  ;;  %v10309_v27 = vld [vmem:[%s11809_s2 + $0x280] sm:$0xff]   ;;  %v10311_v50 = vld [vmem:[%s11809_s2 + $0x2c8] sm:$0xff]   ;;  %v5734_v34 = vrot.slane %v11549_v57, %v11072_v20  ;;  %v5742_v36 = vrot.slane %v11549_v57, %v11075_v21 }
0x1c44   : > { %v6259_v6 = vmax.f32 %v6123_v43, 0.0  ;;  %v6261_v47 = vmax.f32 %v6164_v44, 0.0  ;;  %v10314_v56 = vld [vmem:[%s11809_s2 + $0x250] sm:$0xff]   ;;  %v10338_v44 = vld [vmem:[%s11809_s2 + $0x340] sm:$0xff]  }
0x1c45   : > { %v10315_v39 = vld [vmem:[%s11809_s2 + $0x2d0] sm:$0xff]  }
0x1c46   : > { %9548 = vmatpush3.bf16.msra.mxu0 %v10288_v26  ;;  %9570 = vmatpush3.bf16.msra.mxu1 %v10289_v52  ;;  %v6275_v53 = vpack.c.bf16 %v6259_v6, %v6259_v6  ;;  %v6277_v55 = vpack.c.bf16 %v6261_v47, %v6261_v47  ;;  %v10312_v26 = vld [vmem:[%s11809_s2 + $0x208] sm:$0xff]  }
0x1c47   : > { %9549 = vmatprep.subr.bf16.mxu0 %v10290_v40  ;;  %9571 = vmatprep.subr.bf16.mxu1 %v10291_v5  ;;  %v10313_v52 = vld [vmem:[%s11809_s2 + $0x288] sm:$0xff]   ;;  %v10316_v40 = vld [vmem:[%s11809_s2 + $0x210] sm:$0xff]  }
0x1c48   : > { %v11557_v10 = vpop.f32.mrb[124].mxu0  ;;  %v6243_v11 = vpop.f32.mrb[124].mxu1  ;;  %v10317_v5 = vld [vmem:[%s11809_s2 + $0x290] sm:$0xff]   ;;  %v10343_v47 = vld [vmem:[%s11809_s2 + $0x3c8] sm:$0xff]  }
0x1c49   : > { %v11559_v60 = vadd.f32 %v6243_v11, %v5738_v58  ;;  %v11561_v12 = vpop.f32.mrb[125].mxu0  ;;  %v11563_v61 = vpop.f32.mrb[125].mxu1  ;;  %v10318_v58 = vld [vmem:[%s11809_s2 + $0x258] sm:$0xff]   ;;  %v10323_v11 = vld [vmem:[%s11809_s2 + $0x2e0] sm:$0xff]  }
0x1c4a   : > { %9550 = vmatpush3.bf16.msra.mxu0 %v10292_v30  ;;  %9572 = vmatpush3.bf16.msra.mxu1 %v10293_v31  ;;  %v6206_v13 = vpop.f32.mrb[126].mxu0  ;;  %v6247_v15 = vpop.f32.mrb[126].mxu1  ;;  %v10319_v30 = vld [vmem:[%s11809_s2 + $0x2d8] sm:$0xff]   ;;  %v6205_v20 = vadd.f32 %v11561_v12, %v5734_v34  ;;  %v6246_v21 = vadd.f32 %v11563_v61, %v5742_v36  ;;  %v10340_v12 = vld [vmem:[%s11809_s2 + $0x300] sm:$0xff]  }
0x1c4b   : > { %v6207_v22 = vpop.f32.mrb[127].mxu0  ;;  %v6248_v28 = vpop.f32.mrb[127].mxu1  ;;  %9551 = vmatprep.subr.bf16.mxu0 %v10294_v8  ;;  %9573 = vmatprep.subr.bf16.mxu1 %v10295_v9  ;;  %v10320_v31 = vld [vmem:[%s11809_s2 + $0x218] sm:$0xff]   ;;  %v10322_v9 = vld [vmem:[%s11809_s2 + $0x260] sm:$0xff]  }
0x1c4c   : > { %v10321_v8 = vld [vmem:[%s11809_s2 + $0x298] sm:$0xff]   ;;  %v10324_v13 = vld [vmem:[%s11809_s2 + $0x220] sm:$0xff]   ;;  %v10329_v22 = vld [vmem:[%s11809_s2 + $0x2a8] sm:$0xff]   ;;  %v6265_v46 = vmax.f32 %v6246_v21, 0.0 }
0x1c4d   : > { %v10325_v15 = vld [vmem:[%s11809_s2 + $0x2a0] sm:$0xff]   ;;  %v10330_v28 = vld [vmem:[%s11809_s2 + $0x270] sm:$0xff]  }
0x1c4e   : > { %9552 = vmatpush3.bf16.msra.mxu0 %v10296_v16  ;;  %9574 = vmatpush3.bf16.msra.mxu1 %v10297_v17  ;;  %v10326_v16 = vld [vmem:[%s11809_s2 + $0x268] sm:$0xff]   ;;  %v10341_v61 = vld [vmem:[%s11809_s2 + $0x380] sm:$0xff]  }
0x1c4f   : > { %9553 = vmatprep.subr.bf16.mxu0 %v10298_v32  ;;  %9575 = vmatprep.subr.bf16.mxu1 %v10299_v33  ;;  %v10327_v17 = vld [vmem:[%s11809_s2 + $0x2e8] sm:$0xff]   ;;  %v5722_v32 = vrot.slane %v11549_v57, %v11052_v0  ;;  %v10331_v33 = vld [vmem:[%s11809_s2 + $0x2f0] sm:$0xff]   ;;  %v10334_v0 = vld [vmem:[%s11809_s2 + $0x278] sm:$0xff]  }
0x1c51   : > { %v6162_v38 = vadd.f32 %v11542_v59, %v5722_v32  ;;  %v10339_v59 = vld [vmem:[%s11809_s2 + $0x3c0] sm:$0xff]   ;;  %v6264_v32 = vmax.f32 %v11559_v60, 0.0 }
0x1c52   : > { %9554 = vmatpush3.bf16.msra.mxu0 %v10300_v37  ;;  %9576 = vmatpush3.bf16.msra.mxu1 %v10301_v14  ;;  %v10332_v37 = vld [vmem:[%s11809_s2 + $0x230] sm:$0xff]   ;;  %v6121_v14 = vadd.f32 %v11540_v29, %v5714_v19  ;;  %v10337_v29 = vld [vmem:[%s11809_s2 + $0x2b8] sm:$0xff]  }
0x1c53   : > { %9555 = vmatprep.subr.bf16.mxu0 %v10302_v41  ;;  %9577 = vmatprep.subr.bf16.mxu1 %v10303_v42  ;;  %v10335_v41 = vld [vmem:[%s11809_s2 + $0x2f8] sm:$0xff]  }
0x1c54   : > { %v10336_v42 = vld [vmem:[%s11809_s2 + $0x238] sm:$0xff]   ;;  %v6258_v43 = vmax.f32 %v6121_v14, 0.0 }
0x1c55   : > { %v10366_v19 = vld [vmem:[%s11809_s2 + $0x378] sm:$0xff]  }
0x1c56   : > { %9556 = vmatpush3.bf16.msra.mxu0 %v10304_v4  ;;  %9578 = vmatpush3.bf16.msra.mxu1 %v10305_v45  ;;  %v6260_v4 = vmax.f32 %v6162_v38, 0.0  ;;  %v6263_v45 = vmax.f32 %v6205_v20, 0.0  ;;  %v6274_v1 = vpack.c.bf16 %v6258_v43, %v6258_v43 }
0x1c57   : > { %9585 = vmatprep.subr.bf16.mxu0 %v10306_v23  ;;  %9607 = vmatprep.subr.bf16.mxu1 %v10307_v25  ;;  %v10342_v25 = vld [vmem:[%s11809_s2 + $0x348] sm:$0xff]  }
0x1c58   : > { %v6276_v23 = vpack.c.bf16 %v6260_v4, %v6260_v4  ;;  %v6279_v6 = vpack.c.bf16 %v6263_v45, %v6263_v45 }
0x1c59   : > { %7426 = vmatmul.mubr.bf16.vlgmr.msra.gmra.mrb[132].mxu0 %v6270_v49  ;;  %7466 = vmatmul.mubr.bf16.vlgmr.msra.gmra.mrb[132].mxu1 %v6272_v7  ;;  %v10344_v49 = vld [vmem:[%s11809_s2 + $0x308] sm:$0xff]  }
0x1c5a   : > { %9586 = vmatpush3.bf16.msra.mxu0 %v10308_v48  ;;  %7505 = vmatprep.mubr.bf16.mxu0 %v6275_v53  ;;  %v6281_v48 = vpack.c.bf16 %v6265_v46, %v6265_v46  ;;  %v10345_v7 = vld [vmem:[%s11809_s2 + $0x388] sm:$0xff]   ;;  %v10347_v53 = vld [vmem:[%s11809_s2 + $0x3d0] sm:$0xff]  }
0x1c5b   : > { %9608 = vmatpush3.bf16.msra.mxu1 %v10309_v27  ;;  %7545 = vmatprep.mubr.bf16.mxu1 %v6277_v55  ;;  %v10346_v27 = vld [vmem:[%s11809_s2 + $0x350] sm:$0xff]   ;;  %v10350_v55 = vld [vmem:[%s11809_s2 + $0x358] sm:$0xff]  }
0x1c5c   : > { %9587 = vmatprep.subr.bf16.mxu0 %v10310_v54  ;;  %9609 = vmatprep.subr.bf16.mxu1 %v10311_v50  ;;  %v10348_v54 = vld [vmem:[%s11809_s2 + $0x310] sm:$0xff]  }
0x1c5d   : > { %v10349_v50 = vld [vmem:[%s11809_s2 + $0x390] sm:$0xff]  }
0x1c5e   : > { %9588 = vmatpush3.bf16.msra.mxu0 %v10312_v26  ;;  %v10351_v26 = vld [vmem:[%s11809_s2 + $0x3d8] sm:$0xff]  }
0x1c5f   : > { %9610 = vmatpush3.bf16.msra.mxu1 %v10313_v52  ;;  %9589 = vmatprep.subr.bf16.mxu0 %v10314_v56  ;;  %v10352_v52 = vld [vmem:[%s11809_s2 + $0x318] sm:$0xff]  }
0x1c60   : > { %9611 = vmatprep.subr.bf16.mxu1 %v10315_v39  ;;  %v10353_v56 = vld [vmem:[%s11809_s2 + $0x398] sm:$0xff]   ;;  %v10354_v39 = vld [vmem:[%s11809_s2 + $0x360] sm:$0xff]  }
0x1c62   : > { %9590 = vmatpush3.bf16.msra.mxu0 %v10316_v40  ;;  %v10355_v40 = vld [vmem:[%s11809_s2 + $0x3e0] sm:$0xff]  }
0x1c63   : > { %9612 = vmatpush3.bf16.msra.mxu1 %v10317_v5  ;;  %9591 = vmatprep.subr.bf16.mxu0 %v10318_v58  ;;  %v10356_v5 = vld [vmem:[%s11809_s2 + $0x320] sm:$0xff]  }
0x1c64   : > { %9613 = vmatprep.subr.bf16.mxu1 %v10319_v30  ;;  %v10357_v58 = vld [vmem:[%s11809_s2 + $0x3a0] sm:$0xff]   ;;  %v10358_v30 = vld [vmem:[%s11809_s2 + $0x368] sm:$0xff]  }
0x1c66   : > { %9592 = vmatpush3.bf16.msra.mxu0 %v10320_v31  ;;  %v10359_v31 = vld [vmem:[%s11809_s2 + $0x3e8] sm:$0xff]  }
0x1c67   : > { %9614 = vmatpush3.bf16.msra.mxu1 %v10321_v8  ;;  %9593 = vmatprep.subr.bf16.mxu0 %v10322_v9  ;;  %v10360_v8 = vld [vmem:[%s11809_s2 + $0x328] sm:$0xff]   ;;  %v5730_v9 = vrot.slane %v11549_v57, %v11116_v24  ;;  %v10368_v24 = vld [vmem:[%s11809_s2 + $0x338] sm:$0xff]  }
0x1c68   : > { %9615 = vmatprep.subr.bf16.mxu1 %v10323_v11  ;;  %v10361_v11 = vld [vmem:[%s11809_s2 + $0x3a8] sm:$0xff]  }
0x1c6a   : > { %9594 = vmatpush3.bf16.msra.mxu0 %v10324_v13  ;;  %v10362_v13 = vld [vmem:[%s11809_s2 + $0x370] sm:$0xff]  }
0x1c6b   : > { %9616 = vmatpush3.bf16.msra.mxu1 %v10325_v15  ;;  %9595 = vmatprep.subr.bf16.mxu0 %v10326_v16  ;;  %v10363_v15 = vld [vmem:[%s11809_s2 + $0x3f0] sm:$0xff]  }
0x1c6c   : > { %9617 = vmatprep.subr.bf16.mxu1 %v10327_v17  ;;  %v10364_v16 = vld [vmem:[%s11809_s2 + $0x330] sm:$0xff]   ;;  %v6203_v17 = vadd.f32 %v11557_v10, %v5730_v9  ;;  %v6280_v10 = vpack.c.bf16 %v6264_v32, %v6264_v32 }
0x1c6e   : > { %9596 = vmatpush3.bf16.msra.mxu0 %v10328_v18  ;;  %v10365_v18 = vld [vmem:[%s11809_s2 + $0x3b0] sm:$0xff]   ;;  %v6262_v57 = vmax.f32 %v6203_v17, 0.0 }
0x1c6f   : > { %9618 = vmatpush3.bf16.msra.mxu1 %v10329_v22  ;;  %9597 = vmatprep.subr.bf16.mxu0 %v10330_v28  ;;  %v10367_v22 = vld [vmem:[%s11809_s2 + $0x3f8] sm:$0xff]  }
0x1c70   : > { %9619 = vmatprep.subr.bf16.mxu1 %v10331_v33  ;;  %v10369_v28 = vld [vmem:[%s11809_s2 + $0x3b8] sm:$0xff]   ;;  %v6278_v33 = vpack.c.bf16 %v6262_v57, %v6262_v57  ;;  %s11814_s2 = sld [smem:[#allocation22_spill]] }
0x1c72   : > { %9598 = vmatpush3.bf16.msra.mxu0 %v10332_v37  ;;  %v9009_v37 = vld [vmem:[%s11812_s15] ss:$0 sm:$0xff]  ;;  %s11813_s15 = sld [smem:[#allocation23_spill]] }
0x1c73   : > { %9620 = vmatpush3.bf16.msra.mxu1 %v10333_v51  ;;  %9599 = vmatprep.subr.bf16.mxu0 %v10334_v0 }
0x1c74   : > { %9621 = vmatprep.subr.bf16.mxu1 %v10335_v41 }
0x1c76   : > { %9600 = vmatpush3.bf16.msra.mxu0 %v10336_v42 }
0x1c77   : > { %9622 = vmatpush3.bf16.msra.mxu1 %v10337_v29  ;;  %9629 = vmatprep.subr.bf16.mxu0 %v10338_v44 }
0x1c78   : > { %9651 = vmatprep.subr.bf16.mxu1 %v10339_v59  ;;  %v9145_v32 = vld.sshfl [vmem:[%s11813_s15] sm:$0x33 pattern:$0x76325410]  ;;  %s11816_s15 = sld [smem:[#allocation20_spill]] }
0x1c79   : > { %7506 = vmatmul.mubr.bf16.vlgmr.msra.gmra.mrb[136].mxu0 %v6274_v1 }
0x1c7a   : > { %7546 = vmatmul.mubr.bf16.vlgmr.msra.gmra.mrb[136].mxu1 %v6276_v23  ;;  %9630 = vmatpush3.bf16.msra.mxu0 %v10340_v12 }
0x1c7b   : > { %7585 = vmatprep.mubr.bf16.mxu0 %v6279_v6  ;;  %9652 = vmatpush3.bf16.msra.mxu1 %v10341_v61 }
0x1c7c   : > { %7625 = vmatprep.mubr.bf16.mxu1 %v6281_v48  ;;  %9631 = vmatprep.subr.bf16.mxu0 %v10342_v25 }
0x1c7d   : > { %9653 = vmatprep.subr.bf16.mxu1 %v10343_v47 }
0x1c7e   : > { %9632 = vmatpush3.bf16.msra.mxu0 %v10344_v49 }
0x1c7f   : > { %9654 = vmatpush3.bf16.msra.mxu1 %v10345_v7  ;;  %9633 = vmatprep.subr.bf16.mxu0 %v10346_v27 }
0x1c80   : > { %9655 = vmatprep.subr.bf16.mxu1 %v10347_v53 }
0x1c82   : > { %9634 = vmatpush3.bf16.msra.mxu0 %v10348_v54 }
0x1c83   : > { %9656 = vmatpush3.bf16.msra.mxu1 %v10349_v50  ;;  %9635 = vmatprep.subr.bf16.mxu0 %v10350_v55 }
0x1c84   : > { %9657 = vmatprep.subr.bf16.mxu1 %v10351_v26 }
0x1c86   : > { %9636 = vmatpush3.bf16.msra.mxu0 %v10352_v52 }
0x1c87   : > { %9658 = vmatpush3.bf16.msra.mxu1 %v10353_v56  ;;  %9637 = vmatprep.subr.bf16.mxu0 %v10354_v39 }
0x1c88   : > { %9659 = vmatprep.subr.bf16.mxu1 %v10355_v40 }
0x1c8a   : > { %9638 = vmatpush3.bf16.msra.mxu0 %v10356_v5 }
0x1c8b   : > { %9660 = vmatpush3.bf16.msra.mxu1 %v10357_v58  ;;  %9639 = vmatprep.subr.bf16.mxu0 %v10358_v30 }
0x1c8c   : > { %9661 = vmatprep.subr.bf16.mxu1 %v10359_v31 }
0x1c8e   : > { %9640 = vmatpush3.bf16.msra.mxu0 %v10360_v8 }
0x1c8f   : > { %9662 = vmatpush3.bf16.msra.mxu1 %v10361_v11  ;;  %9641 = vmatprep.subr.bf16.mxu0 %v10362_v13 }
0x1c90   : > { %9663 = vmatprep.subr.bf16.mxu1 %v10363_v15 }
0x1c92   : > { %9642 = vmatpush3.bf16.msra.mxu0 %v10364_v16 }
0x1c93   : > { %9664 = vmatpush3.bf16.msra.mxu1 %v10365_v18  ;;  %9643 = vmatprep.subr.bf16.mxu0 %v10366_v19 }
0x1c94   : > { %9665 = vmatprep.subr.bf16.mxu1 %v10367_v22 }
0x1c96   : > { %9644 = vmatpush3.bf16.msra.mxu0 %v10368_v24 }
0x1c97   : > { %9666 = vmatpush3.bf16.msra.mxu1 %v10369_v28 }
0x1c99   : > { %7586 = vmatmul.mubr.bf16.vlgmr.msra.gmra.mrb[140].mxu0 %v6278_v33  ;;  %v7743_v33 = vcombine.high %v9145_v32, %v9145_v32 }
0x1c9a   : > { %7626 = vmatmul.mubr.bf16.vlgmr.msra.gmra.mrb[140].mxu1 %v6280_v10  ;;  %7726 = vmatprep.mubr.bf16.mxu0 %v10531_v35 }
0x1c9b   : > { %7790 = vmatprep.mubr.bf16.mxu1 %v10531_v35 }
0x1d0c   : > { %v9513_v34 = vpop.f32.mrb[128].mxu0  ;;  %v9535_v36 = vpop.f32.mrb[128].mxu1 }
0x1d0d   : > { %v9514_v14 = vpop.f32.mrb[129].mxu0  ;;  %v9536_v51 = vpop.f32.mrb[129].mxu1 }
0x1d0e   : > { %v9515_v0 = vadd.f32 %v9514_v14, %v9513_v34  ;;  %v9537_v38 = vadd.f32 %v9536_v51, %v9535_v36  ;;  %v9516_v41 = vpop.f32.mrb[130].mxu0  ;;  %v9538_v60 = vpop.f32.mrb[130].mxu1  ;;  %v10372_v14 = vld [vmem:[%s11814_s2 + $0x4] ss:$8 sps:$4 sm:$0xff]   ;;  %v10370_v51 = vld [vmem:[%s11814_s2] ss:$8 sps:$4 sm:$0xff]  }
0x1d0f   : > { %v9517_v20 = vpop.f32.mrb[131].mxu0  ;;  %v9539_v21 = vpop.f32.mrb[131].mxu1  ;;  %7694 = vmatprep.subr.bf16.mxu0 %v10372_v14  ;;  %v10373_v41 = vld [vmem:[%s11814_s2 + $0x40] ss:$8 sps:$4 sm:$0xff]   ;;  %v10375_v60 = vld [vmem:[%s11814_s2 + $0x44] ss:$8 sps:$4 sm:$0xff]  }
0x1d10   : > { %v7348_v42 = vadd.f32 %v9515_v0, %v9009_v37  ;;  %v7663_v0 = vld [vmem:[%s1167_s5] sm:$0x1]  ;;  %7695 = vmatpush1.bf16.msra.mxu0 %v10370_v51  ;;  %v10376_v20 = vld [vmem:[%s11814_s2 + $0x10] ss:$8 sps:$4 sm:$0xff]   ;;  %v10378_v21 = vld [vmem:[%s11814_s2 + $0x14] ss:$8 sps:$4 sm:$0xff]  }
0x1d11   : > { %7696 = vmatprep.subr.bf16.mxu0 %v10378_v21  ;;  %s11818_s5 = sld [smem:[#allocation25_spill]]  ;;  %v10422_v14 = vld [vmem:[%s10716_s20] sm:$0xff]   ;;  %v10423_v51 = vld [vmem:[%s10716_s20 + $0x8] sm:$0xff]  }
0x1d12   : > { %v7388_v43 = vadd.f32 %v9537_v38, %v7348_v42  ;;  %v7664_v38 = vpack.c.bf16 %v7663_v0, %v7663_v0  ;;  %v10381_v42 = vld [vmem:[%s11814_s2 + $0x54] ss:$8 sps:$4 sm:$0xff]  }
0x1d14   : > { %7697 = vmatpush1.bf16.msra.mxu0 %v10376_v20 }
0x1d2c   : > { %v9557_v29 = vpop.f32.mrb[132].mxu0  ;;  %v9579_v44 = vpop.f32.mrb[132].mxu1 }
0x1d2d   : > { %v9558_v4 = vpop.f32.mrb[133].mxu0  ;;  %v9580_v59 = vpop.f32.mrb[133].mxu1 }
0x1d2e   : > { %v9559_v45 = vadd.f32 %v9558_v4, %v9557_v29  ;;  %v9581_v46 = vadd.f32 %v9580_v59, %v9579_v44  ;;  %v9560_v12 = vpop.f32.mrb[134].mxu0  ;;  %v9582_v1 = vpop.f32.mrb[134].mxu1  ;;  %v10384_v29 = vld [vmem:[%s11814_s2 + $0x24] ss:$8 sps:$4 sm:$0xff]  }
0x1d2f   : > { %v9561_v61 = vpop.f32.mrb[135].mxu0  ;;  %v9583_v23 = vpop.f32.mrb[135].mxu1  ;;  %7829 = vmatprep.subr.bf16.mxu0 %v10384_v29  ;;  %v10387_v44 = vld [vmem:[%s11814_s2 + $0x84] ss:$8 sps:$4 sm:$0xff]   ;;  %v9138_v12 = vld [vmem:[%s11816_s15] ss:$0 sm:$0xff] }
0x1d30   : > { %v7428_v25 = vadd.f32 %v9559_v45, %v7388_v43  ;;  %v10379_v43 = vld [vmem:[%s11814_s2 + $0x50] ss:$8 sps:$4 sm:$0xff]   ;;  %v9139_v61 = vld [vmem:[%s11817_s3] ss:$0 sm:$0xff]  ;;  %s11819_s15 = sld [smem:[#allocation24_spill]]  ;;  %s11820_s3 = sld [smem:[#allocation26_spill]] }
0x1d32   : > { %v7468_v6 = vadd.f32 %v9581_v46, %v7428_v25 }
0x1d4c   : > { %v9601_v47 = vpop.f32.mrb[136].mxu0 }
0x1d4d   : > { %v9623_v48 = vpop.f32.mrb[136].mxu1  ;;  %v9602_v49 = vpop.f32.mrb[137].mxu0 }
0x1d4e   : > { %v9603_v7 = vadd.f32 %v9602_v49, %v9601_v47  ;;  %v9624_v27 = vpop.f32.mrb[137].mxu1  ;;  %v9604_v53 = vpop.f32.mrb[138].mxu0  ;;  %v10385_v49 = vld [vmem:[%s11814_s2 + $0x80] ss:$8 sps:$4 sm:$0xff]  }
0x1d4f   : > { %v9625_v54 = vadd.f32 %v9624_v27, %v9623_v48  ;;  %v9626_v50 = vpop.f32.mrb[138].mxu1  ;;  %v9605_v55 = vpop.f32.mrb[139].mxu0  ;;  %v10390_v48 = vld [vmem:[%s11814_s2 + $0x34] ss:$8 sps:$4 sm:$0xff]   ;;  %v10388_v53 = vld [vmem:[%s11814_s2 + $0x30] ss:$8 sps:$4 sm:$0xff]  }
0x1d50   : > { %v7508_v26 = vadd.f32 %v9603_v7, %v7468_v6  ;;  %v9627_v52 = vpop.f32.mrb[139].mxu1  ;;  %v10382_v6 = vld [vmem:[%s11814_s2 + $0x20] ss:$8 sps:$4 sm:$0xff]   ;;  %v10393_v27 = vld [vmem:[%s11814_s2 + $0x94] ss:$8 sps:$4 sm:$0xff]  }
0x1d51   : > { %v10391_v50 = vld [vmem:[%s11814_s2 + $0x90] ss:$8 sps:$4 sm:$0xff]   ;;  %v10394_v55 = vld [vmem:[%s11814_s2 + $0x60] ss:$8 sps:$4 sm:$0xff]   ;;  %v10399_v52 = vld [vmem:[%s11814_s2 + $0x74] ss:$8 sps:$4 sm:$0xff]  }
0x1d52   : > { %v7548_v56 = vadd.f32 %v9625_v54, %v7508_v26  ;;  %v10396_v54 = vld [vmem:[%s11814_s2 + $0x64] ss:$8 sps:$4 sm:$0xff]  }
0x1d6c   : > { %v9645_v39 = vpop.f32.mrb[140].mxu0 }
0x1d6d   : > { %v9667_v40 = vpop.f32.mrb[140].mxu1  ;;  %v9646_v5 = vpop.f32.mrb[141].mxu0 }
0x1d6e   : > { %v9647_v58 = vadd.f32 %v9646_v5, %v9645_v39  ;;  %v9668_v30 = vpop.f32.mrb[141].mxu1  ;;  %v9648_v31 = vpop.f32.mrb[142].mxu0  ;;  %v10397_v39 = vld [vmem:[%s11814_s2 + $0x70] ss:$8 sps:$4 sm:$0xff]   ;;  %v10400_v5 = vld [vmem:[%s11814_s2 + $0xa0] ss:$8 sps:$4 sm:$0xff]  }
0x1d6f   : > { %v9669_v8 = vadd.f32 %v9668_v30, %v9667_v40  ;;  %v9670_v9 = vpop.f32.mrb[142].mxu1  ;;  %v9649_v11 = vpop.f32.mrb[143].mxu0  ;;  %v10402_v40 = vld [vmem:[%s11814_s2 + $0xa4] ss:$8 sps:$4 sm:$0xff]   ;;  %v10405_v30 = vld [vmem:[%s11814_s2 + $0xb4] ss:$8 sps:$4 sm:$0xff]  }
0x1d70   : > { %v7588_v13 = vadd.f32 %v9647_v58, %v7548_v56  ;;  %v9671_v15 = vpop.f32.mrb[143].mxu1  ;;  %v10403_v31 = vld [vmem:[%s11814_s2 + $0xb0] ss:$8 sps:$4 sm:$0xff]  }
0x1d72   : > { %v7628_v16 = vadd.f32 %v9669_v8, %v7588_v13 }
0x1d74   : > { %v7633_v17 = vadd.f32 %v7628_v16, %v11431_v62  ;;  %v10532_v62 = vmov 65535   ;;  %v10407_v16 = vld [vmem:[%s11818_s5] sm:$0xff]  }
0x1d75   : > { %v7750_v10 = vsel %vm7748_vm7, 4294967295, %v10532_v62  ;;  %v10417_v62 = vld [vmem:[%s11818_s5 + $0x28] sm:$0xff]  }
0x1d76   : > { %v7636_v18 = vsel %vm2371_vm6, %v7633_v17, 0.0  ;;  %v7751_v34 = vsel %vm7749_vm8, %v7750_v10, 0  ;;  %v10418_v10 = vld [vmem:[%s11818_s5 + $0x70] sm:$0xff]  }
0x1d77   : > { %7637 = vadd.xlane.f32.xlu0 %v7636_v18  ;;  %v7756_v36 = vand.u32 %v7751_v34, %v7743_v33  ;;  %v7753_v37 = vand.u32 %v9145_v32, %v7751_v34  ;;  %v10409_v18 = vld [vmem:[%s11818_s5 + $0x8] sm:$0xff]   ;;  %v10415_v32 = vld [vmem:[%s11818_s5 + $0x20] sm:$0xff]   ;;  %v10419_v34 = vld [vmem:[%s11818_s5 + $0x30] sm:$0xff]  }
0x1d78   : > { %v10416_v33 = vld [vmem:[%s11818_s5 + $0x68] sm:$0xff]  }
0x1d79   : > { %7758 = vmatprep.subr.bf16.mxu1 %v7756_v36  ;;  %v10420_v36 = vld [vmem:[%s11818_s5 + $0x78] sm:$0xff]  }
0x1d7a   : > { %7759 = vmatpush1.bf16.msra.mxu1 %v7753_v37  ;;  %v10421_v37 = vld [vmem:[%s11818_s5 + $0x38] sm:$0xff]  }
0x1d7b   : > { %7902 = vmatprep.subr.bf16.mxu1 %v10375_v60 }
0x1d7d   : > { %9146 = vmatmul.mubr.msk.bf16.vlgmr.msra.gmra.mrb[144].mxu1 %vm7744_vm9, %v7664_v38 }
0x1d7e   : > { %7903 = vmatpush1.bf16.msra.mxu1 %v10373_v41  ;;  %7934 = vmatprep.mubr.bf16.mxu1 %v10531_v35 }
0x1d7f   : > { %7904 = vmatprep.subr.bf16.mxu1 %v10381_v42 }
0x1d82   : > { %7905 = vmatpush1.bf16.msra.mxu1 %v10379_v43 }
0x1d83   : > { %8046 = vmatprep.subr.bf16.mxu1 %v10387_v44 }
0x1e04   : > { %v7638_v19 = vpop.xlane.xlu0 %7637 }
0x1e05   : > { %v7639_v22 = vmul.f32 0.03125, %v7638_v19  ;;  %v10410_v19 = vld [vmem:[%s11818_s5 + $0x50] sm:$0xff]  }
0x1e07   : > { %v7640_v24 = vsub.f32 %v7633_v17, %v7639_v22  ;;  %v10408_v17 = vld [vmem:[%s11818_s5 + $0x48] sm:$0xff]   ;;  %v10411_v22 = vld [vmem:[%s11818_s5 + $0x10] sm:$0xff]  }
0x1e09   : > { %v7641_v57 = vmul.f32 %v7640_v24, %v7640_v24 }
0x1e0b   : > { %v7642_v28 = vsel %vm2371_vm6, %v7641_v57, 0.0  ;;  %v10413_v57 = vld [vmem:[%s11818_s5 + $0x18] sm:$0xff]  }
0x1e0c   : > { %7643 = vadd.xlane.f32.xlu1 %v7642_v28  ;;  %v10414_v28 = vld [vmem:[%s11818_s5 + $0x60] sm:$0xff]  }
0x1e50   : > { %v7792_v9 = vpop.f32.mrb[144].mxu1 }
0x1e51   : > { %v7794_v11 = vpop.f32.mrb[145].mxu1 }
0x1e52   : > { %v7796_v13 = vpop.f32.mrb[146].mxu1 }
0x1e53   : > { %v7797_v15 = vpop.f32.mrb[147].mxu1 }
0x1e99   : > { %v7644_v4 = vpop.xlane.xlu1 %7643 }
0x1e9a   : > { %v7645_v59 = vmul.f32 0.03125, %v7644_v4 }
0x1e9c   : > { %v7646_v45 = vadd.f32 1e-05, %v7645_v59 }
0x1e9e   : > { %10464 = vrsqrt.f32 %v7646_v45 }
0x1ea8   : > { %v10465_v46 = vpop.eup %10464 }
0x1ea9   : > { %v7648_v1 = vmul.f32 %v10465_v46, %v7640_v24  ;;  %v10412_v24 = vld [vmem:[%s11818_s5 + $0x58] sm:$0xff]  }
0x1eab   : > { %v7655_v23 = vmul.f32 %v9138_v12, %v7648_v1 }
0x1ead   : > { %v7662_v25 = vadd.f32 %v9139_v61, %v7655_v23 }
0x1eaf   : > { %v7666_v47 = vpack.c.bf16 %v7662_v25, %v7662_v25 }
0x1eb1   : > { %9144 = vmatmul.mubr.msk.bf16.vlgmr.msra.gmra.mrb[144].mxu0 %vm1197_vm1, %v7666_v47  ;;  %v7878_v7 = vrot.slane %v7666_v47, 1  ;;  %v7804_v26 = vshrl.u32 %v7666_v47, 16  ;;  %v8022_v56 = vrot.slane %v7666_v47, 2 }
0x1eb2   : > { %7830 = vmatpush1.bf16.msra.mxu0 %v10382_v6  ;;  %7861 = vmatprep.mubr.bf16.mxu0 %v10531_v35 }
0x1eb3   : > { %9164 = vmatmul.mubr.msk.bf16.vlgmr.msra.gmra.mrb[148].mxu1 %vm1197_vm1, %v7878_v7  ;;  %7831 = vmatprep.subr.bf16.mxu0 %v10390_v48  ;;  %v7950_v58 = vrot.slane %v7804_v26, 1  ;;  %v8094_v8 = vrot.slane %v7804_v26, 2 }
0x1eb4   : > { %8047 = vmatpush1.bf16.msra.mxu1 %v10385_v49  ;;  %8078 = vmatprep.mubr.bf16.mxu1 %v10531_v35 }
0x1eb5   : > { %8048 = vmatprep.subr.bf16.mxu1 %v10393_v27 }
0x1eb6   : > { %7832 = vmatpush1.bf16.msra.mxu0 %v10388_v53 }
0x1eb7   : > { %7974 = vmatprep.subr.bf16.mxu0 %v10396_v54 }
0x1eb8   : > { %8049 = vmatpush1.bf16.msra.mxu1 %v10391_v50 }
0x1eb9   : > { %9155 = vmatmul.mubr.msk.bf16.vlgmr.msra.gmra.mrb[148].mxu0 %vm1197_vm1, %v7804_v26  ;;  %v8161_v26 = vld [vmem:[%s11819_s15] sm:$0x3]  ;;  %s1170_s15 = scalar_lea.vmem %s10724_s4, %s10772_s28 }
0x1eba   : > { %7975 = vmatpush1.bf16.msra.mxu0 %v10394_v55  ;;  %8006 = vmatprep.mubr.bf16.mxu0 %v10531_v35 }
0x1ebb   : > { %9182 = vmatmul.mubr.msk.bf16.vlgmr.msra.gmra.mrb[152].mxu1 %vm1197_vm1, %v8022_v56  ;;  %7976 = vmatprep.subr.bf16.mxu0 %v10399_v52  ;;  %v8166_v56 = vrot.slane %v8161_v26, %v11049_v63  ;;  %v10424_v63 = vld [vmem:[%s10716_s20 + $0x10] sm:$0xff]  }
0x1ebe   : > { %7977 = vmatpush1.bf16.msra.mxu0 %v10397_v39 }
0x1ebf   : > { %8118 = vmatprep.subr.bf16.mxu0 %v10402_v40  ;;  %v8170_v40 = vrot.slane %v8161_v26, %v11058_v3  ;;  %v10425_v3 = vld [vmem:[%s10716_s20 + $0x18] sm:$0xff]  }
0x1ec1   : > { %9173 = vmatmul.mubr.msk.bf16.vlgmr.msra.gmra.mrb[152].mxu0 %vm1197_vm1, %v7950_v58 }
0x1ec2   : > { %8119 = vmatpush1.bf16.msra.mxu0 %v10400_v5  ;;  %8150 = vmatprep.mubr.bf16.mxu0 %v10531_v35  ;;  %v10406_v35 = vld [vmem:[%s11818_s5 + $0x40] sm:$0xff]  }
0x1ec3   : > { %8120 = vmatprep.subr.bf16.mxu0 %v10405_v30  ;;  %9673 = vmatprep.subr.bf16.mxu1 %v10406_v35 }
0x1ec4   : > { %9674 = vmatpush3.bf16.msra.mxu1 %v10407_v16 }
0x1ec5   : > { %9675 = vmatprep.subr.bf16.mxu1 %v10408_v17 }
0x1ec6   : > { %8121 = vmatpush1.bf16.msra.mxu0 %v10403_v31 }
0x1ec7   : > { %9988 = vmatprep.subr.bf16.mxu0 %v10529_v2 }
0x1ec8   : > { %9676 = vmatpush3.bf16.msra.mxu1 %v10409_v18  ;;  %v8211_v18 = vld [vmem:[%s11820_s3] sm:$0x1]  ;;  %s9214_s3 = sshll.u32 (%p10756_p4), %s10744_s0, 3 }
0x1ec9   : > { %9191 = vmatmul.mubr.msk.bf16.vlgmr.msra.gmra.mrb[156].mxu0 %vm1197_vm1, %v8094_v8  ;;  %9677 = vmatprep.subr.bf16.mxu1 %v10410_v19  ;;  %s8443_s2 = scalar_lea.vmem (%p10756_p4), %s10729_s9, %s9214_s3 }
0x1eca   : > { %9996 = vmatprep.mubr.msk.bf16.mxu0 %vm10530_vm0, %v10529_v2  ;;  %9989 = vmatpush3.bf16.msra.mxu0 %v10422_v14  ;;  %v8473_v14 = vld [vmem:[%s10940_s18] sm:$0xff] (%p10756_p4) }
0x1ecb   : > { %9990 = vmatprep.subr.bf16.mxu0 %v10529_v2  ;;  %8474 = vst [vmem:[%s8443_s2] sm:$0xff] (%p10756_p4), %v8473_v14 }
0x1ecc   : > { %9678 = vmatpush3.bf16.msra.mxu1 %v10411_v22 }
0x1ecd   : > { %9679 = vmatprep.subr.bf16.mxu1 %v10412_v24 }
0x1ece   : > { %9991 = vmatpush3.bf16.msra.mxu0 %v10423_v51  ;;  %v8475_v51 = vld [vmem:[%s10940_s18 + $0x8] sm:$0xff] (%p10756_p4) }
0x1ecf   : > { %9992 = vmatprep.subr.bf16.mxu0 %v10529_v2  ;;  %8476 = vst [vmem:[%s8443_s2 + $0x20] sm:$0xff] (%p10756_p4), %v8475_v51 }
0x1ed0   : > { %9680 = vmatpush3.bf16.msra.mxu1 %v10413_v57 }
0x1ed1   : > { %9681 = vmatprep.subr.bf16.mxu1 %v10414_v28 }
0x1ed2   : > { %9993 = vmatpush3.bf16.msra.mxu0 %v10424_v63 }
0x1ed3   : > { %9994 = vmatprep.subr.bf16.mxu0 %v10529_v2 }
0x1ed4   : > { %9682 = vmatpush3.bf16.msra.mxu1 %v10415_v32 }
0x1ed5   : > { %9683 = vmatprep.subr.bf16.mxu1 %v10416_v33 }
0x1ed6   : > { %9995 = vmatpush3.bf16.msra.mxu0 %v10425_v3 }
0x1ed8   : > { %9684 = vmatpush3.bf16.msra.mxu1 %v10417_v62  ;;  %v8358_v62 = vld [vmem:[#allocation2] sm:$0x1] }
0x1ed9   : > { %9685 = vmatprep.subr.bf16.mxu1 %v10418_v10 }
0x1edc   : > { %9686 = vmatpush3.bf16.msra.mxu1 %v10419_v34 }
0x1edd   : > { %9687 = vmatprep.subr.bf16.mxu1 %v10420_v36 }
0x1ee0   : > { %9688 = vmatpush3.bf16.msra.mxu1 %v10421_v37 }
0x1f84   : > { %v7728_v0 = vpop.f32.mrb[144].mxu0 }
0x1f85   : > { %v7793_v38 = vadd.f32 %v7792_v9, %v7728_v0  ;;  %v7730_v41 = vpop.f32.mrb[145].mxu0 }
0x1f86   : > { %v7795_v60 = vadd.f32 %v7794_v11, %v7730_v41  ;;  %v7732_v20 = vpop.f32.mrb[146].mxu0  ;;  %v7936_v21 = vpop.f32.mrb[148].mxu1 }
0x1f87   : > { %v7733_v42 = vpop.f32.mrb[147].mxu0  ;;  %v7938_v43 = vpop.f32.mrb[149].mxu1 }
0x1f88   : > { %v7940_v29 = vpop.f32.mrb[150].mxu1 }
0x1f89   : > { %v7941_v44 = vpop.f32.mrb[151].mxu1 }
0x1f8c   : > { %v7863_v4 = vpop.f32.mrb[148].mxu0 }
0x1f8d   : > { %v7870_v59 = vadd.f32 %v7863_v4, %v7793_v38  ;;  %v7865_v45 = vpop.f32.mrb[149].mxu0 }
0x1f8e   : > { %v7871_v46 = vadd.f32 %v7865_v45, %v7795_v60  ;;  %v7867_v12 = vpop.f32.mrb[150].mxu0  ;;  %v8080_v1 = vpop.f32.mrb[152].mxu1 }
0x1f8f   : > { %v7868_v61 = vpop.f32.mrb[151].mxu0  ;;  %v8082_v23 = vpop.f32.mrb[153].mxu1  ;;  %v7943_v25 = vadd.f32 %v7936_v21, %v7870_v59 }
0x1f90   : > { %v8084_v6 = vpop.f32.mrb[154].mxu1  ;;  %v7944_v47 = vadd.f32 %v7938_v43, %v7871_v46 }
0x1f91   : > { %v8085_v48 = vpop.f32.mrb[155].mxu1 }
0x1f94   : > { %v8008_v49 = vpop.f32.mrb[152].mxu0 }
0x1f95   : > { %v8015_v7 = vadd.f32 %v8008_v49, %v7943_v25  ;;  %v8010_v27 = vpop.f32.mrb[153].mxu0 }
0x1f96   : > { %v8016_v53 = vadd.f32 %v8010_v27, %v7944_v47  ;;  %v8012_v54 = vpop.f32.mrb[154].mxu0 }
0x1f97   : > { %v8013_v50 = vpop.f32.mrb[155].mxu0  ;;  %v8087_v55 = vadd.f32 %v8080_v1, %v8015_v7 }
0x1f98   : > { %v8088_v52 = vadd.f32 %v8082_v23, %v8016_v53 }
0x1f9c   : > { %v8152_v39 = vpop.f32.mrb[156].mxu0 }
0x1f9d   : > { %v8159_v5 = vadd.f32 %v8152_v39, %v8087_v55  ;;  %v8154_v58 = vpop.f32.mrb[157].mxu0 }
0x1f9e   : > { %v8160_v30 = vadd.f32 %v8154_v58, %v8088_v52  ;;  %v8156_v31 = vpop.f32.mrb[158].mxu0 }
0x1f9f   : > { %v8173_v8 = vadd.f32 %v8166_v56, %v8159_v5  ;;  %v8157_v9 = vpop.f32.mrb[159].mxu0 }
0x1fa0   : > { %v8174_v11 = vadd.f32 %v8170_v40, %v8160_v30 }
0x1fa1   : > { %v8175_v13 = vmax.f32 %v8173_v8, 0.0 }
0x1fa2   : > { %v8176_v15 = vmax.f32 %v8174_v11, 0.0 }
0x1fa3   : > { %v8177_v16 = vpack.c.bf16 %v8175_v13, %v8175_v13 }
0x1fa4   : > { %v8178_v35 = vpack.c.bf16 %v8176_v15, %v8176_v15 }
0x1fa6   : > { %8340 = vmatprep.mubr.bf16.mxu1 %v8178_v35 }
0x1fa7   : > { %8341 = vmatmul.mubr.bf16.vlgmr.msra.gmra.mrb[156].mxu1 %v8177_v16 }
0x207a   : > { %v9689_v17 = vpop.f32.mrb[156].mxu1 }
0x207b   : > { %v9690_v19 = vpop.f32.mrb[157].mxu1 }
0x207c   : > { %v9691_v22 = vadd.f32 %v9690_v19, %v9689_v17  ;;  %v9692_v24 = vpop.f32.mrb[158].mxu1 }
0x207d   : > { %v9693_v57 = vpop.f32.mrb[159].mxu1 }
0x207e   : > { %v8343_v28 = vadd.f32 %v9691_v22, %v8211_v18 }
0x2080   : > { %v8348_v32 = vmax.f32 %v8343_v28, 0.0 }
0x2082   : > { %v8349_v33 = vpack.c.bf16 %v8348_v32, %v8348_v32 }
0x2084   : > { %9997 = vmatmul.mubr.msk.bf16.vlgmr.msra.gmra.mrb[160].mxu0 %vm8383_vm10, %v8349_v33 }
0x2154   : > { %8441 = sbr.rel (!%p10756_p4) target bundleno = 8539 (0x215b), region = 176 }
0x2157   : > { %v8421_v10 = vpop.f32.mrb[160].mxu0 }
0x2158   : > { %v8422_v34 = vadd.f32 %v8421_v10, %v8358_v62  ;;  %v9998_v36 = vpop.f32.mrb[161].mxu0 }
0x2159   : > { %v8424_v2 = vpop.f32.mrb[162].mxu0 }
0x215a   : > { %8428 = vst.msk [vmem:[%s1170_s15] sm:$0x1] %vm8427_vm11, %v8422_v34  ;;  %v9999_v37 = vpop.f32.mrb[163].mxu0 }
0x215b PF: > { %p87_p8 = scmp.ge.s32.totalorder %s10746_s12, 6   ;;  %s11821_s15 = smov %s10485_s16 }
0x215c   : > { %s11822_s16 = smov %s10754_s26  ;;  %s11823_s18 = smov %s10746_s12 }
0x215d   :  { %89 = sbr.rel (!%p87_p8) target bundleno = 72 (0x48), region = 325 }

</bundles_post_ra>
